<compile_context>
chip_gen: v5e
topology: v5e:2x2
jax: 0.10.0
libtpu: 0.0.40
codegen_flags: <defaults>
</compile_context>

<pallas_src>
import functools

import jax
import jax.numpy as jnp
import numpy as np
from jax import lax
from jax.experimental import pallas as pl
from jax.experimental.pallas import tpu as pltpu


def _round_up(n: int, m: int) -> int:
    return ((n + m - 1) // m) * m


def _cdiv(a: int, b: int) -> int:
    return -(-a // b)


def _vmem_budget_bytes() -> int:
    """Generation-aware scoped-VMEM request: <=48 MiB on v7x (64 MiB/TC physical), <=96 MiB on
    v5e/v6e (128 MiB/TC), leaving headroom for Mosaic internal scratch / pipeline buffers."""
    try:
        phys = pltpu.get_tpu_info().vmem_capacity_bytes
    except Exception:  # unknown chip / interpret mode: assume the tightest (v7x) budget
        phys = 64 * 1024 * 1024
    return int(min((phys * 3) // 4, 96 * 1024 * 1024))


def _pick_row_subblock(TH: int, Wo: int, Cin: int) -> int:
    """Largest divisor of TH whose f32 depthwise accumulator stays within ~16 vregs, so the
    unrolled K*K tap loop never spills (decouples vreg pressure from the DMA tile size)."""
    def acc_vregs(rb):
        return rb * _cdiv(Wo, 8) * _cdiv(Cin, 128)
    best = 1
    for rb in range(1, TH + 1):
        if TH % rb == 0 and acc_vregs(rb) <= 16:
            best = rb
    return best


def _pick_row_tile(Ho, Wo, Wp, Cin, Cout, K, S, act_isz, out_isz, budget):
    """Largest divisor of Ho whose double-buffered halo slab + double-buffered output tile fit
    the (lane/sublane padded) VMEM budget.  Bigger tiles amortize the ~0.35us/step grid cost."""
    Cin_v, Cout_v = _round_up(Cin, 128), _round_up(Cout, 128)
    Wp_v, Wo_v = _round_up(Wp, 8), _round_up(Wo, 8)

    def fits(th):
        slab = ((th - 1) * S + K) * Wp_v * Cin_v * act_isz
        outb = th * Wo_v * Cout_v * out_isz
        return 2 * slab + 2 * outb <= budget

    best = 1
    for th in range(1, Ho + 1):
        if Ho % th == 0 and fits(th):
            best = th
    return best


def _dw_pw_tile(read_patch, wdw_ref, wpw_ref, o_ref, *, K, TH, Wo, RB):
    """Depthwise KxK (VPU, f32 accumulate) + 1x1 pointwise for one TH-row output tile.

    read_patch(rb, kh, kw) -> (RB, Wo, Cin) activation patch for row sub-block rb, tap (kh, kw).
    Rows are processed in RB-row sub-blocks so the f32 accumulator stays in a few vregs (no
    spills across the unrolled tap loop); each sub-block feeds one pointwise stage.
    """
    Cin = wdw_ref.shape[1]
    Cout = wpw_ref.shape[1]

    # Hoisted once per grid step (JAX does not CSE the per-tap cast/slice chains).
    wdw = wdw_ref[...].astype(jnp.float32)          # (K*K, Cin)
    w_taps = [wdw[i] for i in range(K * K)]         # per-tap (Cin,) rows
    wpw = wpw_ref[...]                              # compute dtype (bf16): MXU-native feed
    wpw_f32 = wpw.astype(jnp.float32)               # used by the tiny-Cin VPU pointwise

    for rb in range(TH // RB):                      # short static unroll (TH//RB is small)
        # ---- depthwise KxK: stream taps straight from VMEM, accumulate in f32 ------------
        acc = None
        for kh in range(K):
            for kw in range(K):
                term = read_patch(rb, kh, kw).astype(jnp.float32) * w_taps[kh * K + kw]
                acc = term if acc is None else acc + term          # (RB, Wo, Cin) f32

        # ---- pointwise 1x1 ---------------------------------------------------------------
        if Cin >= 32:
            # Large contraction: one MXU matmul per sub-block, fed in bf16 (MXU-native).
            # The flatten is a free relayout when Wo % 8 == 0.
            out = jnp.dot(acc.reshape(RB * Wo, Cin).astype(wpw.dtype), wpw,
                          preferred_element_type=jnp.float32).reshape(RB, Wo, Cout)
        else:
            # Tiny Cin (e.g. 4): Cin broadcast-multiply-adds on the VPU beat a padded MXU pass.
            out = None
            for ci in range(Cin):
                t = acc[..., ci:ci + 1] * wpw_f32[ci]              # (RB, Wo, Cout) f32
                out = t if out is None else out + t

        o_ref[0, rb * RB:(rb + 1) * RB] = out.astype(o_ref.dtype)


def _image_kernel(x_ref, wdw_ref, wpw_ref, o_ref, *, K, S, Ho, Wo, RB):
    """Grid = (B,). Whole padded image per step, auto-pipelined: Pallas prefetches image b+1
    while image b is computed, so the first DMA of each image is hidden (cross-batch prefetch).

    x_ref: (1, Hp, Wp, Cin)   wdw_ref: (K*K, Cin) f32   wpw_ref: (Cin, Cout)
    o_ref: (1, Ho, Wo, Cout)
    """
    def read_patch(rb, kh, kw):
        r0 = rb * RB * S + kh
        if S == 1:
            return x_ref[0, r0:r0 + RB, kw:kw + Wo, :]
        return x_ref[0, pl.ds(r0, RB, stride=S), pl.ds(kw, Wo, stride=S), :]

    _dw_pw_tile(read_patch, wdw_ref, wpw_ref, o_ref, K=K, TH=Ho, Wo=Wo, RB=RB)


def _rowtile_kernel(x_hbm, wdw_ref, wpw_ref, o_ref, slab_buf, slab_sem,
                    *, K, S, TH, Wo, RB, slab_h):
    """Grid = (batch, row_tile). Input stays in HBM (pl.ANY); a halo'd row slab is brought in
    with a manually double-buffered async copy, prefetching tile t+1 while t is computed.

    Prime at t==0 per image (only the batch axis is 'parallel', so every core sees t==0 for each
    image it owns).  WAR safety: the prefetch into slot 1-slot only overwrites the buffer that
    step t-1 read from, and those loads retired before step t began (sequential grid order).
    """
    b, t, n_t = pl.program_id(0), pl.program_id(1), pl.num_programs(1)

    def slab_copy(t_idx, slot):
        row0 = pl.multiple_of(t_idx * (TH * S), TH * S)
        return pltpu.make_async_copy(
            x_hbm.at[b, pl.ds(row0, slab_h), :, :], slab_buf.at[slot], slab_sem.at[slot])

    slot = t % 2

    @pl.when(t == 0)
    def _():
        slab_copy(t, 0).start()

    # TODO(synk): also prefetch the first slab of the next *core-local* image at t == n_t - 1;
    # needs a portable notion of the per-core grid order (review flagged blind b+1 as unsafe).
    @pl.when(t + 1 < n_t)
    def _():
        slab_copy(t + 1, 1 - slot).start()

    slab_copy(t, slot).wait()

    def read_patch(rb, kh, kw):
        r0 = rb * RB * S + kh
        if S == 1:
            return slab_buf[slot, r0:r0 + RB, kw:kw + Wo, :]
        return slab_buf[slot, pl.ds(r0, RB, stride=S), pl.ds(kw, Wo, stride=S), :]

    _dw_pw_tile(read_patch, wdw_ref, wpw_ref, o_ref, K=K, TH=TH, Wo=Wo, RB=RB)


def depthwise_separable_conv(x_nchw, w_dw, w_pw, *, stride: int, padding: int,
                             compute_dtype=jnp.bfloat16, row_tile=None):
    """x_nchw: (B, Cin, H, W); w_dw: (Cin, 1, K, K); w_pw: (Cout, Cin, 1, 1)  [torch layouts].

    compute_dtype: dtype for HBM activations / slab DMA / MXU feed (bf16 halves HBM bytes and
    runs the MXU at native rate; depthwise accumulation stays f32).  Pass jnp.float32 for
    bit-accurate f32 semantics.
    row_tile: force the row-tiled (manual halo-slab DMA) path with this many output rows per
    tile; None picks automatically (whole-image auto-pipelined path whenever it fits VMEM).
    """
    B, Cin, H, W = x_nchw.shape
    K = w_dw.shape[-1]
    Cout = w_pw.shape[0]
    S, P = int(stride), int(padding)
    Ho = (H + 2 * P - K) // S + 1
    Wo = (W + 2 * P - K) // S + 1
    Hp, Wp = H + 2 * P, W + 2 * P

    compute_dtype = np.dtype(compute_dtype)
    out_dtype = x_nchw.dtype

    # NCHW -> NHWC + spatial zero-pad, fused into one wrapper copy; channels stay REAL-sized
    # (no 128-padding of HBM activations -> no 128/Cin HBM + DMA inflation for tiny Cin).
    # TODO(synk): accept/emit NHWC at the API boundary and zero-fill halos in-kernel to drop
    # this wrapper pass and the final output transpose entirely.
    x_nhwc = jnp.pad(jnp.transpose(x_nchw, (0, 2, 3, 1)),
                     ((0, 0), (P, P), (P, P), (0, 0))).astype(compute_dtype)

    # depthwise (Cin,1,K,K) -> (K*K, Cin) f32 (tiny; taps upcast activations to f32)
    wdw_flat = jnp.transpose(w_dw[:, 0, :, :], (1, 2, 0)).reshape(K * K, Cin).astype(jnp.float32)
    # pointwise (Cout,Cin,1,1) -> (Cin, Cout), pre-cast to the MXU feed dtype
    wpw_mat = jnp.transpose(w_pw[:, :, 0, 0], (1, 0)).astype(compute_dtype)

    act_isz = compute_dtype.itemsize
    out_isz = np.dtype(out_dtype).itemsize
    budget = _vmem_budget_bytes()
    # lane/sublane-padded weight footprint (single-buffered via pipeline_mode=Buffered(1))
    w_bytes = (_round_up(K * K, 8) * _round_up(Cin, 128) * 4
               + _round_up(Cin, 8) * _round_up(Cout, 128) * act_isz)
    work_budget = budget - w_bytes - (2 << 20)           # headroom for compiler scratch

    whole_img_bytes = (2 * Hp * _round_up(Wp, 8) * _round_up(Cin, 128) * act_isz
                       + 2 * Ho * _round_up(Wo, 8) * _round_up(Cout, 128) * out_isz)

    if row_tile is None and whole_img_bytes <= work_budget:
        # ---- Path A: whole padded image per grid step, fully auto-pipelined ----------------
        RB = _pick_row_subblock(Ho, Wo, Cin)
        kernel = functools.partial(_image_kernel, K=K, S=S, Ho=Ho, Wo=Wo, RB=RB)
        out_nhwc = pl.pallas_call(
            kernel,
            out_shape=jax.ShapeDtypeStruct((B, Ho, Wo, Cout), out_dtype),
            grid_spec=pltpu.PrefetchScalarGridSpec(
                num_scalar_prefetch=0,
                grid=(B,),
                in_specs=[
                    pl.BlockSpec((1, Hp, Wp, Cin), lambda b: (b, 0, 0, 0)),
                    # Weights never change across the grid: single-buffer them (saves VMEM).
                    pl.BlockSpec((K * K, Cin), lambda b: (0, 0),
                                 pipeline_mode=pl.Buffered(1)),
                    pl.BlockSpec((Cin, Cout), lambda b: (0, 0),
                                 pipeline_mode=pl.Buffered(1)),
                ],
                out_specs=pl.BlockSpec((1, Ho, Wo, Cout), lambda b: (b, 0, 0, 0))),
            compiler_params=pltpu.CompilerParams(
                dimension_semantics=("parallel",),        # megacore: images across TCs
                vmem_limit_bytes=budget),
        )(x_nhwc, wdw_flat, wpw_mat)
        # TODO(synk): when B == 1 on v7x, add a second 'parallel' row-group axis so both
        # TensorCores stay busy (currently one core idles for B == 1).
    else:
        # ---- Path B: large images -> halo'd row-slab with manual double-buffered DMA -------
        if row_tile is not None:
            assert Ho % int(row_tile) == 0, "row_tile must divide the output height"
            TH = int(row_tile)
        else:
            TH = _pick_row_tile(Ho, Wo, Wp, Cin, Cout, K, S, act_isz, out_isz, work_budget)
        nT = Ho // TH
        slab_h = (TH - 1) * S + K                         # rows needed per tile (with halo)
        RB = _pick_row_subblock(TH, Wo, Cin)
        kernel = functools.partial(_rowtile_kernel, K=K, S=S, TH=TH, Wo=Wo, RB=RB,
                                   slab_h=slab_h)
        out_nhwc = pl.pallas_call(
            kernel,
            out_shape=jax.ShapeDtypeStruct((B, Ho, Wo, Cout), out_dtype),
            grid_spec=pltpu.PrefetchScalarGridSpec(
                num_scalar_prefetch=0,
                grid=(B, nT),
                in_specs=[
                    pl.BlockSpec(memory_space=pl.ANY),    # x stays in HBM, manual slab DMA
                    pl.BlockSpec((K * K, Cin), lambda b, t: (0, 0),
                                 pipeline_mode=pl.Buffered(1)),
                    pl.BlockSpec((Cin, Cout), lambda b, t: (0, 0),
                                 pipeline_mode=pl.Buffered(1)),
                ],
                out_specs=pl.BlockSpec((1, TH, Wo, Cout), lambda b, t: (b, t, 0, 0)),
                scratch_shapes=[
                    pltpu.VMEM((2, slab_h, Wp, Cin), compute_dtype),
                    pltpu.SemaphoreType.DMA((2,)),
                ]),
            compiler_params=pltpu.CompilerParams(
                dimension_semantics=("parallel", "arbitrary"),
                vmem_limit_bytes=budget),
        )(x_nhwc, wdw_flat, wpw_mat)

    # Real-Cout NHWC straight from the kernel; convert back to the module's NCHW convention.
    return jnp.transpose(out_nhwc, (0, 3, 1, 2))


def _reference(x_nchw, w_dw, w_pw, *, stride, padding):
    """Pure-JAX reference matching nn.Conv2d semantics (NCHW)."""
    Cin = x_nchw.shape[1]
    dn = lax.conv_dimension_numbers(x_nchw.shape, w_dw.shape, ("NCHW", "OIHW", "NCHW"))
    dw = lax.conv_general_dilated(
        x_nchw, w_dw, window_strides=(stride, stride),
        padding=[(padding, padding), (padding, padding)],
        dimension_numbers=dn, feature_group_count=Cin)
    dn2 = lax.conv_dimension_numbers(dw.shape, w_pw.shape, ("NCHW", "OIHW", "NCHW"))
    return lax.conv_general_dilated(
        dw, w_pw, window_strides=(1, 1), padding=[(0, 0), (0, 0)], dimension_numbers=dn2)


if __name__ == "__main__":
    # Module hyperparameters (small, consistent with the forward pass)
    B, Cin, Cout, H, W = 2, 4, 8, 16, 16
    K, stride, padding = 3, 1, 1

    key = jax.random.PRNGKey(0)
    kx, kdw, kpw = jax.random.split(key, 3)
    x = jax.random.normal(kx, (B, Cin, H, W), dtype=jnp.float32)
    # depthwise weight: (in_channels, 1, K, K)  (groups = in_channels)
    w_dw = jax.random.normal(kdw, (Cin, 1, K, K), dtype=jnp.float32) * 0.1
    # pointwise weight: (out_channels, in_channels, 1, 1)
    w_pw = jax.random.normal(kpw, (Cout, Cin, 1, 1), dtype=jnp.float32) * 0.1

    ref = _reference(x, w_dw, w_pw, stride=stride, padding=padding)

    # 1) default bf16 activations (f32 accumulate) on the whole-image auto-pipelined path
    out = jax.block_until_ready(
        depthwise_separable_conv(x, w_dw, w_pw, stride=stride, padding=padding))
    np.testing.assert_allclose(np.asarray(out), np.asarray(ref), rtol=2e-2, atol=3e-3)

    # 2) full f32 path: bit-accurate semantics of the PyTorch module
    out_f32 = jax.block_until_ready(
        depthwise_separable_conv(x, w_dw, w_pw, stride=stride, padding=padding,
                                 compute_dtype=jnp.float32))
    np.testing.assert_allclose(np.asarray(out_f32), np.asarray(ref), rtol=1e-5, atol=1e-5)

    # 3) larger image with a forced row tile to exercise the manual halo-slab DMA pipeline
    H2 = W2 = 32
    x2 = jax.random.normal(kx, (B, Cin, H2, W2), dtype=jnp.float32)
    ref2 = _reference(x2, w_dw, w_pw, stride=stride, padding=padding)
    out2 = jax.block_until_ready(
        depthwise_separable_conv(x2, w_dw, w_pw, stride=stride, padding=padding, row_tile=8))
    np.testing.assert_allclose(np.asarray(out2), np.asarray(ref2), rtol=2e-2, atol=3e-3)

    print("KERNEL_OK")
</pallas_src>

<mosaic_0001>
module attributes {stable_mosaic.version = 11 : i64} {
  func.func @_image_kernel(%arg0: i32, %arg1: memref<1x18x18x4xbf16, #tpu.memory_space<vmem>>, %arg2: memref<9x4xf32, #tpu.memory_space<vmem>>, %arg3: memref<4x8xbf16, #tpu.memory_space<vmem>>, %arg4: memref<1x16x16x8xf32, #tpu.memory_space<vmem>>) attributes {dimension_semantics = [#tpu.dimension_semantics<parallel>], iteration_bounds = array<i64: 2>, scalar_prefetch = 0 : i64, scratch_operands = 0 : i64, tpu.core_type = #tpu.core_type<tc>, window_params = [{transform_indices = @transform_0, window_bounds = array<i64: 1, 18, 18, 4>}, {pipeline_mode = #tpu.pipeline_mode<synchronous>, transform_indices = @transform_1, window_bounds = array<i64: 9, 4>}, {pipeline_mode = #tpu.pipeline_mode<synchronous>, transform_indices = @transform_2, window_bounds = array<i64: 4, 8>}, {transform_indices = @transform_3, window_bounds = array<i64: 1, 16, 16, 8>}]} {
    %c0 = arith.constant 0 : index
    %c0_0 = arith.constant 0 : index
    %0 = vector.load %arg2[%c0, %c0_0] : memref<9x4xf32, #tpu.memory_space<vmem>>, vector<9x4xf32>
    %1 = vector.extract_strided_slice %0 {offsets = [0, 0], sizes = [1, 4], strides = [1, 1]} : vector<9x4xf32> to vector<1x4xf32>
    %2 = vector.shape_cast %1 : vector<1x4xf32> to vector<4xf32>
    %3 = vector.extract_strided_slice %0 {offsets = [1, 0], sizes = [1, 4], strides = [1, 1]} : vector<9x4xf32> to vector<1x4xf32>
    %4 = vector.shape_cast %3 : vector<1x4xf32> to vector<4xf32>
    %5 = vector.extract_strided_slice %0 {offsets = [2, 0], sizes = [1, 4], strides = [1, 1]} : vector<9x4xf32> to vector<1x4xf32>
    %6 = vector.shape_cast %5 : vector<1x4xf32> to vector<4xf32>
    %7 = vector.extract_strided_slice %0 {offsets = [3, 0], sizes = [1, 4], strides = [1, 1]} : vector<9x4xf32> to vector<1x4xf32>
    %8 = vector.shape_cast %7 : vector<1x4xf32> to vector<4xf32>
    %9 = vector.extract_strided_slice %0 {offsets = [4, 0], sizes = [1, 4], strides = [1, 1]} : vector<9x4xf32> to vector<1x4xf32>
    %10 = vector.shape_cast %9 : vector<1x4xf32> to vector<4xf32>
    %11 = vector.extract_strided_slice %0 {offsets = [5, 0], sizes = [1, 4], strides = [1, 1]} : vector<9x4xf32> to vector<1x4xf32>
    %12 = vector.shape_cast %11 : vector<1x4xf32> to vector<4xf32>
    %13 = vector.extract_strided_slice %0 {offsets = [6, 0], sizes = [1, 4], strides = [1, 1]} : vector<9x4xf32> to vector<1x4xf32>
    %14 = vector.shape_cast %13 : vector<1x4xf32> to vector<4xf32>
    %15 = vector.extract_strided_slice %0 {offsets = [7, 0], sizes = [1, 4], strides = [1, 1]} : vector<9x4xf32> to vector<1x4xf32>
    %16 = vector.shape_cast %15 : vector<1x4xf32> to vector<4xf32>
    %17 = vector.extract_strided_slice %0 {offsets = [8, 0], sizes = [1, 4], strides = [1, 1]} : vector<9x4xf32> to vector<1x4xf32>
    %18 = vector.shape_cast %17 : vector<1x4xf32> to vector<4xf32>
    %c0_1 = arith.constant 0 : index
    %c0_2 = arith.constant 0 : index
    %19 = vector.load %arg3[%c0_1, %c0_2] : memref<4x8xbf16, #tpu.memory_space<vmem>>, vector<4x8xbf16>
    %20 = arith.extf %19 : vector<4x8xbf16> to vector<4x8xf32>
    %c0_3 = arith.constant 0 : index
    %c0_4 = arith.constant 0 : index
    %c0_5 = arith.constant 0 : index
    %c0_6 = arith.constant 0 : index
    %21 = vector.load %arg1[%c0_3, %c0_4, %c0_5, %c0_6] : memref<1x18x18x4xbf16, #tpu.memory_space<vmem>>, vector<1x8x16x4xbf16>
    %22 = vector.shape_cast %21 : vector<1x8x16x4xbf16> to vector<8x16x4xbf16>
    %23 = arith.extf %22 : vector<8x16x4xbf16> to vector<8x16x4xf32>
    %24 = vector.shape_cast %2 : vector<4xf32> to vector<1x1x4xf32>
    %25 = vector.broadcast %24 : vector<1x1x4xf32> to vector<8x16x4xf32>
    %26 = arith.mulf %23, %25 : vector<8x16x4xf32>
    %c0_7 = arith.constant 0 : index
    %c0_8 = arith.constant 0 : index
    %c1 = arith.constant 1 : index
    %c0_9 = arith.constant 0 : index
    %27 = vector.load %arg1[%c0_7, %c0_8, %c1, %c0_9] : memref<1x18x18x4xbf16, #tpu.memory_space<vmem>>, vector<1x8x16x4xbf16>
    %28 = vector.shape_cast %27 : vector<1x8x16x4xbf16> to vector<8x16x4xbf16>
    %29 = arith.extf %28 : vector<8x16x4xbf16> to vector<8x16x4xf32>
    %30 = vector.shape_cast %4 : vector<4xf32> to vector<1x1x4xf32>
    %31 = vector.broadcast %30 : vector<1x1x4xf32> to vector<8x16x4xf32>
    %32 = arith.mulf %29, %31 : vector<8x16x4xf32>
    %33 = arith.addf %26, %32 : vector<8x16x4xf32>
    %c0_10 = arith.constant 0 : index
    %c0_11 = arith.constant 0 : index
    %c2 = arith.constant 2 : index
    %c0_12 = arith.constant 0 : index
    %34 = vector.load %arg1[%c0_10, %c0_11, %c2, %c0_12] : memref<1x18x18x4xbf16, #tpu.memory_space<vmem>>, vector<1x8x16x4xbf16>
    %35 = vector.shape_cast %34 : vector<1x8x16x4xbf16> to vector<8x16x4xbf16>
    %36 = arith.extf %35 : vector<8x16x4xbf16> to vector<8x16x4xf32>
    %37 = vector.shape_cast %6 : vector<4xf32> to vector<1x1x4xf32>
    %38 = vector.broadcast %37 : vector<1x1x4xf32> to vector<8x16x4xf32>
    %39 = arith.mulf %36, %38 : vector<8x16x4xf32>
    %40 = arith.addf %33, %39 : vector<8x16x4xf32>
    %c0_13 = arith.constant 0 : index
    %c1_14 = arith.constant 1 : index
    %c0_15 = arith.constant 0 : index
    %c0_16 = arith.constant 0 : index
    %41 = vector.load %arg1[%c0_13, %c1_14, %c0_15, %c0_16] : memref<1x18x18x4xbf16, #tpu.memory_space<vmem>>, vector<1x8x16x4xbf16>
    %42 = vector.shape_cast %41 : vector<1x8x16x4xbf16> to vector<8x16x4xbf16>
    %43 = arith.extf %42 : vector<8x16x4xbf16> to vector<8x16x4xf32>
    %44 = vector.shape_cast %8 : vector<4xf32> to vector<1x1x4xf32>
    %45 = vector.broadcast %44 : vector<1x1x4xf32> to vector<8x16x4xf32>
    %46 = arith.mulf %43, %45 : vector<8x16x4xf32>
    %47 = arith.addf %40, %46 : vector<8x16x4xf32>
    %c0_17 = arith.constant 0 : index
    %c1_18 = arith.constant 1 : index
    %c1_19 = arith.constant 1 : index
    %c0_20 = arith.constant 0 : index
    %48 = vector.load %arg1[%c0_17, %c1_18, %c1_19, %c0_20] : memref<1x18x18x4xbf16, #tpu.memory_space<vmem>>, vector<1x8x16x4xbf16>
    %49 = vector.shape_cast %48 : vector<1x8x16x4xbf16> to vector<8x16x4xbf16>
    %50 = arith.extf %49 : vector<8x16x4xbf16> to vector<8x16x4xf32>
    %51 = vector.shape_cast %10 : vector<4xf32> to vector<1x1x4xf32>
    %52 = vector.broadcast %51 : vector<1x1x4xf32> to vector<8x16x4xf32>
    %53 = arith.mulf %50, %52 : vector<8x16x4xf32>
    %54 = arith.addf %47, %53 : vector<8x16x4xf32>
    %c0_21 = arith.constant 0 : index
    %c1_22 = arith.constant 1 : index
    %c2_23 = arith.constant 2 : index
    %c0_24 = arith.constant 0 : index
    %55 = vector.load %arg1[%c0_21, %c1_22, %c2_23, %c0_24] : memref<1x18x18x4xbf16, #tpu.memory_space<vmem>>, vector<1x8x16x4xbf16>
    %56 = vector.shape_cast %55 : vector<1x8x16x4xbf16> to vector<8x16x4xbf16>
    %57 = arith.extf %56 : vector<8x16x4xbf16> to vector<8x16x4xf32>
    %58 = vector.shape_cast %12 : vector<4xf32> to vector<1x1x4xf32>
    %59 = vector.broadcast %58 : vector<1x1x4xf32> to vector<8x16x4xf32>
    %60 = arith.mulf %57, %59 : vector<8x16x4xf32>
    %61 = arith.addf %54, %60 : vector<8x16x4xf32>
    %c0_25 = arith.constant 0 : index
    %c2_26 = arith.constant 2 : index
    %c0_27 = arith.constant 0 : index
    %c0_28 = arith.constant 0 : index
    %62 = vector.load %arg1[%c0_25, %c2_26, %c0_27, %c0_28] : memref<1x18x18x4xbf16, #tpu.memory_space<vmem>>, vector<1x8x16x4xbf16>
    %63 = vector.shape_cast %62 : vector<1x8x16x4xbf16> to vector<8x16x4xbf16>
    %64 = arith.extf %63 : vector<8x16x4xbf16> to vector<8x16x4xf32>
    %65 = vector.shape_cast %14 : vector<4xf32> to vector<1x1x4xf32>
    %66 = vector.broadcast %65 : vector<1x1x4xf32> to vector<8x16x4xf32>
    %67 = arith.mulf %64, %66 : vector<8x16x4xf32>
    %68 = arith.addf %61, %67 : vector<8x16x4xf32>
    %c0_29 = arith.constant 0 : index
    %c2_30 = arith.constant 2 : index
    %c1_31 = arith.constant 1 : index
    %c0_32 = arith.constant 0 : index
    %69 = vector.load %arg1[%c0_29, %c2_30, %c1_31, %c0_32] : memref<1x18x18x4xbf16, #tpu.memory_space<vmem>>, vector<1x8x16x4xbf16>
    %70 = vector.shape_cast %69 : vector<1x8x16x4xbf16> to vector<8x16x4xbf16>
    %71 = arith.extf %70 : vector<8x16x4xbf16> to vector<8x16x4xf32>
    %72 = vector.shape_cast %16 : vector<4xf32> to vector<1x1x4xf32>
    %73 = vector.broadcast %72 : vector<1x1x4xf32> to vector<8x16x4xf32>
    %74 = arith.mulf %71, %73 : vector<8x16x4xf32>
    %75 = arith.addf %68, %74 : vector<8x16x4xf32>
    %c0_33 = arith.constant 0 : index
    %c2_34 = arith.constant 2 : index
    %c2_35 = arith.constant 2 : index
    %c0_36 = arith.constant 0 : index
    %76 = vector.load %arg1[%c0_33, %c2_34, %c2_35, %c0_36] : memref<1x18x18x4xbf16, #tpu.memory_space<vmem>>, vector<1x8x16x4xbf16>
    %77 = vector.shape_cast %76 : vector<1x8x16x4xbf16> to vector<8x16x4xbf16>
    %78 = arith.extf %77 : vector<8x16x4xbf16> to vector<8x16x4xf32>
    %79 = vector.shape_cast %18 : vector<4xf32> to vector<1x1x4xf32>
    %80 = vector.broadcast %79 : vector<1x1x4xf32> to vector<8x16x4xf32>
    %81 = arith.mulf %78, %80 : vector<8x16x4xf32>
    %82 = arith.addf %75, %81 : vector<8x16x4xf32>
    %83 = vector.extract_strided_slice %82 {offsets = [0, 0, 0], sizes = [8, 16, 1], strides = [1, 1, 1]} : vector<8x16x4xf32> to vector<8x16x1xf32>
    %84 = vector.extract_strided_slice %20 {offsets = [0, 0], sizes = [1, 8], strides = [1, 1]} : vector<4x8xf32> to vector<1x8xf32>
    %85 = vector.shape_cast %84 : vector<1x8xf32> to vector<8xf32>
    %86 = vector.shape_cast %85 : vector<8xf32> to vector<1x1x8xf32>
    %87 = vector.broadcast %83 : vector<8x16x1xf32> to vector<8x16x8xf32>
    %88 = vector.broadcast %86 : vector<1x1x8xf32> to vector<8x16x8xf32>
    %89 = arith.mulf %87, %88 : vector<8x16x8xf32>
    %90 = vector.extract_strided_slice %82 {offsets = [0, 0, 1], sizes = [8, 16, 1], strides = [1, 1, 1]} : vector<8x16x4xf32> to vector<8x16x1xf32>
    %91 = vector.extract_strided_slice %20 {offsets = [1, 0], sizes = [1, 8], strides = [1, 1]} : vector<4x8xf32> to vector<1x8xf32>
    %92 = vector.shape_cast %91 : vector<1x8xf32> to vector<8xf32>
    %93 = vector.shape_cast %92 : vector<8xf32> to vector<1x1x8xf32>
    %94 = vector.broadcast %90 : vector<8x16x1xf32> to vector<8x16x8xf32>
    %95 = vector.broadcast %93 : vector<1x1x8xf32> to vector<8x16x8xf32>
    %96 = arith.mulf %94, %95 : vector<8x16x8xf32>
    %97 = arith.addf %89, %96 : vector<8x16x8xf32>
    %98 = vector.extract_strided_slice %82 {offsets = [0, 0, 2], sizes = [8, 16, 1], strides = [1, 1, 1]} : vector<8x16x4xf32> to vector<8x16x1xf32>
    %99 = vector.extract_strided_slice %20 {offsets = [2, 0], sizes = [1, 8], strides = [1, 1]} : vector<4x8xf32> to vector<1x8xf32>
    %100 = vector.shape_cast %99 : vector<1x8xf32> to vector<8xf32>
    %101 = vector.shape_cast %100 : vector<8xf32> to vector<1x1x8xf32>
    %102 = vector.broadcast %98 : vector<8x16x1xf32> to vector<8x16x8xf32>
    %103 = vector.broadcast %101 : vector<1x1x8xf32> to vector<8x16x8xf32>
    %104 = arith.mulf %102, %103 : vector<8x16x8xf32>
    %105 = arith.addf %97, %104 : vector<8x16x8xf32>
    %106 = vector.extract_strided_slice %82 {offsets = [0, 0, 3], sizes = [8, 16, 1], strides = [1, 1, 1]} : vector<8x16x4xf32> to vector<8x16x1xf32>
    %107 = vector.extract_strided_slice %20 {offsets = [3, 0], sizes = [1, 8], strides = [1, 1]} : vector<4x8xf32> to vector<1x8xf32>
    %108 = vector.shape_cast %107 : vector<1x8xf32> to vector<8xf32>
    %109 = vector.shape_cast %108 : vector<8xf32> to vector<1x1x8xf32>
    %110 = vector.broadcast %106 : vector<8x16x1xf32> to vector<8x16x8xf32>
    %111 = vector.broadcast %109 : vector<1x1x8xf32> to vector<8x16x8xf32>
    %112 = arith.mulf %110, %111 : vector<8x16x8xf32>
    %113 = arith.addf %105, %112 : vector<8x16x8xf32>
    %c0_37 = arith.constant 0 : index
    %c0_38 = arith.constant 0 : index
    %c0_39 = arith.constant 0 : index
    %c0_40 = arith.constant 0 : index
    %114 = vector.load %arg4[%c0_37, %c0_38, %c0_39, %c0_40] : memref<1x16x16x8xf32, #tpu.memory_space<vmem>>, vector<1x8x16x8xf32>
    %115 = vector.shape_cast %114 : vector<1x8x16x8xf32> to vector<8x16x8xf32>
    %116 = vector.shape_cast %113 : vector<8x16x8xf32> to vector<1x8x16x8xf32>
    tpu.vector_store %arg4[%c0_37, %c0_38, %c0_39, %c0_40], %116 {strides = array<i32>} : memref<1x16x16x8xf32, #tpu.memory_space<vmem>>, vector<1x8x16x8xf32>,
    %c0_41 = arith.constant 0 : index
    %c8 = arith.constant 8 : index
    %c0_42 = arith.constant 0 : index
    %c0_43 = arith.constant 0 : index
    %117 = vector.load %arg1[%c0_41, %c8, %c0_42, %c0_43] : memref<1x18x18x4xbf16, #tpu.memory_space<vmem>>, vector<1x8x16x4xbf16>
    %118 = vector.shape_cast %117 : vector<1x8x16x4xbf16> to vector<8x16x4xbf16>
    %119 = arith.extf %118 : vector<8x16x4xbf16> to vector<8x16x4xf32>
    %120 = vector.shape_cast %2 : vector<4xf32> to vector<1x1x4xf32>
    %121 = vector.broadcast %120 : vector<1x1x4xf32> to vector<8x16x4xf32>
    %122 = arith.mulf %119, %121 : vector<8x16x4xf32>
    %c0_44 = arith.constant 0 : index
    %c8_45 = arith.constant 8 : index
    %c1_46 = arith.constant 1 : index
    %c0_47 = arith.constant 0 : index
    %123 = vector.load %arg1[%c0_44, %c8_45, %c1_46, %c0_47] : memref<1x18x18x4xbf16, #tpu.memory_space<vmem>>, vector<1x8x16x4xbf16>
    %124 = vector.shape_cast %123 : vector<1x8x16x4xbf16> to vector<8x16x4xbf16>
    %125 = arith.extf %124 : vector<8x16x4xbf16> to vector<8x16x4xf32>
    %126 = vector.shape_cast %4 : vector<4xf32> to vector<1x1x4xf32>
    %127 = vector.broadcast %126 : vector<1x1x4xf32> to vector<8x16x4xf32>
    %128 = arith.mulf %125, %127 : vector<8x16x4xf32>
    %129 = arith.addf %122, %128 : vector<8x16x4xf32>
    %c0_48 = arith.constant 0 : index
    %c8_49 = arith.constant 8 : index
    %c2_50 = arith.constant 2 : index
    %c0_51 = arith.constant 0 : index
    %130 = vector.load %arg1[%c0_48, %c8_49, %c2_50, %c0_51] : memref<1x18x18x4xbf16, #tpu.memory_space<vmem>>, vector<1x8x16x4xbf16>
    %131 = vector.shape_cast %130 : vector<1x8x16x4xbf16> to vector<8x16x4xbf16>
    %132 = arith.extf %131 : vector<8x16x4xbf16> to vector<8x16x4xf32>
    %133 = vector.shape_cast %6 : vector<4xf32> to vector<1x1x4xf32>
    %134 = vector.broadcast %133 : vector<1x1x4xf32> to vector<8x16x4xf32>
    %135 = arith.mulf %132, %134 : vector<8x16x4xf32>
    %136 = arith.addf %129, %135 : vector<8x16x4xf32>
    %c0_52 = arith.constant 0 : index
    %c9 = arith.constant 9 : index
    %c0_53 = arith.constant 0 : index
    %c0_54 = arith.constant 0 : index
    %137 = vector.load %arg1[%c0_52, %c9, %c0_53, %c0_54] : memref<1x18x18x4xbf16, #tpu.memory_space<vmem>>, vector<1x8x16x4xbf16>
    %138 = vector.shape_cast %137 : vector<1x8x16x4xbf16> to vector<8x16x4xbf16>
    %139 = arith.extf %138 : vector<8x16x4xbf16> to vector<8x16x4xf32>
    %140 = vector.shape_cast %8 : vector<4xf32> to vector<1x1x4xf32>
    %141 = vector.broadcast %140 : vector<1x1x4xf32> to vector<8x16x4xf32>
    %142 = arith.mulf %139, %141 : vector<8x16x4xf32>
    %143 = arith.addf %136, %142 : vector<8x16x4xf32>
    %c0_55 = arith.constant 0 : index
    %c9_56 = arith.constant 9 : index
    %c1_57 = arith.constant 1 : index
    %c0_58 = arith.constant 0 : index
    %144 = vector.load %arg1[%c0_55, %c9_56, %c1_57, %c0_58] : memref<1x18x18x4xbf16, #tpu.memory_space<vmem>>, vector<1x8x16x4xbf16>
    %145 = vector.shape_cast %144 : vector<1x8x16x4xbf16> to vector<8x16x4xbf16>
    %146 = arith.extf %145 : vector<8x16x4xbf16> to vector<8x16x4xf32>
    %147 = vector.shape_cast %10 : vector<4xf32> to vector<1x1x4xf32>
    %148 = vector.broadcast %147 : vector<1x1x4xf32> to vector<8x16x4xf32>
    %149 = arith.mulf %146, %148 : vector<8x16x4xf32>
    %150 = arith.addf %143, %149 : vector<8x16x4xf32>
    %c0_59 = arith.constant 0 : index
    %c9_60 = arith.constant 9 : index
    %c2_61 = arith.constant 2 : index
    %c0_62 = arith.constant 0 : index
    %151 = vector.load %arg1[%c0_59, %c9_60, %c2_61, %c0_62] : memref<1x18x18x4xbf16, #tpu.memory_space<vmem>>, vector<1x8x16x4xbf16>
    %152 = vector.shape_cast %151 : vector<1x8x16x4xbf16> to vector<8x16x4xbf16>
    %153 = arith.extf %152 : vector<8x16x4xbf16> to vector<8x16x4xf32>
    %154 = vector.shape_cast %12 : vector<4xf32> to vector<1x1x4xf32>
    %155 = vector.broadcast %154 : vector<1x1x4xf32> to vector<8x16x4xf32>
    %156 = arith.mulf %153, %155 : vector<8x16x4xf32>
    %157 = arith.addf %150, %156 : vector<8x16x4xf32>
    %c0_63 = arith.constant 0 : index
    %c10 = arith.constant 10 : index
    %c0_64 = arith.constant 0 : index
    %c0_65 = arith.constant 0 : index
    %158 = vector.load %arg1[%c0_63, %c10, %c0_64, %c0_65] : memref<1x18x18x4xbf16, #tpu.memory_space<vmem>>, vector<1x8x16x4xbf16>
    %159 = vector.shape_cast %158 : vector<1x8x16x4xbf16> to vector<8x16x4xbf16>
    %160 = arith.extf %159 : vector<8x16x4xbf16> to vector<8x16x4xf32>
    %161 = vector.shape_cast %14 : vector<4xf32> to vector<1x1x4xf32>
    %162 = vector.broadcast %161 : vector<1x1x4xf32> to vector<8x16x4xf32>
    %163 = arith.mulf %160, %162 : vector<8x16x4xf32>
    %164 = arith.addf %157, %163 : vector<8x16x4xf32>
    %c0_66 = arith.constant 0 : index
    %c10_67 = arith.constant 10 : index
    %c1_68 = arith.constant 1 : index
    %c0_69 = arith.constant 0 : index
    %165 = vector.load %arg1[%c0_66, %c10_67, %c1_68, %c0_69] : memref<1x18x18x4xbf16, #tpu.memory_space<vmem>>, vector<1x8x16x4xbf16>
    %166 = vector.shape_cast %165 : vector<1x8x16x4xbf16> to vector<8x16x4xbf16>
    %167 = arith.extf %166 : vector<8x16x4xbf16> to vector<8x16x4xf32>
    %168 = vector.shape_cast %16 : vector<4xf32> to vector<1x1x4xf32>
    %169 = vector.broadcast %168 : vector<1x1x4xf32> to vector<8x16x4xf32>
    %170 = arith.mulf %167, %169 : vector<8x16x4xf32>
    %171 = arith.addf %164, %170 : vector<8x16x4xf32>
    %c0_70 = arith.constant 0 : index
    %c10_71 = arith.constant 10 : index
    %c2_72 = arith.constant 2 : index
    %c0_73 = arith.constant 0 : index
    %172 = vector.load %arg1[%c0_70, %c10_71, %c2_72, %c0_73] : memref<1x18x18x4xbf16, #tpu.memory_space<vmem>>, vector<1x8x16x4xbf16>
    %173 = vector.shape_cast %172 : vector<1x8x16x4xbf16> to vector<8x16x4xbf16>
    %174 = arith.extf %173 : vector<8x16x4xbf16> to vector<8x16x4xf32>
    %175 = vector.shape_cast %18 : vector<4xf32> to vector<1x1x4xf32>
    %176 = vector.broadcast %175 : vector<1x1x4xf32> to vector<8x16x4xf32>
    %177 = arith.mulf %174, %176 : vector<8x16x4xf32>
    %178 = arith.addf %171, %177 : vector<8x16x4xf32>
    %179 = vector.extract_strided_slice %178 {offsets = [0, 0, 0], sizes = [8, 16, 1], strides = [1, 1, 1]} : vector<8x16x4xf32> to vector<8x16x1xf32>
    %180 = vector.extract_strided_slice %20 {offsets = [0, 0], sizes = [1, 8], strides = [1, 1]} : vector<4x8xf32> to vector<1x8xf32>
    %181 = vector.shape_cast %180 : vector<1x8xf32> to vector<8xf32>
    %182 = vector.shape_cast %181 : vector<8xf32> to vector<1x1x8xf32>
    %183 = vector.broadcast %179 : vector<8x16x1xf32> to vector<8x16x8xf32>
    %184 = vector.broadcast %182 : vector<1x1x8xf32> to vector<8x16x8xf32>
    %185 = arith.mulf %183, %184 : vector<8x16x8xf32>
    %186 = vector.extract_strided_slice %178 {offsets = [0, 0, 1], sizes = [8, 16, 1], strides = [1, 1, 1]} : vector<8x16x4xf32> to vector<8x16x1xf32>
    %187 = vector.extract_strided_slice %20 {offsets = [1, 0], sizes = [1, 8], strides = [1, 1]} : vector<4x8xf32> to vector<1x8xf32>
    %188 = vector.shape_cast %187 : vector<1x8xf32> to vector<8xf32>
    %189 = vector.shape_cast %188 : vector<8xf32> to vector<1x1x8xf32>
    %190 = vector.broadcast %186 : vector<8x16x1xf32> to vector<8x16x8xf32>
    %191 = vector.broadcast %189 : vector<1x1x8xf32> to vector<8x16x8xf32>
    %192 = arith.mulf %190, %191 : vector<8x16x8xf32>
    %193 = arith.addf %185, %192 : vector<8x16x8xf32>
    %194 = vector.extract_strided_slice %178 {offsets = [0, 0, 2], sizes = [8, 16, 1], strides = [1, 1, 1]} : vector<8x16x4xf32> to vector<8x16x1xf32>
    %195 = vector.extract_strided_slice %20 {offsets = [2, 0], sizes = [1, 8], strides = [1, 1]} : vector<4x8xf32> to vector<1x8xf32>
    %196 = vector.shape_cast %195 : vector<1x8xf32> to vector<8xf32>
    %197 = vector.shape_cast %196 : vector<8xf32> to vector<1x1x8xf32>
    %198 = vector.broadcast %194 : vector<8x16x1xf32> to vector<8x16x8xf32>
    %199 = vector.broadcast %197 : vector<1x1x8xf32> to vector<8x16x8xf32>
    %200 = arith.mulf %198, %199 : vector<8x16x8xf32>
    %201 = arith.addf %193, %200 : vector<8x16x8xf32>
    %202 = vector.extract_strided_slice %178 {offsets = [0, 0, 3], sizes = [8, 16, 1], strides = [1, 1, 1]} : vector<8x16x4xf32> to vector<8x16x1xf32>
    %203 = vector.extract_strided_slice %20 {offsets = [3, 0], sizes = [1, 8], strides = [1, 1]} : vector<4x8xf32> to vector<1x8xf32>
    %204 = vector.shape_cast %203 : vector<1x8xf32> to vector<8xf32>
    %205 = vector.shape_cast %204 : vector<8xf32> to vector<1x1x8xf32>
    %206 = vector.broadcast %202 : vector<8x16x1xf32> to vector<8x16x8xf32>
    %207 = vector.broadcast %205 : vector<1x1x8xf32> to vector<8x16x8xf32>
    %208 = arith.mulf %206, %207 : vector<8x16x8xf32>
    %209 = arith.addf %201, %208 : vector<8x16x8xf32>
    %c0_74 = arith.constant 0 : index
    %c8_75 = arith.constant 8 : index
    %c0_76 = arith.constant 0 : index
    %c0_77 = arith.constant 0 : index
    %210 = vector.load %arg4[%c0_74, %c8_75, %c0_76, %c0_77] : memref<1x16x16x8xf32, #tpu.memory_space<vmem>>, vector<1x8x16x8xf32>
    %211 = vector.shape_cast %210 : vector<1x8x16x8xf32> to vector<8x16x8xf32>
    %212 = vector.shape_cast %209 : vector<8x16x8xf32> to vector<1x8x16x8xf32>
    tpu.vector_store %arg4[%c0_74, %c8_75, %c0_76, %c0_77], %212 {strides = array<i32>} : memref<1x16x16x8xf32, #tpu.memory_space<vmem>>, vector<1x8x16x8xf32>,
    return
  }
  func.func @transform_0(%arg0: i32) -> (i32, i32, i32, i32) {
    %c0_i32 = arith.constant 0 : i32
    %c0_i32_0 = arith.constant 0 : i32
    %c0_i32_1 = arith.constant 0 : i32
    %c0_i32_2 = arith.constant 0 : i32
    return %arg0, %c0_i32, %c0_i32_0, %c0_i32_1 : i32, i32, i32, i32
  }
  func.func @transform_1(%arg0: i32) -> (i32, i32) {
    %c0_i32 = arith.constant 0 : i32
    %c0_i32_0 = arith.constant 0 : i32
    %c0_i32_1 = arith.constant 0 : i32
    return %c0_i32, %c0_i32_0 : i32, i32
  }
  func.func @transform_2(%arg0: i32) -> (i32, i32) {
    %c0_i32 = arith.constant 0 : i32
    %c0_i32_0 = arith.constant 0 : i32
    %c0_i32_1 = arith.constant 0 : i32
    return %c0_i32, %c0_i32_0 : i32, i32
  }
  func.func @transform_3(%arg0: i32) -> (i32, i32, i32, i32) {
    %c0_i32 = arith.constant 0 : i32
    %c0_i32_0 = arith.constant 0 : i32
    %c0_i32_1 = arith.constant 0 : i32
    %c0_i32_2 = arith.constant 0 : i32
    return %arg0, %c0_i32, %c0_i32_0, %c0_i32_1 : i32, i32, i32, i32
  }
}

</mosaic_0001>

<bundles_post_ra>
// kernel: tpu_custom_call.1
= control target key start
LH: loop header
LB: loop body
LE: loop exit
PB: predicated region body
PF: predicated region fallthrough
CT: control target
= control target key end

     0   :  { %s3412_s12 = smov 0   ;;  %s5687_s0 = inlined_call_operand.vmem [shape: bf16[2,18,18,4], index: 0, kind: input, shape index: {}]   ;;  %s5688_s1 = inlined_call_operand.vmem [shape: f32[9,4], index: 1, kind: input, shape index: {}]   ;;  %s5689_s2 = inlined_call_operand.vmem [shape: bf16[4,8], index: 2, kind: input, shape index: {}]   ;;  %s5690_s3 = inlined_call_operand.vmem [shape: f32[2,16,16,8], index: 3, kind: output, shape index: {}]  }
   0x1 LB: > { %s3036_s13 = sadd.s32 4294967295, %s3386_s12   ;;  %p3040_p0 = scmp.ge.s32.totalorder %s3386_s12, 1  ;;  %s3386_s12 = sphi %s3412_s12, %s13_s12  }
   0x2   : > { %p137_p1 = scmp.lt.s32.totalorder %s3386_s12, 3 }
   0x4   : > { %p138_p2 = pnand %p3040_p0, %p137_p1 }
   0x6   : > { %141 = sbr.rel (%p138_p2) target bundleno = 629 (0x275), region = 32 }
   0xb   : > { %p161_p3 = scmp.lt.s32.totalorder %s3036_s13, 1  ;;  %v5691_v0 = vmov 0   ;;  %v171_v1 = vld [vmem:[%s5688_s1] sm:$0xff]  ;;  %vm289_vm0 = vcmask 1046528   ;;  %vm427_vm1 = vcmask 1045504   ;;  %vm1568_vm2 = vcmask 64512  }
   0xc   : > { %3357 = vset.pattern.permute.xlu2 %v5691_v0  ;;  %3356 = vset.pattern.permute.xlu1 %v5691_v0  ;;  %v3429_v2 = vperm.slane %v171_v1, 0  ;;  %v3431_v3 = vperm.slane %v171_v1, 1  ;;  %v3433_v4 = vperm.slane %v171_v1, 2  ;;  %v3440_v5 = vperm.slane %v171_v1, 3  ;;  %v3489_v35 = vld [vmem:[%s5688_s1 + $0x8] ss:$0 sm:$0xff] }
   0xd   : > { %3355 = vset.pattern.permute.xlu0 %v5691_v0  ;;  %s6078_s13 = smov (!%p161_p3, %s3036_s13), 1  ;;  %v3442_v6 = vperm.slane %v171_v1, 4  ;;  %v3444_v7 = vperm.slane %v171_v1, 5  ;;  %v3449_v11 = vperm.slane %v171_v1, 6  ;;  %v3451_v12 = vperm.slane %v171_v1, 7 }
   0xe   : > { %s3342_s16 = smul.u32 216, %s6078_s13  ;;  %s3222_s28 = sshll.u32 %s6078_s13, 8 }
   0xf   : > { %s5329_s4 = scalar_lea.vmem %s5690_s3, %s3222_s28 }
  0x10   : > { %s3438_s19 = scalar_lea.vmem %s5687_s0, %s3342_s16 }
  0x11   : > { %v3319_v8 = vld [vmem:[%s3438_s19 + $0x18] sm:$0xff]   ;;  %v3048_v10 = vld [vmem:[%s3438_s19 + $0x24] sm:$0xff]   ;;  %v3327_v18 = vld [vmem:[%s3438_s19 + $0x30] sm:$0xff]  }
  0x12   : > { %v364_v9 = vld [vmem:[%s3438_s19 + $0x18] sm:$0xe]  ;;  %v3453_v13 = vunpack.c.l.bf16 %v3319_v8  ;;  %v3455_v14 = vunpack.c.h.bf16 %v3319_v8  ;;  %v521_v16 = vunpack.c.l.bf16 %v3048_v10  ;;  %v3070_v17 = vld [vmem:[%s3438_s19 + $0x24] sm:$0xe]  ;;  %v3459_v19 = vunpack.c.h.bf16 %v3048_v10  ;;  %v3102_v40 = vld [vmem:[%s3438_s19 + $0x30] sm:$0xe] }
  0x13   : > { %v372_v15 = vunpack.c.l.bf16 %v364_v9  ;;  %v713_v20 = vunpack.c.l.bf16 %v3070_v17  ;;  %v3461_v21 = vunpack.c.l.bf16 %v3327_v18  ;;  %v3463_v22 = vunpack.c.h.bf16 %v3327_v18  ;;  %v177_v45 = vld [vmem:[%s3438_s19 + $0xc] sm:$0xff]   ;;  %v3069_v18 = vld [vmem:[%s3438_s19 + $0x18] sm:$0xe] }
  0x14   : > { %v212_v23 = vmul.f32 %v3453_v13, %v3429_v2  ;;  %v247_v24 = vmul.f32 %v3453_v13, %v3431_v3  ;;  %v3471_v25 = vmul.f32 %v3455_v14, %v3431_v3  ;;  %v3476_v27 = vmul.f32 %v3455_v14, %v3433_v4  ;;  %v363_v50 = vld [vmem:[%s3438_s19 + $0xc] sm:$0xe] }
  0x15   : > { %v385_v26 = vmul.f32 %v3433_v4, %v372_v15  ;;  %v538_v28 = vmul.f32 %v3440_v5, %v521_v16  ;;  %v589_v29 = vmul.f32 %v3442_v6, %v521_v16  ;;  %v3482_v30 = vmul.f32 %v3442_v6, %v3459_v19 }
  0x16   : > { %v300_v31 = vrot.slane %v247_v24, 1  ;;  %v301_v32 = vrot.slane %v3471_v25, 1  ;;  %v726_v34 = vmul.f32 %v3444_v7, %v713_v20  ;;  %v439_v36 = vrot.slane %v3476_v27, 2 }
  0x17   : > { %v438_v33 = vrot.slane %v385_v26, 2  ;;  %v641_v37 = vrot.slane %v589_v29, 1  ;;  %v5707_v38 = vrot.slane %v3482_v30, 1  ;;  %v3495_v39 = vmul.f32 %v3444_v7, %v3459_v19 }
  0x18   : > { %v302_v41 = vsel %vm289_vm0, %v300_v31, %v301_v32  ;;  %v778_v42 = vrot.slane %v726_v34, 2  ;;  %v878_v43 = vmul.f32 %v3461_v21, %v3449_v11  ;;  %v929_v44 = vmul.f32 %v3461_v21, %v3451_v12  ;;  %v3078_v34 = vld [vmem:[%s3438_s19 + $0x24] sm:$0xff]  }
  0x19   : > { %v350_v46 = vadd.f32 %v302_v41, %v212_v23  ;;  %v440_v47 = vsel %vm427_vm1, %v438_v33, %v439_v36  ;;  %v643_v48 = vsel %vm289_vm0, %v641_v37, %v5707_v38  ;;  %v5706_v49 = vrot.slane %v3495_v39, 2 }
  0x1a   : > { %v3516_v51 = vmul.f32 %v3463_v22, %v3451_v12  ;;  %v981_v52 = vrot.slane %v929_v44, 1  ;;  %v1053_v53 = vunpack.c.l.bf16 %v3102_v40  ;;  %v3520_v54 = vmul.f32 %v3489_v35, %v3463_v22  ;;  %v3101_v44 = vld [vmem:[%s3438_s19 + $0x24] sm:$0xe] }
  0x1b   : > { %v488_v55 = vadd.f32 %v440_v47, %v350_v46  ;;  %v780_v56 = vsel %vm427_vm1, %v778_v42, %v5706_v49  ;;  %v193_v57 = vunpack.c.l.bf16 %v177_v45  ;;  %v3525_v58 = vunpack.c.h.bf16 %v177_v45 }
  0x1c   : > { %v5705_v59 = vrot.slane %v3516_v51, 1  ;;  %v1066_v60 = vmul.f32 %v3489_v35, %v1053_v53  ;;  %v5703_v61 = vrot.slane %v3520_v54, 2  ;;  %v371_v62 = vunpack.c.l.bf16 %v363_v50 }
  0x1d   : > { %v554_v63 = vadd.f32 %v538_v28, %v488_v55  ;;  %v210_v1 = vmul.f32 %v3429_v2, %v193_v57  ;;  %v244_v8 = vmul.f32 %v3431_v3, %v193_v57  ;;  %v3534_v9 = vmul.f32 %v3431_v3, %v3525_v58 }
  0x1e   : > { %v983_v10 = vsel %vm289_vm0, %v981_v52, %v5705_v59  ;;  %v1118_v15 = vrot.slane %v1066_v60, 2  ;;  %v382_v16 = vmul.f32 %v3433_v4, %v371_v62  ;;  %v3542_v17 = vmul.f32 %v3433_v4, %v3525_v58 }
  0x1f   : > { %v691_v20 = vadd.f32 %v643_v48, %v554_v63  ;;  %v295_v23 = vrot.slane %v244_v8, 1  ;;  %v5702_v24 = vrot.slane %v3534_v9, 1  ;;  %v536_v26 = vmul.f32 %v3453_v13, %v3440_v5  ;;  %v3224_v63 = vld [vmem:[%s3438_s19] sm:$0xff]  }
  0x20   : > { %v1120_v28 = vsel %vm427_vm1, %v1118_v15, %v5703_v61  ;;  %v433_v29 = vrot.slane %v382_v16, 2  ;;  %v5700_v31 = vrot.slane %v3542_v17, 2  ;;  %v586_v33 = vmul.f32 %v3453_v13, %v3442_v6 }
  0x21   : > { %v828_v37 = vadd.f32 %v780_v56, %v691_v20  ;;  %v297_v40 = vsel %vm289_vm0, %v295_v23, %v5702_v24  ;;  %v3560_v41 = vmul.f32 %v3455_v14, %v3442_v6  ;;  %v712_v42 = vunpack.c.l.bf16 %v3069_v18 }
  0x22   : > { %v348_v45 = vadd.f32 %v297_v40, %v210_v1  ;;  %v435_v46 = vsel %vm427_vm1, %v433_v29, %v5700_v31  ;;  %v636_v47 = vrot.slane %v586_v33, 1  ;;  %v3568_v48 = vmul.f32 %v3455_v14, %v3444_v7 }
  0x23   : > { %v894_v50 = vadd.f32 %v878_v43, %v828_v37  ;;  %v5698_v52 = vrot.slane %v3560_v41, 1  ;;  %v723_v53 = vmul.f32 %v3444_v7, %v712_v42  ;;  %v859_v55 = vunpack.c.l.bf16 %v3078_v34  ;;  %v3044_v37 = vld [vmem:[%s3438_s19 + $0xc] sm:$0xff]  }
  0x24   : > { %v486_v56 = vadd.f32 %v435_v46, %v348_v45  ;;  %v5695_v57 = vrot.slane %v3568_v48, 2  ;;  %v3573_v60 = vunpack.c.h.bf16 %v3078_v34  ;;  %v1052_v62 = vunpack.c.l.bf16 %v3101_v44 }
  0x25   : > { %v1031_v1 = vadd.f32 %v983_v10, %v894_v50  ;;  %v638_v8 = vsel %vm289_vm0, %v636_v47, %v5698_v52  ;;  %v773_v43 = vrot.slane %v723_v53, 2  ;;  %v876_v15 = vmul.f32 %v3449_v11, %v859_v55 }
  0x26   : > { %v552_v16 = vadd.f32 %v536_v26, %v486_v56  ;;  %v926_v18 = vmul.f32 %v3451_v12, %v859_v55  ;;  %v3583_v20 = vmul.f32 %v3451_v12, %v3573_v60  ;;  %v1063_v23 = vmul.f32 %v3489_v35, %v1052_v62  ;;  %v362_v26 = vld [vmem:[%s3438_s19] sm:$0xe] }
  0x27   : > { %v3586_v29 = vadd.f32 %v1120_v28, %v1031_v1  ;;  %v775_v10 = vsel %vm427_vm1, %v773_v43, %v5695_v57  ;;  %v3593_v33 = vmul.f32 %v3489_v35, %v3573_v60  ;;  %v3225_v34 = vunpack.c.l.bf16 %v3224_v63  ;;  %v3068_v1 = vld [vmem:[%s3438_s19 + $0xc] sm:$0xe] }
  0x28   : > { %v689_v40 = vadd.f32 %v638_v8, %v552_v16  ;;  %v976_v42 = vrot.slane %v926_v18, 1  ;;  %v5694_v44 = vrot.slane %v3583_v20, 1  ;;  %v1113_v45 = vrot.slane %v1063_v23, 2 }
  0x29   : > { %1202 = vperm.xlu2 %3357, %v3586_v29   ;;  %v5693_v28 = vrot.slane %v3593_v33, 2  ;;  %v3600_v46 = vunpack.c.h.bf16 %v3224_v63  ;;  %v208_v47 = vmul.f32 %v3225_v34, %v3429_v2  ;;  %v241_v50 = vmul.f32 %v3225_v34, %v3431_v3 }
  0x2a   : > { %v826_v53 = vadd.f32 %v775_v10, %v689_v40  ;;  %v978_v55 = vsel %vm289_vm0, %v976_v42, %v5694_v44  ;;  %v370_v56 = vunpack.c.l.bf16 %v362_v26  ;;  %v517_v62 = vunpack.c.l.bf16 %v3044_v37 }
  0x2b   : > { %v1115_v8 = vsel %vm427_vm1, %v1113_v45, %v5693_v28  ;;  %v3613_v63 = vmul.f32 %v3600_v46, %v3431_v3  ;;  %v290_v43 = vrot.slane %v241_v50, 1  ;;  %v3617_v16 = vmul.f32 %v3600_v46, %v3433_v4 }
  0x2c   : > { %v892_v18 = vadd.f32 %v876_v15, %v826_v53  ;;  %v379_v23 = vmul.f32 %v3433_v4, %v370_v56  ;;  %v3620_v10 = vunpack.c.h.bf16 %v3044_v37  ;;  %v534_v34 = vmul.f32 %v3440_v5, %v517_v62 }
  0x2d   : > { %v5697_v26 = vrot.slane %v3613_v63, 1  ;;  %v5696_v40 = vrot.slane %v3617_v16, 2  ;;  %v583_v42 = vmul.f32 %v3442_v6, %v517_v62  ;;  %v711_v45 = vunpack.c.l.bf16 %v3068_v1  ;;  %v3100_v62 = vld [vmem:[%s3438_s19 + $0x18] sm:$0xe] }
  0x2e   : > { %v1029_v50 = vadd.f32 %v978_v55, %v892_v18  ;;  %v428_v0 = vrot.slane %v379_v23, 2  ;;  %v3628_v15 = vmul.f32 %v3442_v6, %v3620_v10  ;;  %v3632_v37 = vmul.f32 %v3444_v7, %v3620_v10 }
  0x2f   : > { %v292_v53 = vsel %vm289_vm0, %v290_v43, %v5697_v26  ;;  %v631_v56 = vrot.slane %v583_v42, 1  ;;  %v720_v28 = vmul.f32 %v3444_v7, %v711_v45  ;;  %v874_v55 = vmul.f32 %v3453_v13, %v3449_v11 }
  0x30   : > { %v3641_v1 = vadd.f32 %v1115_v8, %v1029_v50  ;;  %v346_v18 = vadd.f32 %v292_v53, %v208_v47  ;;  %v430_v23 = vsel %vm427_vm1, %v428_v0, %v5696_v40  ;;  %v5699_v44 = vrot.slane %v3628_v15, 1  ;;  %v226_v8 = vld [vmem:[%s3438_s19 + $0x20] sm:$0x1]  ;;  %v3062_v53 = vld [vmem:[%s3438_s19 + $0x2c] sm:$0x1] }
  0x31   : > { %v768_v57 = vrot.slane %v720_v28, 2  ;;  %v5701_v43 = vrot.slane %v3632_v37, 2  ;;  %v923_v42 = vmul.f32 %v3453_v13, %v3451_v12  ;;  %v3652_v45 = vmul.f32 %v3455_v14, %v3451_v12 }
  0x32   : > { %1192 = vperm.xlu1 %3356, %v3641_v1   ;;  %v484_v47 = vadd.f32 %v430_v23, %v346_v18  ;;  %v633_v0 = vsel %vm289_vm0, %v631_v56, %v5699_v44  ;;  %v1051_v50 = vunpack.c.l.bf16 %v3100_v62  ;;  %v3661_v28 = vmul.f32 %v3489_v35, %v3455_v14  ;;  %v3094_v44 = vld [vmem:[%s3438_s19 + $0x38] sm:$0x1] }
  0x33   : > { %v770_v13 = vsel %vm427_vm1, %v768_v57, %v5701_v43  ;;  %v971_v40 = vrot.slane %v923_v42, 1  ;;  %v5704_v26 = vrot.slane %v3652_v45, 1  ;;  %v213_v18 = vmul.f32 %v3455_v14, %v3429_v2 }
  0x34   : > { %v550_v23 = vadd.f32 %v534_v34, %v484_v47  ;;  %v1060_v52 = vmul.f32 %v3489_v35, %v1051_v50  ;;  %v1109_v56 = vrot.slane %v3661_v28, 2  ;;  %v234_v62 = vunpack.c.l.bf16 %v226_v8 }
  0x35   : > { %v973_v31 = vsel %vm289_vm0, %v971_v40, %v5704_v26  ;;  %v539_v57 = vmul.f32 %v3440_v5, %v3459_v19  ;;  %v576_v42 = vunpack.c.l.bf16 %v3062_v53  ;;  %v3680_v43 = vmul.f32 %v3463_v22, %v3449_v11  ;;  %v225_v53 = vld [vmem:[%s3438_s19 + $0x14] sm:$0x1] }
  0x36   : > { %v687_v34 = vadd.f32 %v633_v0, %v550_v23  ;;  %v1108_v47 = vrot.slane %v1060_v52, 2  ;;  %v249_v50 = vmul.f32 %v3431_v3, %v234_v62  ;;  %v387_v24 = vmul.f32 %v3433_v4, %v234_v62 }
  0x37   : > { %v591_v8 = vmul.f32 %v3442_v6, %v576_v42  ;;  %v728_v61 = vmul.f32 %v3444_v7, %v576_v42  ;;  %v916_v40 = vunpack.c.l.bf16 %v3094_v44  ;;  %v211_v19 = vmul.f32 %v3429_v2, %v3525_v58 }
  0x38   : > { %v824_v26 = vadd.f32 %v770_v13, %v687_v34  ;;  %v1110_v0 = vsel %vm427_vm1, %v1108_v47, %v1109_v56  ;;  %v303_v52 = vrot.slane %v249_v50, 1  ;;  %v441_v23 = vrot.slane %v387_v24, 2  ;;  %v3061_v34 = vld [vmem:[%s3438_s19 + $0x20] sm:$0x1] }
  0x39   : > { %v644_v59 = vrot.slane %v591_v8, 1  ;;  %v781_v49 = vrot.slane %v728_v61, 2  ;;  %v931_v62 = vmul.f32 %v3451_v12, %v916_v40  ;;  %v1068_v38 = vmul.f32 %v3489_v35, %v916_v40 }
  0x3a   : > { %v890_v42 = vadd.f32 %v874_v55, %v824_v26  ;;  %v304_v44 = vsel %vm289_vm0, %v301_v32, %v303_v52  ;;  %v442_v58 = vsel %vm427_vm1, %v439_v36, %v441_v23  ;;  %v233_v13 = vunpack.c.l.bf16 %v225_v53 }
  0x3b   : > { %v351_v47 = vadd.f32 %v304_v44, %v213_v18  ;;  %v5824_v24 = vrot.slane %v3482_v30, 1  ;;  %v5825_v50 = vrot.slane %v3495_v39, 2  ;;  %v984_v55 = vrot.slane %v931_v62, 1  ;;  %v3093_v39 = vld [vmem:[%s3438_s19 + $0x2c] sm:$0x1] }
  0x3c   : > { %v1027_v25 = vadd.f32 %v973_v31, %v890_v42  ;;  %v1121_v8 = vrot.slane %v1068_v38, 2  ;;  %v246_v27 = vmul.f32 %v3431_v3, %v233_v13  ;;  %v384_v32 = vmul.f32 %v3433_v4, %v233_v13  ;;  %v224_v44 = vld [vmem:[%s3438_s19 + $0x8] sm:$0x1] }
  0x3d   : > { %v645_v61 = vsel %vm289_vm0, %v5824_v24, %v644_v59  ;;  %v782_v26 = vsel %vm427_vm1, %v5825_v50, %v781_v49  ;;  %v489_v36 = vadd.f32 %v442_v58, %v351_v47  ;;  %v5826_v40 = vrot.slane %v3516_v51, 1 }
  0x3e   : > { %v537_v30 = vmul.f32 %v3455_v14, %v3440_v5  ;;  %v575_v59 = vunpack.c.l.bf16 %v3061_v34  ;;  %v3715_v53 = vadd.f32 %v1110_v0, %v1027_v25  ;;  %v5827_v49 = vrot.slane %v3520_v54, 2 }
  0x3f   : > { %v985_v18 = vsel %vm289_vm0, %v5826_v40, %v984_v55  ;;  %v298_v31 = vrot.slane %v246_v27, 1  ;;  %v436_v52 = vrot.slane %v384_v32, 2  ;;  %v555_v23 = vadd.f32 %v539_v57, %v489_v36 }
  0x40   : > { %v1122_v38 = vsel %vm427_vm1, %v5827_v49, %v1121_v8  ;;  %v588_v62 = vmul.f32 %v3442_v6, %v575_v59  ;;  %v725_v51 = vmul.f32 %v3444_v7, %v575_v59  ;;  %v877_v42 = vmul.f32 %v3449_v11, %v3573_v60  ;;  %1182 = vperm.xlu0 %3355, %v3715_v53  }
  0x41   : > { %v5828_v0 = vrot.slane %v3534_v9, 1  ;;  %v5829_v58 = vrot.slane %v3542_v17, 2  ;;  %v915_v57 = vunpack.c.l.bf16 %v3093_v39  ;;  %v209_v34 = vmul.f32 %v3600_v46, %v3429_v2  ;;  %v3060_v17 = vld [vmem:[%s3438_s19 + $0x14] sm:$0x1] }
  0x42   : > { %v692_v47 = vadd.f32 %v645_v61, %v555_v23  ;;  %v639_v50 = vrot.slane %v588_v62, 1  ;;  %v776_v55 = vrot.slane %v725_v51, 2  ;;  %v232_v9 = vunpack.c.l.bf16 %v224_v44 }
  0x43   : > { %v299_v54 = vsel %vm289_vm0, %v5828_v0, %v298_v31  ;;  %v437_v13 = vsel %vm427_vm1, %v5829_v58, %v436_v52  ;;  %v928_v60 = vmul.f32 %v3451_v12, %v915_v57  ;;  %v1065_v25 = vmul.f32 %v3489_v35, %v915_v57 }
  0x44   : > { %v349_v24 = vadd.f32 %v299_v54, %v211_v19  ;;  %v535_v8 = vmul.f32 %v3440_v5, %v3620_v10  ;;  %v829_v27 = vadd.f32 %v782_v26, %v692_v47  ;;  %v5830_v36 = vrot.slane %v3560_v41, 1  ;;  %v3092_v41 = vld [vmem:[%s3438_s19 + $0x20] sm:$0x1] }
  0x45   : > { %v5831_v19 = vrot.slane %v3568_v48, 2  ;;  %v979_v40 = vrot.slane %v928_v60, 1  ;;  %v1116_v59 = vrot.slane %v1065_v25, 2  ;;  %v243_v39 = vmul.f32 %v3431_v3, %v232_v9 }
  0x46   : > { %v487_v32 = vadd.f32 %v437_v13, %v349_v24  ;;  %v640_v46 = vsel %vm289_vm0, %v5830_v36, %v639_v50  ;;  %v381_v49 = vmul.f32 %v3433_v4, %v232_v9  ;;  %v895_v31 = vadd.f32 %v3680_v43, %v829_v27  ;;  %v366_v9 = vld [vmem:[%s3438_s19 + $0x30] sm:$0xe]  ;;  %v3052_v36 = vld [vmem:[%s3438_s19 + $0x3c] sm:$0xff]  }
  0x47   : > { %v777_v61 = vsel %vm427_vm1, %v5831_v19, %v776_v55  ;;  %v574_v52 = vunpack.c.l.bf16 %v3060_v17  ;;  %v875_v26 = vmul.f32 %v3455_v14, %v3449_v11  ;;  %v5832_v23 = vrot.slane %v3583_v20, 1 }
  0x48   : > { %v553_v10 = vadd.f32 %v537_v30, %v487_v32  ;;  %v5833_v62 = vrot.slane %v3593_v33, 2  ;;  %v293_v44 = vrot.slane %v243_v39, 1  ;;  %v431_v0 = vrot.slane %v381_v49, 2 }
  0x49   : > { %v980_v48 = vsel %vm289_vm0, %v5832_v23, %v979_v40  ;;  %v1032_v54 = vadd.f32 %v985_v18, %v895_v31  ;;  %v585_v43 = vmul.f32 %v3442_v6, %v574_v52  ;;  %v722_v30 = vmul.f32 %v3444_v7, %v574_v52  ;;  %v3072_v23 = vld [vmem:[%s3438_s19 + $0x3c] sm:$0xe] }
  0x4a   : > { %v1117_v51 = vsel %vm427_vm1, %v5833_v62, %v1116_v59  ;;  %v690_v58 = vadd.f32 %v640_v46, %v553_v10  ;;  %v5834_v14 = vrot.slane %v3613_v63, 1  ;;  %v5835_v20 = vrot.slane %v3617_v16, 2 }
  0x4b   : > { %v914_v33 = vunpack.c.l.bf16 %v3092_v41  ;;  %v216_v47 = vmul.f32 %v3461_v21, %v3429_v2  ;;  %v3767_v18 = vadd.f32 %v1122_v38, %v1032_v54  ;;  %v634_v55 = vrot.slane %v585_v43, 1 }
  0x4c   : > { %v294_v13 = vsel %vm289_vm0, %v5834_v14, %v293_v44  ;;  %v432_v57 = vsel %vm427_vm1, %v5835_v20, %v431_v0  ;;  %v827_v24 = vadd.f32 %v777_v61, %v690_v58  ;;  %v771_v60 = vrot.slane %v722_v30, 2  ;;  %v3328_v44 = vld [vmem:[%s3438_s19 + $0x48] sm:$0xff]  }
  0x4d   : > { %5836 = vst [vmem:[#allocation2_spill] sm:$0xff] %v3767_v18  ;;  %v347_v50 = vadd.f32 %v294_v13, %v209_v34  ;;  %v925_v25 = vmul.f32 %v3451_v12, %v914_v33  ;;  %v1062_v63 = vmul.f32 %v3489_v35, %v914_v33  ;;  %v253_v16 = vmul.f32 %v3461_v21, %v3431_v3 }
  0x4e   : > { %1207 = vperm.xlu2 %3357, %v3767_v18   ;;  %v893_v17 = vadd.f32 %v877_v42, %v827_v24  ;;  %v5837_v32 = vrot.slane %v3628_v15, 1  ;;  %v3780_v34 = vmul.f32 %v3463_v22, %v3431_v3  ;;  %v5838_v46 = vrot.slane %v3632_v37, 2 }
  0x4f   : > { %v485_v27 = vadd.f32 %v432_v57, %v347_v50  ;;  %v974_v61 = vrot.slane %v925_v25, 1  ;;  %v1111_v40 = vrot.slane %v1062_v63, 2  ;;  %v310_v59 = vrot.slane %v253_v16, 1 }
  0x50   : > { %v635_v38 = vsel %vm289_vm0, %v5837_v32, %v634_v55  ;;  %v772_v19 = vsel %vm427_vm1, %v5838_v46, %v771_v60  ;;  %v1030_v42 = vadd.f32 %v980_v48, %v893_v17  ;;  %v311_v15 = vrot.slane %v3780_v34, 1  ;;  %v3104_v55 = vld [vmem:[%s3438_s19 + $0x48] sm:$0xe] }
  0x51   : > { %v551_v39 = vadd.f32 %v535_v8, %v485_v27  ;;  %v374_v49 = vunpack.c.l.bf16 %v366_v9  ;;  %v5839_v31 = vrot.slane %v3652_v45, 1  ;;  %v1112_v52 = vsel %vm427_vm1, %v1109_v56, %v1111_v40  ;;  %v3839_v32 = vld [vmem:[%s3438_s19 + $0x24] sm:$0xff]   ;;  %v3063_v40 = vld [vmem:[%s3438_s19 + $0x38] sm:$0x1] }
  0x52   : > { %v3795_v37 = vmul.f32 %v3463_v22, %v3433_v4  ;;  %v525_v41 = vunpack.c.l.bf16 %v3052_v36  ;;  %v3798_v62 = vadd.f32 %v1117_v51, %v1030_v42  ;;  %v312_v48 = vsel %vm289_vm0, %v310_v59, %v311_v15 }
  0x53   : > { %v975_v10 = vsel %vm289_vm0, %v5839_v31, %v974_v61  ;;  %v688_v8 = vadd.f32 %v635_v38, %v551_v39  ;;  %v391_v45 = vmul.f32 %v3433_v4, %v374_v49  ;;  %v354_v0 = vadd.f32 %v312_v48, %v216_v47  ;;  %v227_v61 = vld [vmem:[%s3438_s19 + $0x2c] sm:$0x1] }
  0x54   : > { %v5712_v28 = vrot.slane %v3795_v37, 2  ;;  %v3806_v56 = vunpack.c.h.bf16 %v3052_v36  ;;  %v542_v54 = vmul.f32 %v3440_v5, %v525_v41  ;;  %1197 = vperm.xlu1 %3356, %v3798_v62   ;;  %v595_v43 = vmul.f32 %v3442_v6, %v525_v41 }
  0x55   : > { %v825_v51 = vadd.f32 %v772_v19, %v688_v8  ;;  %v448_v58 = vrot.slane %v391_v45, 2  ;;  %v715_v30 = vunpack.c.l.bf16 %v3072_v23  ;;  %v3819_v20 = vunpack.c.l.bf16 %v3328_v44 }
  0x56   : > { %v3813_v14 = vmul.f32 %v3442_v6, %v3806_v56  ;;  %v3817_v13 = vmul.f32 %v3444_v7, %v3806_v56  ;;  %v3821_v57 = vunpack.c.h.bf16 %v3328_v44  ;;  %v651_v24 = vrot.slane %v595_v43, 1 }
  0x57   : > { %v891_v33 = vadd.f32 %v875_v26, %v825_v51  ;;  %v450_v47 = vsel %vm427_vm1, %v448_v58, %v5712_v28  ;;  %v732_v50 = vmul.f32 %v3444_v7, %v715_v30  ;;  %v882_v16 = vmul.f32 %v3819_v20, %v3449_v11  ;;  %v3105_v28 = vld [vmem:[%s3438_s19 + $0x54] sm:$0xe] }
  0x58   : > { %v492_v60 = vadd.f32 %v450_v47, %v354_v0  ;;  %v5711_v25 = vrot.slane %v3813_v14, 1  ;;  %v5710_v63 = vrot.slane %v3817_v13, 2  ;;  %v935_v17 = vmul.f32 %v3819_v20, %v3451_v12 }
  0x59   : > { %v1028_v9 = vadd.f32 %v975_v10, %v891_v33  ;;  %v788_v26 = vrot.slane %v732_v50, 2  ;;  %v3836_v27 = vmul.f32 %v3821_v57, %v3451_v12  ;;  %v1055_v46 = vunpack.c.l.bf16 %v3104_v55 }
  0x5a   : > { %v558_v38 = vadd.f32 %v542_v54, %v492_v60  ;;  %v653_v36 = vsel %vm289_vm0, %v651_v24, %v5711_v25  ;;  %v3846_v19 = vmul.f32 %v3489_v35, %v3821_v57  ;;  %v991_v39 = vrot.slane %v935_v17, 1  ;;  %v3083_v60 = vld [vmem:[%s3438_s19 + $0x3c] sm:$0xff]  }
  0x5b   : > { %v3850_v59 = vadd.f32 %v1112_v52, %v1028_v9  ;;  %v790_v42 = vsel %vm427_vm1, %v788_v26, %v5710_v63  ;;  %v5709_v49 = vrot.slane %v3836_v27, 1  ;;  %v1072_v10 = vmul.f32 %v3489_v35, %v1055_v46  ;;  %v3095_v9 = vld [vmem:[%s3438_s19 + $0x44] sm:$0x1] }
  0x5c   : > { %v695_v31 = vadd.f32 %v653_v36, %v558_v38  ;;  %v5708_v41 = vrot.slane %v3846_v19, 2  ;;  %v198_v23 = vunpack.c.h.bf16 %v3839_v32  ;;  %v235_v8 = vunpack.c.l.bf16 %v227_v61 }
  0x5d   : > { %5840 = vst [vmem:[#allocation3_spill] sm:$0xff] %v3850_v59  ;;  %1187 = vperm.xlu0 %3355, %v3850_v59   ;;  %v993_v52 = vsel %vm289_vm0, %v991_v39, %v5709_v49  ;;  %v541_v48 = vmul.f32 %v3463_v22, %v3440_v5  ;;  %v577_v45 = vunpack.c.l.bf16 %v3063_v40  ;;  %v1128_v0 = vrot.slane %v1072_v10, 2  ;;  %v229_v49 = vld [vmem:[%s3438_s19 + $0x44] sm:$0x1] }
  0x5e   : > { %v832_v44 = vadd.f32 %v790_v42, %v695_v31  ;;  %v215_v54 = vmul.f32 %v3429_v2, %v198_v23  ;;  %v3867_v51 = vmul.f32 %v3431_v3, %v198_v23  ;;  %v252_v58 = vmul.f32 %v3431_v3, %v235_v8 }
  0x5f   : > { %v3871_v43 = vmul.f32 %v3433_v4, %v198_v23  ;;  %v390_v30 = vmul.f32 %v3433_v4, %v235_v8  ;;  %v3876_v33 = vmul.f32 %v3463_v22, %v3442_v6  ;;  %v1130_v24 = vsel %vm427_vm1, %v1128_v0, %v5708_v41  ;;  %v365_v0 = vld [vmem:[%s3438_s19 + $0x24] sm:$0xe] }
  0x60   : > { %v898_v47 = vadd.f32 %v882_v16, %v832_v44  ;;  %v306_v50 = vrot.slane %v3867_v51, 1  ;;  %v594_v55 = vmul.f32 %v3442_v6, %v577_v45  ;;  %v308_v26 = vrot.slane %v252_v58, 1 }
  0x61   : > { %v444_v17 = vrot.slane %v3871_v43, 2  ;;  %v446_v38 = vrot.slane %v390_v30, 2  ;;  %v647_v36 = vrot.slane %v3876_v33, 1  ;;  %v3889_v16 = vmul.f32 %v3463_v22, %v3444_v7 }
  0x62   : > { %v1035_v46 = vadd.f32 %v993_v52, %v898_v47  ;;  %v649_v61 = vrot.slane %v594_v55, 1  ;;  %v731_v40 = vmul.f32 %v3444_v7, %v577_v45  ;;  %v309_v42 = vsel %vm289_vm0, %v306_v50, %v308_v26 }
  0x63   : > { %v447_v39 = vsel %vm427_vm1, %v444_v17, %v446_v38  ;;  %v864_v31 = vunpack.c.h.bf16 %v3083_v60  ;;  %v917_v10 = vunpack.c.l.bf16 %v3095_v9  ;;  %v353_v8 = vadd.f32 %v309_v42, %v215_v54  ;;  %v3071_v38 = vld [vmem:[%s3438_s19 + $0x30] sm:$0xe]  ;;  %v3103_v42 = vld [vmem:[%s3438_s19 + $0x3c] sm:$0xe] }
  0x64   : > { %v3894_v23 = vadd.f32 %v1130_v24, %v1035_v46  ;;  %v650_v44 = vsel %vm289_vm0, %v647_v36, %v649_v61  ;;  %v784_v52 = vrot.slane %v3889_v16, 2  ;;  %v786_v51 = vrot.slane %v731_v40, 2 }
  0x65   : > { %v881_v58 = vmul.f32 %v3449_v11, %v864_v31  ;;  %v933_v45 = vmul.f32 %v3451_v12, %v864_v31  ;;  %v934_v43 = vmul.f32 %v3451_v12, %v917_v10  ;;  %v491_v30 = vadd.f32 %v447_v39, %v353_v8  ;;  %v3916_v8 = vld [vmem:[%s3438_s19 + $0x3c] sm:$0xff]  }
  0x66   : > { %5841 = vst [vmem:[#allocation4_spill] sm:$0xff] %v3894_v23  ;;  %1222 = vperm.xlu2 %3357, %v3894_v23   ;;  %v1070_v33 = vmul.f32 %v3489_v35, %v864_v31  ;;  %v1071_v54 = vmul.f32 %v3489_v35, %v917_v10  ;;  %v197_v47 = vunpack.c.l.bf16 %v3839_v32  ;;  %v787_v24 = vsel %vm427_vm1, %v784_v52, %v786_v51 }
  0x67   : > { %v987_v55 = vrot.slane %v933_v45, 1  ;;  %v989_v9 = vrot.slane %v934_v43, 1  ;;  %v373_v26 = vunpack.c.l.bf16 %v365_v0  ;;  %v557_v46 = vadd.f32 %v541_v48, %v491_v30 }
  0x68   : > { %v1124_v61 = vrot.slane %v1070_v33, 2  ;;  %v1126_v16 = vrot.slane %v1071_v54, 2  ;;  %v214_v40 = vmul.f32 %v3429_v2, %v197_v47  ;;  %v250_v31 = vmul.f32 %v3431_v3, %v197_v47 }
  0x69   : > { %v990_v39 = vsel %vm289_vm0, %v987_v55, %v989_v9  ;;  %v388_v10 = vmul.f32 %v3433_v4, %v373_v26  ;;  %v540_v32 = vmul.f32 %v3461_v21, %v3440_v5  ;;  %v694_v0 = vadd.f32 %v650_v44, %v557_v46 }
  0x6a   : > { %v1127_v48 = vsel %vm427_vm1, %v1124_v61, %v1126_v16  ;;  %v592_v51 = vmul.f32 %v3461_v21, %v3442_v6  ;;  %v714_v45 = vunpack.c.l.bf16 %v3071_v38  ;;  %v305_v43 = vrot.slane %v250_v31, 1 }
  0x6b   : > { %v443_v30 = vrot.slane %v388_v10, 2  ;;  %v863_v33 = vunpack.c.l.bf16 %v3083_v60  ;;  %v1054_v54 = vunpack.c.l.bf16 %v3103_v42  ;;  %v831_v47 = vadd.f32 %v787_v24, %v694_v0 }
  0x6c   : > { %v646_v9 = vrot.slane %v592_v51, 1  ;;  %v729_v26 = vmul.f32 %v3444_v7, %v714_v45  ;;  %v202_v41 = vunpack.c.h.bf16 %v3916_v8  ;;  %v307_v63 = vsel %vm289_vm0, %v305_v43, %v306_v50  ;;  %v3065_v43 = vld [vmem:[%s3438_s19 + $0x50] sm:$0x1] }
  0x6d   : > { %v445_v44 = vsel %vm427_vm1, %v443_v30, %v444_v17  ;;  %v880_v46 = vmul.f32 %v3449_v11, %v863_v33  ;;  %v932_v21 = vmul.f32 %v3451_v12, %v863_v33  ;;  %v897_v38 = vadd.f32 %v881_v58, %v831_v47 }
  0x6e   : > { %v352_v16 = vadd.f32 %v307_v63, %v214_v40  ;;  %v648_v60 = vsel %vm289_vm0, %v646_v9, %v647_v36  ;;  %v783_v24 = vrot.slane %v729_v26, 2  ;;  %v1069_v31 = vmul.f32 %v3489_v35, %v1054_v54  ;;  %v3097_v54 = vld [vmem:[%s3438_s19 + $0x5c] sm:$0x1] }
  0x6f   : > { %v986_v42 = vrot.slane %v932_v21, 1  ;;  %v219_v10 = vmul.f32 %v3429_v2, %v202_v41  ;;  %v237_v50 = vunpack.c.l.bf16 %v229_v49  ;;  %v1034_v0 = vadd.f32 %v990_v39, %v897_v38 }
  0x70   : > { %v490_v17 = vadd.f32 %v445_v44, %v352_v16  ;;  %v785_v51 = vsel %vm427_vm1, %v783_v24, %v784_v52  ;;  %v3933_v45 = vmul.f32 %v3431_v3, %v202_v41  ;;  %v1123_v58 = vrot.slane %v1069_v31, 2  ;;  %v3946_v52 = vld [vmem:[%s3438_s19 + $0x54] sm:$0xff]  }
  0x71   : > { %v988_v63 = vsel %vm289_vm0, %v986_v42, %v987_v55  ;;  %v258_v36 = vmul.f32 %v3431_v3, %v237_v50  ;;  %v3938_v40 = vmul.f32 %v3433_v4, %v202_v41  ;;  %v3941_v30 = vadd.f32 %v1127_v48, %v1034_v0 }
  0x72   : > { %v556_v33 = vadd.f32 %v540_v32, %v490_v17  ;;  %v316_v49 = vrot.slane %v3933_v45, 1  ;;  %v396_v39 = vmul.f32 %v3433_v4, %v237_v50  ;;  %v1125_v47 = vsel %vm427_vm1, %v1123_v58, %v1124_v61 }
  0x73   : > { %v318_v55 = vrot.slane %v258_v36, 1  ;;  %v454_v9 = vrot.slane %v3938_v40, 2  ;;  %v545_v41 = vmul.f32 %v3821_v57, %v3440_v5  ;;  %1217 = vperm.xlu1 %3356, %v3941_v30   ;;  %v579_v32 = vunpack.c.l.bf16 %v3065_v43 }
  0x74   : > { %v693_v48 = vadd.f32 %v648_v60, %v556_v33  ;;  %v456_v26 = vrot.slane %v396_v39, 2  ;;  %v599_v44 = vmul.f32 %v3821_v57, %v3442_v6  ;;  %v3961_v61 = vmul.f32 %v3821_v57, %v3444_v7 }
  0x75   : > { %v319_v21 = vsel %vm289_vm0, %v316_v49, %v318_v55  ;;  %v868_v38 = vunpack.c.h.bf16 %v3946_v52  ;;  %v919_v16 = vunpack.c.l.bf16 %v3097_v54  ;;  %v600_v31 = vmul.f32 %v3442_v6, %v579_v32 }
  0x76   : > { %v830_v24 = vadd.f32 %v785_v51, %v693_v48  ;;  %v357_v42 = vadd.f32 %v319_v21, %v219_v10  ;;  %v457_v60 = vsel %vm427_vm1, %v454_v9, %v456_v26  ;;  %v657_v50 = vrot.slane %v599_v44, 1  ;;  %v367_v48 = vld [vmem:[%s3438_s19 + $0x3c] sm:$0xe] }
  0x77   : > { %v737_v0 = vmul.f32 %v3444_v7, %v579_v32  ;;  %v794_v17 = vrot.slane %v3961_v61, 2  ;;  %v885_v58 = vmul.f32 %v3449_v11, %v868_v38  ;;  %v659_v33 = vrot.slane %v600_v31, 1 }
  0x78   : > { %v896_v36 = vadd.f32 %v880_v46, %v830_v24  ;;  %v495_v43 = vadd.f32 %v457_v60, %v357_v42  ;;  %v939_v51 = vmul.f32 %v3451_v12, %v868_v38  ;;  %v940_v10 = vmul.f32 %v3451_v12, %v919_v16 }
  0x79   : > { %v796_v39 = vrot.slane %v737_v0, 2  ;;  %v1076_v54 = vmul.f32 %v3489_v35, %v868_v38  ;;  %v1077_v55 = vmul.f32 %v3489_v35, %v919_v16  ;;  %v660_v44 = vsel %vm289_vm0, %v657_v50, %v659_v33  ;;  %v3073_v16 = vld [vmem:[%s3438_s19 + $0x48] sm:$0xe] }
  0x7a   : > { %v1033_v26 = vadd.f32 %v988_v63, %v896_v36  ;;  %v561_v32 = vadd.f32 %v545_v41, %v495_v43  ;;  %v997_v21 = vrot.slane %v939_v51, 1  ;;  %v999_v24 = vrot.slane %v940_v10, 1 }
  0x7b   : > { %v797_v46 = vsel %vm427_vm1, %v794_v17, %v796_v39  ;;  %v1134_v42 = vrot.slane %v1076_v54, 2  ;;  %v1136_v60 = vrot.slane %v1077_v55, 2  ;;  %v201_v38 = vunpack.c.l.bf16 %v3916_v8 }
  0x7c   : > { %v3980_v31 = vadd.f32 %v1125_v47, %v1033_v26  ;;  %v698_v0 = vadd.f32 %v660_v44, %v561_v32  ;;  %v375_v25 = vunpack.c.l.bf16 %v367_v48  ;;  %v1000_v63 = vsel %vm289_vm0, %v997_v21, %v999_v24  ;;  %v228_v24 = vld [vmem:[%s3438_s19 + $0x38] sm:$0x1] }
  0x7d   : > { %v1137_v41 = vsel %vm427_vm1, %v1134_v42, %v1136_v60  ;;  %v544_v36 = vmul.f32 %v3819_v20, %v3440_v5  ;;  %v598_v43 = vmul.f32 %v3819_v20, %v3442_v6  ;;  %v218_v33 = vmul.f32 %v3429_v2, %v201_v38 }
  0x7e   : > { %5842 = vst [vmem:[#allocation5_spill] sm:$0xff] %v3980_v31  ;;  %1212 = vperm.xlu0 %3355, %v3980_v31   ;;  %v835_v47 = vadd.f32 %v797_v46, %v698_v0  ;;  %v256_v8 = vmul.f32 %v3431_v3, %v201_v38  ;;  %v394_v51 = vmul.f32 %v3433_v4, %v375_v25  ;;  %v716_v10 = vunpack.c.l.bf16 %v3073_v16  ;;  %v3064_v38 = vld [vmem:[%s3438_s19 + $0x44] sm:$0x1] }
  0x7f   : > { %v656_v39 = vrot.slane %v598_v43, 1  ;;  %v867_v54 = vunpack.c.l.bf16 %v3946_v52  ;;  %v1056_v55 = vunpack.c.l.bf16 %v3105_v28  ;;  %v217_v44 = vmul.f32 %v3463_v22, %v3429_v2 }
  0x80   : > { %v901_v48 = vadd.f32 %v885_v58, %v835_v47  ;;  %v315_v26 = vrot.slane %v256_v8, 1  ;;  %v453_v32 = vrot.slane %v394_v51, 2  ;;  %v735_v60 = vmul.f32 %v3444_v7, %v716_v10  ;;  %v189_v10 = vld [vmem:[%s3438_s19 + $0x54] sm:$0xff]  }
  0x81   : > { %v658_v46 = vsel %vm289_vm0, %v656_v39, %v657_v50  ;;  %v884_v0 = vmul.f32 %v3449_v11, %v867_v54  ;;  %v938_v25 = vmul.f32 %v3451_v12, %v867_v54  ;;  %v1075_v52 = vmul.f32 %v3489_v35, %v1056_v55  ;;  %v3096_v39 = vld [vmem:[%s3438_s19 + $0x50] sm:$0x1] }
  0x82   : > { %v1038_v16 = vadd.f32 %v1000_v63, %v901_v48  ;;  %v317_v28 = vsel %vm289_vm0, %v315_v26, %v316_v49  ;;  %v455_v22 = vsel %vm427_vm1, %v453_v32, %v454_v9  ;;  %v793_v58 = vrot.slane %v735_v60, 2 }
  0x83   : > { %v356_v50 = vadd.f32 %v317_v28, %v218_v33  ;;  %v996_v43 = vrot.slane %v938_v25, 1  ;;  %v236_v47 = vunpack.c.l.bf16 %v228_v24  ;;  %v1133_v51 = vrot.slane %v1075_v52, 2 }
  0x84   : > { %v4011_v8 = vadd.f32 %v1137_v41, %v1038_v16  ;;  %v543_v63 = vmul.f32 %v3440_v5, %v3806_v56  ;;  %v578_v45 = vunpack.c.l.bf16 %v3064_v38  ;;  %v795_v40 = vsel %vm427_vm1, %v793_v58, %v794_v17 }
  0x85   : > { %v494_v49 = vadd.f32 %v455_v22, %v356_v50  ;;  %v998_v9 = vsel %vm289_vm0, %v996_v43, %v997_v21  ;;  %v255_v33 = vmul.f32 %v3431_v3, %v236_v47  ;;  %v1135_v41 = vsel %vm427_vm1, %v1133_v51, %v1134_v42 }
  0x86   : > { %5843 = vst [vmem:[#allocation6_spill] sm:$0xff] %v4011_v8  ;;  %1237 = vperm.xlu2 %3357, %v4011_v8   ;;  %v393_v54 = vmul.f32 %v3433_v4, %v236_v47  ;;  %v597_v56 = vmul.f32 %v3442_v6, %v578_v45  ;;  %v734_v55 = vmul.f32 %v3444_v7, %v578_v45  ;;  %v918_v21 = vunpack.c.l.bf16 %v3096_v39  ;;  %v3325_v39 = vld [vmem:[%s3438_s19 + $0x60] sm:$0xff]  }
  0x87   : > { %v560_v48 = vadd.f32 %v544_v36, %v494_v49  ;;  %v313_v61 = vrot.slane %v255_v33, 1  ;;  %v883_v17 = vmul.f32 %v3821_v57, %v3449_v11  ;;  %v205_v60 = vunpack.c.l.bf16 %v189_v10  ;;  %v369_v36 = vld [vmem:[%s3438_s19 + $0x54] sm:$0xe] }
  0x88   : > { %v451_v26 = vrot.slane %v393_v54, 2  ;;  %v654_v32 = vrot.slane %v597_v56, 1  ;;  %v791_v24 = vrot.slane %v734_v55, 2  ;;  %v937_v38 = vmul.f32 %v3451_v12, %v918_v21  ;;  %v3075_v54 = vld [vmem:[%s3438_s19 + $0x60] sm:$0xe] }
  0x89   : > { %v697_v25 = vadd.f32 %v658_v46, %v560_v48  ;;  %v314_v42 = vsel %vm289_vm0, %v311_v15, %v313_v61  ;;  %v1074_v16 = vmul.f32 %v3489_v35, %v918_v21  ;;  %v5844_v22 = vrot.slane %v3795_v37, 2 }
  0x8a   : > { %v355_v28 = vadd.f32 %v314_v42, %v217_v44  ;;  %v5845_v50 = vrot.slane %v3813_v14, 1  ;;  %v5846_v34 = vrot.slane %v3817_v13, 2  ;;  %v994_v43 = vrot.slane %v937_v38, 1 }
  0x8b   : > { %v452_v52 = vsel %vm427_vm1, %v5844_v22, %v451_v26  ;;  %v834_v58 = vadd.f32 %v795_v40, %v697_v25  ;;  %v1131_v47 = vrot.slane %v1074_v16, 2  ;;  %v4044_v51 = vunpack.c.h.bf16 %v189_v10 }
  0x8c   : > { %v655_v46 = vsel %vm289_vm0, %v5845_v50, %v654_v32  ;;  %v792_v15 = vsel %vm427_vm1, %v5846_v34, %v791_v24  ;;  %v493_v35 = vadd.f32 %v452_v52, %v355_v28  ;;  %v222_v44 = vmul.f32 %v3429_v2, %v205_v60 }
  0x8d   : > { %v262_v37 = vmul.f32 %v3431_v3, %v205_v60  ;;  %v377_v45 = vunpack.c.l.bf16 %v369_v36  ;;  %v900_v14 = vadd.f32 %v884_v0, %v834_v58  ;;  %v5847_v49 = vrot.slane %v3836_v27, 1 }
  0x8e   : > { %v5848_v13 = vrot.slane %v3846_v19, 2  ;;  %v4057_v10 = vmul.f32 %v3431_v3, %v4044_v51  ;;  %v559_v56 = vadd.f32 %v543_v63, %v493_v35  ;;  %v4063_v0 = vmul.f32 %v3433_v4, %v4044_v51  ;;  %v3090_v63 = vld [vmem:[%s3438_s19 + $0x6c] sm:$0xff]  }
  0x8f   : > { %v995_v33 = vsel %vm289_vm0, %v5847_v49, %v994_v43  ;;  %v325_v55 = vrot.slane %v262_v37, 1  ;;  %v400_v48 = vmul.f32 %v3433_v4, %v377_v45  ;;  %v1037_v27 = vadd.f32 %v998_v9, %v900_v14 }
  0x90   : > { %v1132_v40 = vsel %vm427_vm1, %v5848_v13, %v1131_v47  ;;  %v326_v61 = vrot.slane %v4057_v10, 1  ;;  %v4066_v19 = vunpack.c.l.bf16 %v3325_v39  ;;  %v4068_v21 = vunpack.c.h.bf16 %v3325_v39  ;;  %v3107_v47 = vld [vmem:[%s3438_s19 + $0x6c] sm:$0xe]  ;;  %v230_v13 = vld [vmem:[%s3438_s19 + $0x50] sm:$0x1] }
  0x91   : > { %v696_v26 = vadd.f32 %v655_v46, %v559_v56  ;;  %v463_v32 = vrot.slane %v400_v48, 2  ;;  %v5717_v24 = vrot.slane %v4063_v0, 2  ;;  %v718_v60 = vunpack.c.l.bf16 %v3075_v54  ;;  %v3133_v10 = vld [vmem:[%s3438_s19 + $0x6c] sm:$0xe] }
  0x92   : > { %v4072_v25 = vadd.f32 %v1135_v41, %v1037_v27  ;;  %v327_v42 = vsel %vm289_vm0, %v325_v55, %v326_v61  ;;  %v548_v9 = vmul.f32 %v4066_v19, %v3440_v5  ;;  %v604_v38 = vmul.f32 %v4066_v19, %v3442_v6  ;;  %v4122_v27 = vld [vmem:[%s3438_s19 + $0x54] sm:$0xff]  }
  0x93   : > { %v833_v16 = vadd.f32 %v792_v15, %v696_v26  ;;  %v360_v36 = vadd.f32 %v327_v42, %v222_v44  ;;  %v465_v28 = vsel %vm427_vm1, %v463_v32, %v5717_v24  ;;  %v4086_v41 = vmul.f32 %v4068_v21, %v3442_v6 }
  0x94   : > { %5849 = vst [vmem:[#allocation7_spill] sm:$0xff] %v4072_v25  ;;  %1232 = vperm.xlu1 %3356, %v4072_v25   ;;  %v666_v22 = vrot.slane %v604_v38, 1  ;;  %v741_v52 = vmul.f32 %v3444_v7, %v718_v60  ;;  %v4092_v50 = vmul.f32 %v4068_v21, %v3444_v7  ;;  %v871_v46 = vunpack.c.l.bf16 %v3090_v63 }
  0x95   : > { %v899_v34 = vadd.f32 %v883_v17, %v833_v16  ;;  %v498_v15 = vadd.f32 %v465_v28, %v360_v36  ;;  %v5716_v58 = vrot.slane %v4086_v41, 1  ;;  %v4095_v43 = vunpack.c.h.bf16 %v3090_v63  ;;  %v3066_v36 = vld [vmem:[%s3438_s19 + $0x5c] sm:$0x1] }
  0x96   : > { %v803_v35 = vrot.slane %v741_v52, 2  ;;  %v5715_v44 = vrot.slane %v4092_v50, 2  ;;  %v888_v37 = vmul.f32 %v3449_v11, %v871_v46  ;;  %v944_v45 = vmul.f32 %v3451_v12, %v871_v46 }
  0x97   : > { %v1036_v39 = vadd.f32 %v995_v33, %v899_v34  ;;  %v564_v14 = vadd.f32 %v548_v9, %v498_v15  ;;  %v668_v17 = vsel %vm289_vm0, %v666_v22, %v5716_v58  ;;  %v4106_v49 = vmul.f32 %v3451_v12, %v4095_v43  ;;  %v4115_v33 = vld [vmem:[%s5688_s1 + $0x8] ss:$0 sm:$0xff] }
  0x98   : > { %v805_v54 = vsel %vm427_vm1, %v803_v35, %v5715_v44  ;;  %v1006_v56 = vrot.slane %v944_v45, 1  ;;  %v1058_v55 = vunpack.c.l.bf16 %v3107_v47  ;;  %v4119_v48 = vmul.f32 %v4115_v33, %v4095_v43 }
  0x99   : > { %v4124_v26 = vadd.f32 %v1132_v40, %v1036_v39  ;;  %v701_v32 = vadd.f32 %v668_v17, %v564_v14  ;;  %v5714_v60 = vrot.slane %v4106_v49, 1  ;;  %v221_v63 = vmul.f32 %v3821_v57, %v3429_v2 }
  0x9a   : > { %v1081_v42 = vmul.f32 %v4115_v33, %v1058_v55  ;;  %v5713_v9 = vrot.slane %v4119_v48, 2  ;;  %v238_v38 = vunpack.c.l.bf16 %v230_v13  ;;  %v260_v16 = vmul.f32 %v3821_v57, %v3431_v3 }
  0x9b   : > { %5850 = vst [vmem:[#allocation8_spill] sm:$0xff] %v4124_v26  ;;  %1227 = vperm.xlu0 %3355, %v4124_v26   ;;  %v838_v28 = vadd.f32 %v805_v54, %v701_v32  ;;  %v1008_v40 = vsel %vm289_vm0, %v1006_v56, %v5714_v60  ;;  %v4140_v22 = vmul.f32 %v3821_v57, %v3433_v4  ;;  %v530_v52 = vunpack.c.h.bf16 %v4122_v27 }
  0x9c   : > { %v1143_v46 = vrot.slane %v1081_v42, 2  ;;  %v261_v34 = vmul.f32 %v3431_v3, %v238_v38  ;;  %v321_v15 = vrot.slane %v260_v16, 1  ;;  %v399_v47 = vmul.f32 %v3433_v4, %v238_v38  ;;  %v3098_v42 = vld [vmem:[%s3438_s19 + $0x68] sm:$0x1] }
  0x9d   : > { %v904_v35 = vadd.f32 %v888_v37, %v838_v28  ;;  %v459_v45 = vrot.slane %v4140_v22, 2  ;;  %v547_v39 = vmul.f32 %v3440_v5, %v530_v52  ;;  %v580_v14 = vunpack.c.l.bf16 %v3066_v36 }
  0x9e   : > { %v1145_v57 = vsel %vm427_vm1, %v1143_v46, %v5713_v9  ;;  %v323_v17 = vrot.slane %v261_v34, 1  ;;  %v461_v13 = vrot.slane %v399_v47, 2  ;;  %v4151_v54 = vmul.f32 %v3442_v6, %v530_v52 }
  0x9f   : > { %v1041_v56 = vadd.f32 %v1008_v40, %v904_v35  ;;  %v603_v55 = vmul.f32 %v3442_v6, %v580_v14  ;;  %v4155_v37 = vmul.f32 %v3444_v7, %v530_v52  ;;  %v740_v32 = vmul.f32 %v3444_v7, %v580_v14 }
  0xa0   : > { %v324_v38 = vsel %vm289_vm0, %v321_v15, %v323_v17  ;;  %v462_v16 = vsel %vm427_vm1, %v459_v45, %v461_v13  ;;  %v662_v36 = vrot.slane %v4151_v54, 1  ;;  %v887_v28 = vmul.f32 %v4068_v21, %v3449_v11  ;;  %v368_v17 = vld [vmem:[%s3438_s19 + $0x48] sm:$0xe] }
  0xa1   : > { %v4164_v40 = vadd.f32 %v1145_v57, %v1041_v56  ;;  %v359_v22 = vadd.f32 %v324_v38, %v221_v63  ;;  %v664_v46 = vrot.slane %v603_v55, 1  ;;  %v799_v52 = vrot.slane %v4155_v37, 2  ;;  %v3074_v56 = vld [vmem:[%s3438_s19 + $0x54] sm:$0xe] }
  0xa2   : > { %v801_v34 = vrot.slane %v740_v32, 2  ;;  %v920_v47 = vunpack.c.l.bf16 %v3098_v42  ;;  %v942_v35 = vmul.f32 %v4068_v21, %v3451_v12  ;;  %v4171_v14 = vmul.f32 %v4115_v33, %v4068_v21 }
  0xa3   : > { %5851 = vst [vmem:[#allocation9_spill] sm:$0xff] %v4164_v40  ;;  %1252 = vperm.xlu2 %3357, %v4164_v40   ;;  %v497_v13 = vadd.f32 %v462_v16, %v359_v22  ;;  %v665_v57 = vsel %vm289_vm0, %v662_v36, %v664_v46  ;;  %v220_v63 = vmul.f32 %v3819_v20, %v3429_v2  ;;  %v376_v46 = vunpack.c.l.bf16 %v368_v17 }
  0xa4   : > { %v259_v54 = vmul.f32 %v3819_v20, %v3431_v3  ;;  %v802_v55 = vsel %vm427_vm1, %v799_v52, %v801_v34  ;;  %v943_v37 = vmul.f32 %v3451_v12, %v920_v47  ;;  %v1002_v32 = vrot.slane %v942_v35, 1 }
  0xa5   : > { %v1080_v42 = vmul.f32 %v4115_v33, %v920_v47  ;;  %v563_v38 = vadd.f32 %v547_v39, %v497_v13  ;;  %v1139_v16 = vrot.slane %v4171_v14, 2  ;;  %v529_v44 = vunpack.c.l.bf16 %v4122_v27  ;;  %v3106_v47 = vld [vmem:[%s3438_s19 + $0x60] sm:$0xe] }
  0xa6   : > { %v320_v22 = vrot.slane %v259_v54, 1  ;;  %v1004_v9 = vrot.slane %v943_v37, 1  ;;  %v717_v20 = vunpack.c.l.bf16 %v3074_v56  ;;  %v397_v24 = vmul.f32 %v3433_v4, %v376_v46 }
  0xa7   : > { %v1141_v60 = vrot.slane %v1080_v42, 2  ;;  %v700_v58 = vadd.f32 %v665_v57, %v563_v38  ;;  %v886_v35 = vmul.f32 %v4066_v19, %v3449_v11  ;;  %v546_v13 = vmul.f32 %v3440_v5, %v529_v44  ;;  %v231_v57 = vld [vmem:[%s3438_s19 + $0x5c] sm:$0x1] }
  0xa8   : > { %v322_v34 = vsel %vm289_vm0, %v320_v22, %v321_v15  ;;  %v1005_v39 = vsel %vm289_vm0, %v1002_v32, %v1004_v9  ;;  %v458_v37 = vrot.slane %v397_v24, 2  ;;  %v601_v27 = vmul.f32 %v3442_v6, %v529_v44 }
  0xa9   : > { %v1142_v14 = vsel %vm427_vm1, %v1139_v16, %v1141_v60  ;;  %v358_v17 = vadd.f32 %v322_v34, %v220_v63  ;;  %v837_v54 = vadd.f32 %v802_v55, %v700_v58  ;;  %v738_v15 = vmul.f32 %v3444_v7, %v717_v20  ;;  %v3067_v20 = vld [vmem:[%s3438_s19 + $0x68] sm:$0x1] }
  0xaa   : > { %v941_v56 = vmul.f32 %v4066_v19, %v3451_v12  ;;  %v1057_v42 = vunpack.c.l.bf16 %v3106_v47  ;;  %v223_v9 = vmul.f32 %v3429_v2, %v4044_v51  ;;  %v460_v60 = vsel %vm427_vm1, %v458_v37, %v459_v45  ;;  %v3099_v47 = vld [vmem:[%s3438_s19 + $0x74] sm:$0x1] }
  0xab   : > { %v903_v38 = vadd.f32 %v887_v28, %v837_v54  ;;  %v661_v63 = vrot.slane %v601_v27, 1  ;;  %v798_v58 = vrot.slane %v738_v15, 2  ;;  %v5724_v24 = vmov 1   ;;  %v3110_v15 = vld [vmem:[%s3438_s19 + $0x6c] sm:$0xff]  }
  0xac   : > { %3359 = vset.pattern.permute.xlu2 %v5724_v24  ;;  %v496_v44 = vadd.f32 %v460_v60, %v358_v17  ;;  %v1001_v55 = vrot.slane %v941_v56, 1  ;;  %v1078_v22 = vmul.f32 %v4115_v33, %v1057_v42  ;;  %v239_v46 = vunpack.c.l.bf16 %v231_v57 }
  0xad   : > { %1282 = vperm.xlu2 %3359, %v3850_v59   ;;  %v1040_v34 = vadd.f32 %v1005_v39, %v903_v38  ;;  %v663_v51 = vsel %vm289_vm0, %v661_v63, %v662_v36  ;;  %v800_v28 = vsel %vm427_vm1, %v798_v58, %v799_v52  ;;  %v549_v45 = vmul.f32 %v4068_v21, %v3440_v5 }
  0xae   : > { %v562_v54 = vadd.f32 %v546_v13, %v496_v44  ;;  %v1003_v37 = vsel %vm289_vm0, %v1001_v55, %v1002_v32  ;;  %v1138_v17 = vrot.slane %v1078_v22, 2  ;;  %v264_v27 = vmul.f32 %v3431_v3, %v239_v46 }
  0xaf   : > { %v4214_v57 = vadd.f32 %v1142_v14, %v1040_v34  ;;  %v402_v56 = vmul.f32 %v3433_v4, %v239_v46  ;;  %v581_v39 = vunpack.c.l.bf16 %v3067_v20  ;;  %v4219_v36 = vmul.f32 %v3449_v11, %v4095_v43 }
  0xb0   : > { %v699_v52 = vadd.f32 %v663_v51, %v562_v54  ;;  %v1140_v42 = vsel %vm427_vm1, %v1138_v17, %v1139_v16  ;;  %v328_v38 = vrot.slane %v264_v27, 1  ;;  %v921_v13 = vunpack.c.l.bf16 %v3099_v47 }
  0xb1   : > { %1247 = vperm.xlu1 %3356, %v4214_v57   ;;  %v466_v32 = vrot.slane %v402_v56, 2  ;;  %v606_v60 = vmul.f32 %v3442_v6, %v581_v39  ;;  %v743_v14 = vmul.f32 %v3444_v7, %v581_v39  ;;  %v1604_v63 = vunpack.c.l.bf16 %v3110_v15 }
  0xb2   : > { %v836_v58 = vadd.f32 %v800_v28, %v699_v52  ;;  %v329_v43 = vsel %vm289_vm0, %v326_v61, %v328_v38  ;;  %v946_v44 = vmul.f32 %v3451_v12, %v921_v13  ;;  %v1083_v16 = vmul.f32 %v4115_v33, %v921_v13 }
  0xb3   : > { %v361_v55 = vadd.f32 %v329_v43, %v223_v9  ;;  %v5852_v22 = vrot.slane %v4063_v0, 2  ;;  %v669_v20 = vrot.slane %v606_v60, 1  ;;  %v806_v34 = vrot.slane %v743_v14, 2 }
  0xb4   : > { %v902_v51 = vadd.f32 %v886_v35, %v836_v58  ;;  %v1009_v47 = vrot.slane %v946_v44, 1  ;;  %v1146_v54 = vrot.slane %v1083_v16, 2  ;;  %v4233_v28 = vunpack.c.h.bf16 %v3110_v15  ;;  %v3334_v35 = vld [vmem:[%s3438_s19 + $0x78] sm:$0xff]  }
  0xb5   : > { %v467_v46 = vsel %vm427_vm1, %v5852_v22, %v466_v32  ;;  %1294 = vperm.xlu2 %3359, %v3586_v29   ;;  %v5854_v17 = vrot.slane %v4086_v41, 1  ;;  %v5855_v0 = vrot.slane %v4092_v50, 2  ;;  %v1620_v56 = vmul.f32 %v1604_v63, %v3429_v2 }
  0xb6   : > { %5853 = vst [vmem:[#allocation10_spill] sm:$0xff] %v4233_v28  ;;  %v499_v61 = vadd.f32 %v467_v46, %v361_v55  ;;  %v1039_v39 = vadd.f32 %v1003_v37, %v902_v51  ;;  %v5856_v15 = vrot.slane %v4106_v49, 1  ;;  %v5857_v38 = vrot.slane %v4119_v48, 2  ;;  %v3165_v37 = vld [vmem:[%s3438_s19 + $0x78] sm:$0xe] }
  0xb7   : > { %v670_v9 = vsel %vm289_vm0, %v5854_v17, %v669_v20  ;;  %v807_v27 = vsel %vm427_vm1, %v5855_v0, %v806_v34  ;;  %v1653_v41 = vmul.f32 %v1604_v63, %v3431_v3  ;;  %v4254_v50 = vmul.f32 %v4233_v28, %v3431_v3  ;;  %v3174_v20 = vld [vmem:[%s3438_s19 + $0x84] sm:$0xff]  }
  0xb8   : > { %v1010_v52 = vsel %vm289_vm0, %v5856_v15, %v1009_v47  ;;  %v1147_v13 = vsel %vm427_vm1, %v5857_v38, %v1146_v54  ;;  %v565_v32 = vadd.f32 %v549_v45, %v499_v61  ;;  %v1779_v60 = vunpack.c.l.bf16 %v3133_v10  ;;  %v3197_v0 = vld [vmem:[%s3438_s19 + $0x84] sm:$0xe] }
  0xb9   : > { %5858 = vst [vmem:[#allocation11_spill] sm:$0xff] %v4254_v50  ;;  %v4258_v14 = vmul.f32 %v4233_v28, %v3433_v4  ;;  %v4261_v49 = vadd.f32 %v1140_v42, %v1039_v39  ;;  %v1703_v58 = vrot.slane %v1653_v41, 1  ;;  %v4263_v48 = vunpack.c.l.bf16 %v3334_v35  ;;  %3358 = vset.pattern.permute.xlu1 %v5724_v24 }
  0xba   : > { %v4265_v43 = vunpack.c.h.bf16 %v3334_v35  ;;  %v702_v45 = vadd.f32 %v670_v9, %v565_v32  ;;  %v5723_v63 = vrot.slane %v4254_v50, 1  ;;  %v1789_v44 = vmul.f32 %v1779_v60, %v3433_v4  ;;  %1278 = vperm.xlu1 %3358, %v3715_v53   ;;  %v3115_v60 = vld [vmem:[%s3438_s19 + $0x88] sm:$0xf] }
  0xbb   : > { %5859 = vst [vmem:[#allocation12_spill] sm:$0xff] %v4258_v14  ;;  %v5722_v16 = vrot.slane %v4258_v14, 2  ;;  %1242 = vperm.xlu0 %3355, %v4261_v49   ;;  %v1941_v42 = vmul.f32 %v4263_v48, %v3440_v5  ;;  %v1990_v55 = vmul.f32 %v4263_v48, %v3442_v6  ;;  %v2116_v46 = vunpack.c.l.bf16 %v3165_v37 }
  0xbc   : > { %5860 = vst [vmem:[#allocation13_spill] sm:$0xff] %v4261_v49  ;;  %v4279_v22 = vmul.f32 %v4265_v43, %v3442_v6  ;;  %v839_v34 = vadd.f32 %v807_v27, %v702_v45  ;;  %v1705_v51 = vsel %vm289_vm0, %v1703_v58, %v5723_v63  ;;  %v1839_v47 = vrot.slane %v1789_v44, 2  ;;  %v3127_v44 = vld [vmem:[%s3438_s19 + $0x8c] sm:$0x1] }
  0xbd   : > { %5861 = vst [vmem:[#allocation14_spill] sm:$0xff] %v4265_v43  ;;  %v4287_v54 = vmul.f32 %v4265_v43, %v3444_v7  ;;  %v1756_v10 = vadd.f32 %v1705_v51, %v1620_v56  ;;  %v2040_v61 = vrot.slane %v1990_v55, 1  ;;  %v2126_v9 = vmul.f32 %v2116_v46, %v3444_v7  ;;  %1302 = vperm.xlu2 %3359, %v3980_v31  }
  0xbe   : > { %5862 = vst [vmem:[#allocation15_spill] sm:$0xff] %v4279_v22  ;;  %v5721_v17 = vrot.slane %v4279_v22, 1  ;;  %v905_v27 = vadd.f32 %v4219_v36, %v839_v34  ;;  %v1841_v35 = vsel %vm427_vm1, %v1839_v47, %v5722_v16  ;;  %v2262_v15 = vunpack.c.l.bf16 %v3174_v20  ;;  %v3130_v22 = vld [vmem:[%s3438_s19 + $0xb0] sm:$0x1] }
  0xbf   : > { %5863 = vst [vmem:[#allocation16_spill] sm:$0xff] %v4287_v54  ;;  %v5719_v39 = vrot.slane %v4287_v54, 2  ;;  %v1892_v38 = vadd.f32 %v1841_v35, %v1756_v10  ;;  %v2176_v41 = vrot.slane %v2126_v9, 2  ;;  %v4301_v32 = vunpack.c.h.bf16 %v3174_v20 }
  0xc0   : > { %v2042_v56 = vsel %vm289_vm0, %v2040_v61, %v5721_v17  ;;  %v1042_v37 = vadd.f32 %v1010_v52, %v905_v27  ;;  %v2278_v58 = vmul.f32 %v2262_v15, %v3449_v11  ;;  %v2327_v36 = vmul.f32 %v2262_v15, %v3451_v12  ;;  %v4325_v27 = vld [vmem:[%s3438_s19 + $0x90] sm:$0xff]   ;;  %v3191_v17 = vld [vmem:[%s3438_s19 + $0xa4] sm:$0x1] }
  0xc1   : > { %5864 = vst [vmem:[#allocation17_spill] sm:$0xff] %v4301_v32  ;;  %v2453_v45 = vunpack.c.l.bf16 %v3197_v0  ;;  %v1957_v55 = vadd.f32 %v1941_v42, %v1892_v38  ;;  %v2178_v46 = vsel %vm427_vm1, %v2176_v41, %v5719_v39  ;;  %v4312_v34 = vmul.f32 %v4301_v32, %v3451_v12 }
  0xc2   : > { %v4316_v20 = vmul.f32 %v4115_v33, %v4301_v32  ;;  %v4318_v52 = vadd.f32 %v1147_v13, %v1042_v37  ;;  %v2377_v51 = vrot.slane %v2327_v36, 1  ;;  %v1609_v10 = vunpack.c.l.bf16 %v3115_v60  ;;  %1290 = vperm.xlu1 %3358, %v3798_v62  }
  0xc3   : > { %5865 = vst [vmem:[#allocation18_spill] sm:$0xff] %v4312_v34  ;;  %v2463_v47 = vmul.f32 %v4115_v33, %v2453_v45  ;;  %v2093_v42 = vadd.f32 %v2042_v56, %v1957_v55  ;;  %v5718_v61 = vrot.slane %v4312_v34, 1  ;;  %v1645_v0 = vunpack.c.l.bf16 %v3127_v44  ;;  %v3159_v56 = vld [vmem:[%s3438_s19 + $0x98] sm:$0x1]  ;;  %v3201_v34 = vld [vmem:[%s3438_s19 + $0xb4] sm:$0xe] }
  0xc4   : > { %5866 = vst [vmem:[#allocation19_spill] sm:$0xff] %v4316_v20  ;;  %v5720_v9 = vrot.slane %v4316_v20, 2  ;;  %1257 = vperm.xlu0 %3355, %v4318_v52   ;;  %v1625_v13 = vmul.f32 %v1609_v10, %v3429_v2  ;;  %v4330_v15 = vmul.f32 %v1609_v10, %v3431_v3  ;;  %v4333_v38 = vmul.f32 %v1609_v10, %v3433_v4 }
  0xc5   : > { %5867 = vst [vmem:[#allocation20_spill] sm:$0xff] %v4318_v52  ;;  %v2513_v35 = vrot.slane %v2463_v47, 2  ;;  %v2229_v41 = vadd.f32 %v2178_v46, %v2093_v42  ;;  %v2379_v60 = vsel %vm289_vm0, %v2377_v51, %v5718_v61  ;;  %v1661_v37 = vmul.f32 %v1645_v0, %v3431_v3  ;;  %1314 = vperm.xlu2 %3359, %v4124_v26   ;;  %v3179_v61 = vld [vmem:[%s3438_s19 + $0x9c] sm:$0xff]  }
  0xc6   : > { %5868 = vst [vmem:[#allocation21_spill] sm:$0xff] %v4330_v15  ;;  %v1797_v36 = vmul.f32 %v1645_v0, %v3433_v4  ;;  %v5726_v44 = vrot.slane %v4330_v15, 1  ;;  %v5727_v55 = vrot.slane %v4333_v38, 2  ;;  %v4348_v46 = vunpack.c.h.bf16 %v4325_v27 }
  0xc7   : > { %5869 = vst [vmem:[#allocation22_spill] sm:$0xff] %v4333_v38  ;;  %v2515_v45 = vsel %vm427_vm1, %v2513_v35, %v5720_v9  ;;  %v2294_v47 = vadd.f32 %v2278_v58, %v2229_v41  ;;  %v1716_v51 = vrot.slane %v1661_v37, 1  ;;  %v1982_v42 = vunpack.c.l.bf16 %v3159_v56 }
  0xc8   : > { %5870 = vst [vmem:[#allocation23_spill] sm:$0xff] %v4348_v46  ;;  %v1852_v10 = vrot.slane %v1797_v36, 2  ;;  %v1946_v0 = vmul.f32 %v4348_v46, %v3440_v5  ;;  %v4355_v39 = vmul.f32 %v4348_v46, %v3442_v6  ;;  %v4359_v35 = vmul.f32 %v4348_v46, %v3444_v7 }
  0xc9   : > { %v2267_v9 = vunpack.c.h.bf16 %v3179_v61  ;;  %v2430_v16 = vadd.f32 %v2379_v60, %v2294_v47  ;;  %v1717_v58 = vsel %vm289_vm0, %v5726_v44, %v1716_v51  ;;  %v1998_v41 = vmul.f32 %v1982_v42, %v3442_v6 }
  0xca   : > { %5871 = vst [vmem:[#allocation24_spill] sm:$0xff] %v4355_v39  ;;  %v1853_v56 = vsel %vm427_vm1, %v5727_v55, %v1852_v10  ;;  %v1761_v37 = vadd.f32 %v1717_v58, %v1625_v13  ;;  %v5731_v36 = vrot.slane %v4355_v39, 1  ;;  %v2134_v63 = vmul.f32 %v1982_v42, %v3444_v7  ;;  %1298 = vperm.xlu1 %3358, %v3767_v18   ;;  %v3119_v42 = vld [vmem:[%s3438_s19 + $0xa0] sm:$0xf] }
  0xcb   : > { %5872 = vst [vmem:[#allocation25_spill] sm:$0xff] %v4359_v35  ;;  %v5734_v24 = vrot.slane %v4359_v35, 2  ;;  %v4372_v60 = vadd.f32 %v2515_v45, %v2430_v16  ;;  %v2053_v47 = vrot.slane %v1998_v41, 1  ;;  %v2283_v51 = vmul.f32 %v2267_v9, %v3449_v11 }
  0xcc   : > { %v2319_v44 = vunpack.c.l.bf16 %v3191_v17  ;;  %v1897_v10 = vadd.f32 %v1853_v56, %v1761_v37  ;;  %v2189_v55 = vrot.slane %v2134_v63, 2  ;;  %v4377_v13 = vmul.f32 %v2267_v9, %v3451_v12  ;;  %v3137_v56 = vld [vmem:[%s3438_s19 + $0x9c] sm:$0xe]  ;;  %v3336_v63 = vld [vmem:[%s3438_s19 + $0xa8] sm:$0xff]  }
  0xcd   : > { %5873 = vst [vmem:[#allocation26_spill] sm:$0xff] %v4372_v60  ;;  %v4380_v58 = vmul.f32 %v4115_v33, %v2267_v9  ;;  %2592 = vperm.xlu0 %3355, %v4372_v60   ;;  %v2054_v16 = vsel %vm289_vm0, %v5731_v36, %v2053_v47  ;;  %v1612_v41 = vunpack.c.l.bf16 %v3179_v61  ;;  %1326 = vperm.xlu2 %3359, %v4261_v49   ;;  %v4397_v38 = vunpack.c.l.bf16 %v3119_v42 }
  0xce   : > { %5874 = vst [vmem:[#allocation27_spill] sm:$0xff] %v4377_v13  ;;  %v2335_v45 = vmul.f32 %v2319_v44, %v3451_v12  ;;  %v2471_v17 = vmul.f32 %v4115_v33, %v2319_v44  ;;  %v1962_v37 = vadd.f32 %v1946_v0, %v1897_v10  ;;  %v2190_v9 = vsel %vm427_vm1, %v5734_v24, %v2189_v55 }
  0xcf   : > { %5875 = vst [vmem:[#allocation28_spill] sm:$0xff] %v4380_v58  ;;  %v5735_v60 = vrot.slane %v4377_v13, 1  ;;  %v5736_v39 = vrot.slane %v4380_v58, 2  ;;  %v1628_v61 = vmul.f32 %v1612_v41, %v3429_v2  ;;  %v1665_v15 = vmul.f32 %v1612_v41, %v3431_v3 }
  0xd0   : > { %v2390_v47 = vrot.slane %v2335_v45, 1  ;;  %v2526_v36 = vrot.slane %v2471_v17, 2  ;;  %v2098_v44 = vadd.f32 %v2054_v16, %v1962_v37  ;;  %v1783_v0 = vunpack.c.l.bf16 %v3137_v56  ;;  %v3169_v17 = vld [vmem:[%s3438_s19 + $0xa8] sm:$0xe] }
  0xd1   : > { %v4401_v10 = vunpack.c.l.bf16 %v3336_v63  ;;  %v4411_v42 = vmul.f32 %v4397_v38, %v3431_v3  ;;  %v4415_v16 = vmul.f32 %v4397_v38, %v3433_v4  ;;  %v1723_v56 = vrot.slane %v1665_v15, 1 }
  0xd2   : > { %v2391_v55 = vsel %vm289_vm0, %v5735_v60, %v2390_v47  ;;  %v2527_v45 = vsel %vm427_vm1, %v5736_v39, %v2526_v36  ;;  %v2234_v41 = vadd.f32 %v2190_v9, %v2098_v44  ;;  %v1801_v37 = vmul.f32 %v1783_v0, %v3433_v4  ;;  %v3182_v47 = vld [vmem:[%s3438_s19 + $0xb4] sm:$0xff]   ;;  %1310 = vperm.xlu1 %3358, %v3894_v23  }
  0xd3   : > { %v4419_v24 = vunpack.c.h.bf16 %v3336_v63  ;;  %v5743_v60 = vrot.slane %v4411_v42, 1  ;;  %v1949_v39 = vmul.f32 %v4401_v10, %v3440_v5  ;;  %v2002_v58 = vmul.f32 %v4401_v10, %v3442_v6 }
  0xd4   : > { %v2299_v9 = vadd.f32 %v2283_v51, %v2234_v41  ;;  %v1859_v15 = vrot.slane %v1801_v37, 2  ;;  %v2120_v44 = vunpack.c.l.bf16 %v3169_v17  ;;  %v2270_v35 = vunpack.c.l.bf16 %v3182_v47 }
  0xd5   : > { %v4431_v63 = vmul.f32 %v4419_v24, %v3442_v6  ;;  %v1725_v0 = vsel %vm289_vm0, %v1723_v56, %v5743_v60  ;;  %v2060_v36 = vrot.slane %v2002_v58, 1  ;;  %v4438_v13 = vmul.f32 %v4419_v24, %v3444_v7  ;;  %1338 = vperm.xlu2 %3359, %v4318_v52  }
  0xd6   : > { %v2435_v51 = vadd.f32 %v2391_v55, %v2299_v9  ;;  %v1764_v41 = vadd.f32 %v1725_v0, %v1628_v61  ;;  %v5876_v37 = vrot.slane %v4415_v16, 2  ;;  %v2138_v54 = vmul.f32 %v2120_v44, %v3444_v7 }
  0xd7   : > { %v5746_v17 = vrot.slane %v4431_v63, 1  ;;  %v5747_v58 = vrot.slane %v4438_v13, 2  ;;  %v4448_v56 = vunpack.c.h.bf16 %v3182_v47  ;;  %v2286_v60 = vmul.f32 %v2270_v35, %v3449_v11 }
  0xd8   : > { %v1861_v20 = vsel %vm427_vm1, %v1859_v15, %v5876_v37  ;;  %v4452_v32 = vadd.f32 %v2527_v45, %v2435_v51  ;;  %v2339_v9 = vmul.f32 %v2270_v35, %v3451_v12  ;;  %v2196_v15 = vrot.slane %v2138_v54, 2  ;;  %v3153_v35 = vld [vmem:[%s3438_s19 + $0xb8] sm:$0xf] }
  0xd9   : > { %v1900_v61 = vadd.f32 %v1861_v20, %v1764_v41  ;;  %v2062_v55 = vsel %vm289_vm0, %v2060_v36, %v5746_v17  ;;  %v4460_v44 = vmul.f32 %v4448_v56, %v3451_v12  ;;  %v2457_v47 = vunpack.c.l.bf16 %v3201_v34 }
  0xda   : > { %5877 = vst [vmem:[#allocation29_spill] sm:$0xff] %v4452_v32  ;;  %v4464_v0 = vmul.f32 %v4115_v33, %v4448_v56  ;;  %2617 = vperm.xlu0 %3355, %v4452_v32   ;;  %v2397_v45 = vrot.slane %v2339_v9, 1  ;;  %v1631_v36 = vmul.f32 %v4419_v24, %v3429_v2  ;;  %v1648_v51 = vunpack.c.l.bf16 %v3130_v22  ;;  %1322 = vperm.xlu1 %3358, %v4011_v8   ;;  %v3162_v9 = vld [vmem:[%s3438_s19 + $0xbc] sm:$0x1] }
  0xdb   : > { %v1965_v20 = vadd.f32 %v1949_v39, %v1900_v61  ;;  %v2198_v54 = vsel %vm427_vm1, %v2196_v15, %v5747_v58  ;;  %v5760_v34 = vrot.slane %v4460_v44, 1  ;;  %v2475_v41 = vmul.f32 %v4115_v33, %v2457_v47 }
  0xdc   : > { %v4479_v39 = vmul.f32 %v4419_v24, %v3431_v3  ;;  %v1670_v22 = vmul.f32 %v1648_v51, %v3431_v3  ;;  %v4484_v61 = vmul.f32 %v4419_v24, %v3433_v4  ;;  %v5880_v50 = vrot.slane %v4464_v0, 2 }
  0xdd   : > { %v2101_v17 = vadd.f32 %v2062_v55, %v1965_v20  ;;  %v2399_v15 = vsel %vm289_vm0, %v2397_v45, %v5760_v34  ;;  %v2533_v47 = vrot.slane %v2475_v41, 2  ;;  %v1806_v55 = vmul.f32 %v1648_v51, %v3433_v4  ;;  %v4498_v45 = vld [vmem:[%s3438_s19 + $0xc0] sm:$0xff]  }
  0xde   : > { %5878 = vst [vmem:[#allocation30_spill] sm:$0xff] %v4479_v39  ;;  %v1936_v20 = vunpack.c.l.bf16 %v3153_v35  ;;  %v5759_v37 = vrot.slane %v4479_v39, 1  ;;  %v1731_v32 = vrot.slane %v1670_v22, 1  ;;  %v5762_v14 = vrot.slane %v4484_v61, 2 }
  0xdf   : > { %5879 = vst [vmem:[#allocation31_spill] sm:$0xff] %v4484_v61  ;;  %v2237_v58 = vadd.f32 %v2198_v54, %v2101_v17  ;;  %v2535_v28 = vsel %vm427_vm1, %v2533_v47, %v5880_v50  ;;  %v1867_v8 = vrot.slane %v1806_v55, 2  ;;  %v1985_v18 = vunpack.c.l.bf16 %v3162_v9  ;;  %v3194_v54 = vld [vmem:[%s3438_s19 + $0xc8] sm:$0x1] }
  0xe0   : > { %v1952_v23 = vmul.f32 %v1936_v20, %v3440_v5  ;;  %v1732_v17 = vsel %vm289_vm0, %v5759_v37, %v1731_v32  ;;  %v4504_v51 = vmul.f32 %v1936_v20, %v3442_v6  ;;  %v4507_v35 = vmul.f32 %v1936_v20, %v3444_v7  ;;  %v4520_v20 = vpop.permute.xlu2 %1202 }
  0xe1   : > { %v2302_v41 = vadd.f32 %v2286_v60, %v2237_v58  ;;  %v1767_v22 = vadd.f32 %v1732_v17, %v1631_v36  ;;  %v1868_v50 = vsel %vm427_vm1, %v5762_v14, %v1867_v8  ;;  %v2007_v9 = vmul.f32 %v1985_v18, %v3442_v6 }
  0xe2   : > { %5881 = vst [vmem:[#allocation32_spill] sm:$0xff] %v4504_v51  ;;  %v2143_v60 = vmul.f32 %v1985_v18, %v3444_v7  ;;  %v5761_v47 = vrot.slane %v4504_v51, 1  ;;  %v5764_v32 = vrot.slane %v4507_v35, 2  ;;  %v4518_v55 = vunpack.c.h.bf16 %v4498_v45  ;;  %1334 = vperm.xlu1 %3358, %v4164_v40  }
  0xe3   : > { %5882 = vst [vmem:[#allocation33_spill] sm:$0xff] %v4507_v35  ;;  %v2438_v58 = vadd.f32 %v2399_v15, %v2302_v41  ;;  %v1903_v36 = vadd.f32 %v1868_v50, %v1767_v22  ;;  %v2068_v17 = vrot.slane %v2007_v9, 1  ;;  %v2322_v34 = vunpack.c.l.bf16 %v3194_v54 }
  0xe4   : > { %5883 = vst [vmem:[#allocation34_spill] sm:$0xff] %v4518_v55  ;;  %v2204_v37 = vrot.slane %v2143_v60, 2  ;;  %v4527_v18 = vmul.f32 %v4518_v55, %v3451_v12  ;;  %v4531_v15 = vmul.f32 %v4115_v33, %v4518_v55  ;;  %v2289_v54 = vmul.f32 %v4518_v55, %v3449_v11 }
  0xe5   : > { %v4523_v8 = vadd.f32 %v2535_v28, %v2438_v58  ;;  %v1968_v41 = vadd.f32 %v1952_v23, %v1903_v36  ;;  %v2069_v22 = vsel %vm289_vm0, %v5761_v47, %v2068_v17  ;;  %v2344_v50 = vmul.f32 %v2322_v34, %v3451_v12  ;;  %v3132_v28 = vld [vmem:[%s3438_s19 + $0x60] sm:$0xe] }
  0xe6   : > { %5885 = vst [vmem:[#allocation36_spill] sm:$0xff] %v4527_v18  ;;  %v2205_v9 = vsel %vm427_vm1, %v5764_v32, %v2204_v37  ;;  %v5770_v60 = vrot.slane %v4527_v18, 1  ;;  %v2480_v23 = vmul.f32 %v4115_v33, %v2322_v34  ;;  %v5765_v47 = vmov 2   ;;  %v3140_v34 = vld [vmem:[%s3438_s19 + $0x6c] sm:$0xff]  }
  0xe7   : > { %5884 = vst [vmem:[#allocation35_spill] sm:$0xff] %v4523_v8  ;;  %2632 = vperm.xlu0 %3355, %v4523_v8   ;;  %v2104_v58 = vadd.f32 %v2069_v22, %v1968_v41  ;;  %v2405_v36 = vrot.slane %v2344_v50, 1  ;;  %3361 = vset.pattern.permute.xlu2 %v5765_v47  ;;  %v1650_v14 = vmul.f32 %v4066_v19, %v3431_v3  ;;  %v1778_v32 = vunpack.c.l.bf16 %v3132_v28 }
  0xe8   : > { %5886 = vst [vmem:[#allocation37_spill] sm:$0xff] %v4531_v15  ;;  %v2541_v51 = vrot.slane %v2480_v23, 2  ;;  %1383 = vperm.xlu2 %3361, %v3641_v1   ;;  %v4553_v37 = vmul.f32 %v4068_v21, %v3431_v3  ;;  %v1618_v22 = vmul.f32 %v4066_v19, %v3429_v2  ;;  %v4561_v17 = vpop.permute.xlu2 %1207  ;;  %v4567_v35 = vmul.f32 %v4068_v21, %v3433_v4 }
  0xe9   : > { %v2240_v41 = vadd.f32 %v2205_v9, %v2104_v58  ;;  %v1698_v50 = vrot.slane %v1650_v14, 1  ;;  %v2406_v47 = vsel %vm289_vm0, %v5770_v60, %v2405_v36  ;;  %5888 = vst [vmem:[#allocation39_spill] sm:$0xff] %v4561_v17  ;;  %v1786_v8 = vmul.f32 %v1778_v32, %v3433_v4  ;;  %v3164_v36 = vld [vmem:[%s3438_s19 + $0x6c] sm:$0xe] }
  0xea   : > { %5887 = vst [vmem:[#allocation38_spill] sm:$0xff] %v4553_v37  ;;  %v5774_v23 = vrot.slane %v4553_v37, 1  ;;  %v5890_v9 = vrot.slane %v4531_v15, 2  ;;  %v5891_v14 = vmov 2   ;;  %v1923_v58 = vunpack.c.l.bf16 %v3140_v34  ;;  %v3196_v15 = vld [vmem:[%s3438_s19 + $0x78] sm:$0xe] }
  0xeb   : > { %5889 = vst [vmem:[#allocation40_spill] sm:$0xff] %v4567_v35  ;;  %v2305_v28 = vadd.f32 %v2289_v54, %v2240_v41  ;;  %3360 = vset.pattern.permute.xlu1 %v5891_v14  ;;  %v1834_v60 = vrot.slane %v1786_v8, 2  ;;  %v5775_v18 = vrot.slane %v4567_v35, 2  ;;  %v4579_v61 = vunpack.c.h.bf16 %v3140_v34 }
  0xec   : > { %v2542_v19 = vsel %vm427_vm1, %v5890_v9, %v2541_v51  ;;  %1379 = vperm.xlu1 %3360, %v3850_v59   ;;  %v1700_v32 = vsel %vm289_vm0, %v1698_v50, %v5774_v23  ;;  %v173_v51 = vld [vmem:[%s5689_s2] sm:$0x3]  ;;  %v1939_v9 = vmul.f32 %v1923_v58, %v3440_v5  ;;  %v1987_v59 = vmul.f32 %v1923_v58, %v3442_v6 }
  0xed   : > { %5892 = vst [vmem:[#allocation41_spill] sm:$0xff] %v4579_v61  ;;  %v2441_v54 = vadd.f32 %v2406_v47, %v2305_v28  ;;  %v1754_v41 = vadd.f32 %v1700_v32, %v1618_v22  ;;  %v1836_v50 = vsel %vm427_vm1, %v1834_v60, %v5775_v18  ;;  %v4591_v8 = vmul.f32 %v4579_v61, %v3442_v6  ;;  %v3126_v28 = vld [vmem:[%s3438_s19 + $0x80] sm:$0x1] }
  0xee   : > { %v2115_v34 = vunpack.c.l.bf16 %v3164_v36  ;;  %v4595_v47 = vmul.f32 %v4579_v61, %v3444_v7  ;;  %v2035_v23 = vrot.slane %v1987_v59, 1  ;;  %v4600_v58 = vunpack.c.l.bf16 %v173_v51  ;;  %v3145_v51 = vld [vmem:[%s3438_s19 + $0x88] sm:$0xf] }
  0xef   : > { %5893 = vst [vmem:[#allocation42_spill] sm:$0xff] %v4591_v8  ;;  %v4598_v22 = vadd.f32 %v2542_v19, %v2441_v54  ;;  %v1890_v32 = vadd.f32 %v1836_v50, %v1754_v41  ;;  %v5778_v60 = vrot.slane %v4591_v8, 1  ;;  %v1644_v39 = vunpack.c.l.bf16 %v3126_v28  ;;  %v3158_v28 = vld [vmem:[%s3438_s19 + $0x8c] sm:$0x1] }
  0xf0   : > { %5894 = vst [vmem:[#allocation43_spill] sm:$0xff] %v4595_v47  ;;  %1391 = vperm.xlu2 %3361, %v3586_v29   ;;  %v2123_v18 = vmul.f32 %v2115_v34, %v3444_v7  ;;  %v4607_v14 = vpop.permute.xlu2 %1222  ;;  %v5785_v54 = vrot.slane %v4595_v47, 2  ;;  %v4615_v41 = vperm.slane %v4600_v58, 0  ;;  %v2452_v50 = vunpack.c.l.bf16 %v3196_v15 }
  0xf1   : > { %5895 = vst [vmem:[#allocation44_spill] sm:$0xff] %v4598_v22  ;;  %2647 = vperm.xlu0 %3355, %v4598_v22   ;;  %v1955_v36 = vadd.f32 %v1939_v9, %v1890_v32  ;;  %v2037_v59 = vsel %vm289_vm0, %v2035_v23, %v5778_v60  ;;  %v1623_v9 = vmul.f32 %v4265_v43, %v3429_v2  ;;  %v1928_v17 = vunpack.c.l.bf16 %v3145_v51 }
  0xf2   : > { %5896 = vst [vmem:[#allocation45_spill] sm:$0xff] %v4607_v14  ;;  %v2171_v19 = vrot.slane %v2123_v18, 2  ;;  %v4622_v34 = vmul.f32 %v4265_v43, %v3431_v3  ;;  %v2324_v18 = vmul.f32 %v4263_v48, %v3451_v12  ;;  %v1658_v23 = vmul.f32 %v1644_v39, %v3431_v3 }
  0xf3   : > { %v2091_v32 = vadd.f32 %v2037_v59, %v1955_v36  ;;  %v4630_v60 = vmul.f32 %v4265_v43, %v3433_v4  ;;  %v1794_v14 = vmul.f32 %v1644_v39, %v3433_v4  ;;  %v4639_v36 = vmul.f32 %v4265_v43, %v3451_v12 }
  0xf4   : > { %1387 = vperm.xlu1 %3360, %v3798_v62   ;;  %5897 = vst [vmem:[#allocation46_spill] sm:$0xff] %v4622_v34  ;;  %v2173_v15 = vsel %vm427_vm1, %v2171_v19, %v5785_v54  ;;  %v1711_v59 = vrot.slane %v1658_v23, 1  ;;  %v1981_v8 = vunpack.c.l.bf16 %v3158_v28  ;;  %v2460_v47 = vmul.f32 %v4115_v33, %v2452_v50 }
  0xf5   : > { %5898 = vst [vmem:[#allocation47_spill] sm:$0xff] %v4630_v60  ;;  %v4646_v19 = vmul.f32 %v4115_v33, %v4265_v43  ;;  %v1847_v54 = vrot.slane %v1794_v14, 2  ;;  %v4649_v39 = vmul.f32 %v1928_v17, %v3442_v6  ;;  %v5902_v51 = vmov 1  }
  0xf6   : > { %5899 = vst [vmem:[#allocation48_spill] sm:$0xff] %v4639_v36  ;;  %v2227_v22 = vadd.f32 %v2173_v15, %v2091_v32  ;;  %v2276_v23 = vmul.f32 %v4263_v48, %v3449_v11  ;;  %v5903_v28 = vrot.slane %v4622_v34, 1  ;;  %v1995_v50 = vmul.f32 %v1981_v8, %v3442_v6  ;;  %v3190_v48 = vld [vmem:[%s3438_s19 + $0x98] sm:$0x1] }
  0xf7   : > { %5900 = vst [vmem:[#allocation49_spill] sm:$0xff] %v4646_v19  ;;  %v5905_v61 = vrot.slane %v4630_v60, 2  ;;  %v1944_v32 = vmul.f32 %v1928_v17, %v3440_v5  ;;  %v4666_v15 = vmul.f32 %v1928_v17, %v3444_v7  ;;  %v2131_v34 = vmul.f32 %v1981_v8, %v3444_v7 }
  0xf8   : > { %1403 = vperm.xlu2 %3361, %v3941_v30   ;;  %5901 = vst [vmem:[#allocation50_spill] sm:$0xff] %v4649_v39  ;;  %v1712_v40 = vsel %vm289_vm0, %v5903_v28, %v1711_v59  ;;  %v4659_v43 = vpop.permute.xlu2 %1237  ;;  %v2048_v28 = vrot.slane %v1995_v50, 1  ;;  %v2292_v59 = vadd.f32 %v2276_v23, %v2227_v22  ;;  %v4696_v22 = vmul.f32 %v4348_v46, %v3431_v3  ;;  %v3148_v23 = vld [vmem:[%s3438_s19 + $0x9c] sm:$0xff]  }
  0xf9   : > { %3366 = vset.pattern.permute.xlu0 %v5902_v51  ;;  %5904 = vst [vmem:[#allocation51_spill] sm:$0xff] %v4659_v43  ;;  %v1759_v14 = vadd.f32 %v1712_v40, %v1623_v9  ;;  %v1848_v35 = vsel %vm427_vm1, %v5905_v61, %v1847_v54  ;;  %v2372_v51 = vrot.slane %v2324_v18, 1  ;;  %v2508_v9 = vrot.slane %v2460_v47, 2  ;;  %v4674_v54 = vpop.permute.xlu1 %1192  ;;  %v3136_v40 = vld [vmem:[%s3438_s19 + $0x90] sm:$0xe]  ;;  %v4685_v47 = vpop.permute.xlu0 %1182 }
  0xfa   : > { %1286 = vperm.xlu0 %3366, %v3641_v1   ;;  %5906 = vst [vmem:[#allocation52_spill] sm:$0xff] %v4666_v15  ;;  %v4678_v18 = vmul.f32 %v4615_v41, %v4520_v20  ;;  %v2318_v43 = vunpack.c.l.bf16 %v3190_v48  ;;  %v5909_v61 = vrot.slane %v4649_v39, 1  ;;  %v4692_v20 = vmul.f32 %v4348_v46, %v3451_v12 }
  0xfb   : > { %5907 = vst [vmem:[#allocation53_spill] sm:$0xff] %v4674_v54  ;;  %v1895_v17 = vadd.f32 %v1848_v35, %v1759_v14  ;;  %v2184_v35 = vrot.slane %v2131_v34, 2  ;;  %v4708_v34 = vmul.f32 %v4115_v33, %v4348_v46  ;;  %v4721_v39 = vmul.f32 %v4348_v46, %v3433_v4 }
  0xfc   : > { %1399 = vperm.xlu1 %3360, %v3980_v31   ;;  %v4682_v31 = vunpack.c.l.bf16 %v4325_v27  ;;  %v2049_v54 = vsel %vm289_vm0, %v5909_v61, %v2048_v28  ;;  %5910 = vst [vmem:[#allocation55_spill] sm:$0xff] %v4696_v22  ;;  %v5911_v27 = vrot.slane %v4639_v36, 1  ;;  %v2332_v61 = vmul.f32 %v2318_v43, %v3451_v12 }
  0xfd   : > { %v1960_v50 = vadd.f32 %v1944_v32, %v1895_v17  ;;  %v5912_v32 = vrot.slane %v4646_v19, 2  ;;  %5914 = vst [vmem:[#allocation57_spill] sm:$0xff] %v4721_v39  ;;  %v1931_v19 = vunpack.c.l.bf16 %v3148_v23  ;;  %v5915_v60 = vrot.slane %v4666_v15, 2 }
  0xfe   : > { %5908 = vst [vmem:[#allocation54_spill] sm:$0xff] %v4682_v31  ;;  %v2374_v14 = vsel %vm289_vm0, %v2372_v51, %v5911_v27  ;;  %v1662_v28 = vmul.f32 %v4682_v31, %v3431_v3  ;;  %v1626_v17 = vmul.f32 %v4682_v31, %v3429_v2  ;;  %v1782_v27 = vunpack.c.l.bf16 %v3136_v40  ;;  %v3168_v31 = vld [vmem:[%s3438_s19 + $0x9c] sm:$0xe] }
  0xff   : > { %v2510_v48 = vsel %vm427_vm1, %v2508_v9, %v5912_v32  ;;  %v2096_v9 = vadd.f32 %v2049_v54, %v1960_v50  ;;  %v2428_v36 = vadd.f32 %v2374_v14, %v2292_v59  ;;  %v2185_v37 = vsel %vm427_vm1, %v5915_v60, %v2184_v35 }
 0x100   : > { %1415 = vperm.xlu2 %3361, %v4072_v25   ;;  %v4717_v32 = vpop.permute.xlu2 %1252  ;;  %v1718_v8 = vrot.slane %v1662_v28, 1  ;;  %v2281_v51 = vmul.f32 %v4348_v46, %v3449_v11  ;;  %v2468_v54 = vmul.f32 %v4115_v33, %v2318_v43  ;;  %v5916_v28 = vrot.slane %v4696_v22, 1 }
 0x101   : > { %5913 = vst [vmem:[#allocation56_spill] sm:$0xff] %v4717_v32  ;;  %v1798_v14 = vmul.f32 %v1782_v27, %v3433_v4  ;;  %v2385_v60 = vrot.slane %v2332_v61, 1  ;;  %v5802_v46 = vrot.slane %v4721_v39, 2  ;;  %v4738_v32 = vunpack.c.h.bf16 %v3148_v23  ;;  %v4740_v15 = vpop.permute.xlu1 %1197 }
 0x102   : > { %1306 = vperm.xlu0 %3366, %v3941_v30   ;;  %v1720_v59 = vsel %vm289_vm0, %v1718_v8, %v5916_v28  ;;  %v2232_v40 = vadd.f32 %v2185_v37, %v2096_v9  ;;  %5918 = vst [vmem:[#allocation59_spill] sm:$0xff] %v4740_v15  ;;  %v1999_v33 = vmul.f32 %v1931_v19, %v3442_v6  ;;  %v2119_v43 = vunpack.c.l.bf16 %v3168_v31  ;;  %v3200_v37 = vld [vmem:[%s3438_s19 + $0xa8] sm:$0xe]  ;;  %v1188_v9 = vpop.permute.xlu0 %1187 }
 0x103   : > { %v1762_v35 = vadd.f32 %v1720_v59, %v1626_v17  ;;  %5917 = vst [vmem:[#allocation58_spill] sm:$0xff] %v4738_v32  ;;  %v1947_v50 = vmul.f32 %v1931_v19, %v3440_v5  ;;  %v4746_v8 = vmul.f32 %v4738_v32, %v3442_v6  ;;  %v4750_v61 = vmul.f32 %v4738_v32, %v3444_v7  ;;  %v3129_v32 = vld [vmem:[%s3438_s19 + $0xa4] sm:$0x1] }
 0x104   : > { %1411 = vperm.xlu1 %3360, %v4124_v26   ;;  %v1854_v26 = vrot.slane %v1798_v14, 2  ;;  %v2336_v23 = vmul.f32 %v4401_v10, %v3451_v12  ;;  %v2521_v17 = vrot.slane %v2468_v54, 2  ;;  %v2055_v19 = vrot.slane %v1999_v33, 1 }
 0x105   : > { %v2135_v27 = vmul.f32 %v2119_v43, %v3444_v7  ;;  %v5807_v59 = vrot.slane %v4746_v8, 1  ;;  %v4764_v15 = vmul.f32 %v4419_v24, %v3451_v12  ;;  %v2297_v54 = vadd.f32 %v2281_v51, %v2232_v40 }
 0x106   : > { %v1856_v31 = vsel %vm427_vm1, %v1854_v26, %v5802_v46  ;;  %v5919_v26 = vrot.slane %v4692_v20, 1  ;;  %v2456_v46 = vunpack.c.l.bf16 %v3200_v37  ;;  %v2392_v39 = vrot.slane %v2336_v23, 1 }
 0x107   : > { %v1898_v28 = vadd.f32 %v1856_v31, %v1762_v35  ;;  %v2191_v43 = vrot.slane %v2135_v27, 2  ;;  %v2057_v14 = vsel %vm289_vm0, %v2055_v19, %v5807_v59  ;;  %v5808_v22 = vrot.slane %v4764_v15, 1  ;;  %v3161_v27 = vld [vmem:[%s3438_s19 + $0xb0] sm:$0x1] }
 0x108   : > { %1427 = vperm.xlu2 %3361, %v4214_v57   ;;  %v2386_v33 = vsel %vm289_vm0, %v5919_v26, %v2385_v60  ;;  %v1283_v35 = vpop.permute.xlu2 %1282  ;;  %v5921_v51 = vrot.slane %v4708_v34, 2  ;;  %v1262_v60 = vmul.f32 %v4615_v41, %v1188_v9  ;;  %v2284_v23 = vmul.f32 %v4401_v10, %v3449_v11 }
 0x109   : > { %v1963_v31 = vadd.f32 %v1947_v50, %v1898_v28  ;;  %v5922_v50 = vrot.slane %v4750_v61, 2  ;;  %v2433_v28 = vadd.f32 %v2386_v33, %v2297_v54  ;;  %v2394_v10 = vsel %vm289_vm0, %v2392_v39, %v5808_v22 }
 0x10a   : > { %1318 = vperm.xlu0 %3366, %v4072_v25   ;;  %v4775_v25 = vadd.f32 %v2510_v48, %v2428_v36  ;;  %v2522_v40 = vsel %vm427_vm1, %v5921_v51, %v2521_v17  ;;  %v4789_v36 = vperm.slane %v4600_v58, 1  ;;  %v3193_v48 = vld [vmem:[%s3438_s19 + $0xbc] sm:$0x1]  ;;  %v4795_v17 = vld [vmem:[%s5688_s1 + $0x8] ss:$0 sm:$0xff]  ;;  %v1984_v33 = vunpack.c.l.bf16 %v3161_v27 }
 0x10b   : > { %v2193_v37 = vsel %vm427_vm1, %v2191_v43, %v5922_v50  ;;  %v2099_v19 = vadd.f32 %v2057_v14, %v1963_v31  ;;  %v4798_v9 = vmul.f32 %v4795_v17, %v2456_v46  ;;  %v4802_v26 = vmul.f32 %v4795_v17, %v4419_v24  ;;  %v4808_v31 = vpop.permute.xlu1 %1217 }
 0x10c   : > { %5920 = vst [vmem:[#allocation60_spill] sm:$0xff] %v4775_v25  ;;  %1423 = vperm.xlu1 %3360, %v4261_v49   ;;  %v1647_v14 = vunpack.c.l.bf16 %v3129_v32  ;;  %v1343_v54 = vmul.f32 %v4789_v36, %v1283_v35  ;;  %v5809_v51 = vmov 3   ;;  %v1629_v46 = vmul.f32 %v4397_v38, %v3429_v2 }
 0x10d   : > { %v2235_v43 = vadd.f32 %v2193_v37, %v2099_v19  ;;  %5923 = vst [vmem:[#allocation61_spill] sm:$0xff] %v4808_v31  ;;  %v2321_v37 = vunpack.c.l.bf16 %v3193_v48  ;;  %v2004_v39 = vmul.f32 %v1984_v33, %v3442_v6  ;;  %v2140_v35 = vmul.f32 %v1984_v33, %v3444_v7 }
 0x10e   : > { %v1667_v50 = vmul.f32 %v1647_v14, %v3431_v3  ;;  %v1803_v32 = vmul.f32 %v1647_v14, %v3433_v4  ;;  %v4815_v59 = vadd.f32 %v1343_v54, %v1262_v60  ;;  %v4825_v60 = vadd.f32 %v2522_v40, %v2433_v28  ;;  %v1213_v54 = vpop.permute.xlu0 %1212 }
 0x10f   : > { %v2300_v19 = vadd.f32 %v2284_v23, %v2235_v43  ;;  %v2341_v22 = vmul.f32 %v2321_v37, %v3451_v12  ;;  %v4823_v14 = vmul.f32 %v4795_v17, %v2321_v37  ;;  %v2063_v33 = vrot.slane %v2004_v39, 1 }
 0x110   : > { %3362 = vset.pattern.permute.xlu2 %v5809_v51  ;;  %v1726_v27 = vrot.slane %v1667_v50, 1  ;;  %v1862_v38 = vrot.slane %v1803_v32, 2  ;;  %v1295_v23 = vpop.permute.xlu2 %1294  ;;  %v2528_v51 = vrot.slane %v4798_v9, 2  ;;  %v4833_v50 = vmul.f32 %v4615_v41, %v1213_v54  ;;  %v3171_v54 = vld [vmem:[%s3438_s19 + $0xc0] sm:$0xe] }
 0x111   : > { %1472 = vperm.xlu2 %3362, %v3715_v53   ;;  %v4827_v48 = vadd.f32 %v2394_v10, %v2300_v19  ;;  %v5924_v32 = vrot.slane %v4411_v42, 1  ;;  %v5925_v40 = vrot.slane %v4415_v16, 2  ;;  %v3122_v10 = vld [vmem:[%s3438_s19 + $0xb4] sm:$0xff]   ;;  %v1950_v39 = vmul.f32 %v4419_v24, %v3440_v5 }
 0x112   : > { %1330 = vperm.xlu0 %3366, %v4214_v57   ;;  %v3139_v19 = vld [vmem:[%s3438_s19 + $0xb4] sm:$0xe]  ;;  %v2199_v9 = vrot.slane %v2140_v35, 2  ;;  %v5926_v49 = vrot.slane %v4431_v63, 1  ;;  %v2536_v16 = vrot.slane %v4823_v14, 2  ;;  %v2122_v63 = vunpack.c.l.bf16 %v3171_v54 }
 0x113   : > { %v1727_v37 = vsel %vm289_vm0, %v5924_v32, %v1726_v27  ;;  %v1863_v28 = vsel %vm427_vm1, %v5925_v40, %v1862_v38  ;;  %v2400_v27 = vrot.slane %v2341_v22, 1  ;;  %v1346_v38 = vmul.f32 %v4789_v36, %v1295_v23 }
 0x114   : > { %1435 = vperm.xlu1 %3360, %v4318_v52   ;;  %v1765_v43 = vadd.f32 %v1727_v37, %v1629_v46  ;;  %v2287_v52 = vmul.f32 %v4448_v56, %v3449_v11  ;;  %v2064_v42 = vsel %vm289_vm0, %v5926_v49, %v2063_v33  ;;  %v1616_v40 = vunpack.c.l.bf16 %v3122_v10 }
 0x115   : > { %v4853_v46 = vunpack.c.h.bf16 %v3122_v10  ;;  %v1785_v37 = vunpack.c.l.bf16 %v3139_v19  ;;  %v4856_v35 = vadd.f32 %v1346_v38, %v4678_v18  ;;  %v4859_v56 = vunpack.c.l.bf16 %v4498_v45  ;;  %v4875_v45 = vpop.permute.xlu1 %1232  ;;  %v3186_v10 = vld [vmem:[%s3438_s19 + $0xcc] sm:$0xff]  }
 0x116   : > { %v1901_v32 = vadd.f32 %v1863_v28, %v1765_v43  ;;  %v4863_v49 = vmul.f32 %v4518_v55, %v3442_v6  ;;  %v5928_v14 = vrot.slane %v4438_v13, 2  ;;  %v1671_v43 = vmul.f32 %v1616_v40, %v3431_v3  ;;  %5929 = vst [vmem:[#allocation63_spill] sm:$0xff] %v4875_v45 }
 0x117   : > { %v4872_v18 = vmul.f32 %v4853_v46, %v3431_v3  ;;  %v1632_v33 = vmul.f32 %v1616_v40, %v3429_v2  ;;  %v1807_v28 = vmul.f32 %v1785_v37, %v3433_v4  ;;  %v4881_v13 = vmul.f32 %v4853_v46, %v3433_v4 }
 0x118   : > { %5927 = vst [vmem:[#allocation62_spill] sm:$0xff] %v4863_v49  ;;  %v1966_v22 = vadd.f32 %v1950_v39, %v1901_v32  ;;  %v2200_v23 = vsel %vm427_vm1, %v5928_v14, %v2199_v9  ;;  %v1303_v19 = vpop.permute.xlu2 %1302  ;;  %v1733_v9 = vrot.slane %v1671_v43, 1  ;;  %v5930_v32 = vmov 3  }
 0x119   : > { %1484 = vperm.xlu2 %3362, %v3798_v62   ;;  %v2008_v62 = vmul.f32 %v4859_v56, %v3442_v6  ;;  %v5813_v54 = vrot.slane %v4872_v18, 1  ;;  %v1869_v40 = vrot.slane %v1807_v28, 2  ;;  %v2144_v45 = vmul.f32 %v2122_v63, %v3444_v7 }
 0x11a   : > { %2677 = vperm.xlu0 %3366, %v4775_v25   ;;  %v2102_v39 = vadd.f32 %v2064_v42, %v1966_v22  ;;  %v4897_v22 = vmul.f32 %v4518_v55, %v3444_v7  ;;  %v2274_v43 = vunpack.c.l.bf16 %v3186_v10  ;;  %v5932_v38 = vrot.slane %v4460_v44, 1 }
 0x11b   : > { %v2070_v14 = vrot.slane %v2008_v62, 1  ;;  %v1735_v42 = vsel %vm289_vm0, %v1733_v9, %v5813_v54  ;;  %v5933_v62 = vrot.slane %v4881_v13, 2  ;;  %v2206_v9 = vrot.slane %v2144_v45, 2  ;;  %v5938_v54 = vld [vmem:[#allocation2_spill] sm:$0xff] }
 0x11c   : > { %3363 = vset.pattern.permute.xlu1 %v5930_v32  ;;  %v2238_v31 = vadd.f32 %v2200_v23, %v2102_v39  ;;  %5931 = vst [vmem:[#allocation64_spill] sm:$0xff] %v4897_v22  ;;  %v2401_v28 = vsel %vm289_vm0, %v5932_v38, %v2400_v27  ;;  %v1768_v37 = vadd.f32 %v1735_v42, %v1632_v33  ;;  %v3203_v23 = vld [vmem:[%s3438_s19 + $0xcc] sm:$0xe]  ;;  %v4909_v32 = vunpack.c.h.bf16 %v3186_v10 }
 0x11d   : > { %1480 = vperm.xlu1 %3363, %v3641_v1   ;;  %v1871_v63 = vsel %vm427_vm1, %v1869_v40, %v5933_v62  ;;  %v1953_v1 = vmul.f32 %v4859_v56, %v3440_v5  ;;  %v5935_v55 = vrot.slane %v4802_v26, 2  ;;  %v5936_v27 = vrot.slane %v4464_v0, 2  ;;  %v1228_v62 = vpop.permute.xlu0 %1227 }
 0x11e   : > { %v2303_v39 = vadd.f32 %v2287_v52, %v2238_v31  ;;  %5934 = vst [vmem:[#allocation65_spill] sm:$0xff] %v4909_v32  ;;  %v1904_v38 = vadd.f32 %v1871_v63, %v1768_v37  ;;  %v1348_v40 = vmul.f32 %v4789_v36, %v1303_v19  ;;  %v5937_v52 = vrot.slane %v4863_v49, 1 }
 0x11f   : > { %v2530_v44 = vsel %vm427_vm1, %v2528_v51, %v5935_v55  ;;  %v2537_v33 = vsel %vm427_vm1, %v5936_v27, %v2536_v16  ;;  %v2345_v45 = vmul.f32 %v2274_v43, %v3451_v12  ;;  %v2459_v10 = vunpack.c.l.bf16 %v3203_v23 }
 0x120   : > { %v2439_v42 = vadd.f32 %v2401_v28, %v2303_v39  ;;  %v2072_v31 = vsel %vm289_vm0, %v2070_v14, %v5937_v52  ;;  %v1270_v0 = vmul.f32 %v4615_v41, %v1228_v62  ;;  %v1969_v55 = vadd.f32 %v1953_v1, %v1904_v38  ;;  %v1315_v28 = vpop.permute.xlu2 %1314 }
 0x121   : > { %1492 = vperm.xlu2 %3362, %v5938_v54   ;;  %v4927_v51 = vmul.f32 %v4909_v32, %v3451_v12  ;;  %v4930_v16 = vadd.f32 %v1348_v40, %v4833_v50  ;;  %v5941_v37 = vrot.slane %v4897_v22, 2  ;;  %v4938_v63 = vadd.f32 %v2530_v44, %v4827_v48  ;;  %v5963_v22 = vld [vmem:[#allocation47_spill] sm:$0xff] }
 0x122   : > { %2697 = vperm.xlu0 %3366, %v4825_v60   ;;  %v4932_v19 = vadd.f32 %v2537_v33, %v2439_v42  ;;  %v2105_v23 = vadd.f32 %v2072_v31, %v1969_v55  ;;  %v1351_v1 = vmul.f32 %v4789_v36, %v1315_v28  ;;  %v2290_v27 = vmul.f32 %v2274_v43, %v3449_v11 }
 0x123   : > { %5939 = vst [vmem:[#allocation2_spill] sm:$0xff] %v4927_v51  ;;  %v2208_v14 = vsel %vm427_vm1, %v2206_v9, %v5941_v37  ;;  %v4940_v39 = vpop.permute.xlu1 %1247  ;;  %v2407_v38 = vrot.slane %v2345_v45, 1  ;;  %v2481_v50 = vmul.f32 %v4795_v17, %v2459_v10  ;;  %v4947_v33 = vmul.f32 %v4795_v17, %v4909_v32  ;;  %v3124_v9 = vld [vmem:[%s3438_s19 + $0x68] sm:$0x1]  ;;  %v5945_v45 = vld [vmem:[#allocation4_spill] sm:$0xff] }
 0x124   : > { %5940 = vst [vmem:[#allocation66_spill] sm:$0xff] %v4930_v16  ;;  %v2241_v48 = vadd.f32 %v2208_v14, %v2105_v23  ;;  %v5815_v44 = vrot.slane %v4927_v51, 1  ;;  %v4952_v40 = vadd.f32 %v1351_v1, %v1270_v0  ;;  %v1642_v42 = vunpack.c.l.bf16 %v3124_v9  ;;  %v3156_v14 = vld [vmem:[%s3438_s19 + $0x74] sm:$0x1]  ;;  %v5946_v1 = vld [vmem:[#allocation38_spill] sm:$0xff] }
 0x125   : > { %5942 = vst [vmem:[#allocation67_spill] sm:$0xff] %v4940_v39  ;;  %1488 = vperm.xlu1 %3363, %v3586_v29   ;;  %v2543_v52 = vrot.slane %v2481_v50, 2  ;;  %v5816_v31 = vrot.slane %v4947_v33, 2  ;;  %v1619_v37 = vmul.f32 %v4068_v21, %v3429_v2  ;;  %v1261_v28 = vmul.f32 %v4615_v41, %v4685_v47  ;;  %v3125_v47 = vld [vmem:[%s3438_s19 + $0x74] sm:$0x1] }
 0x126   : > { %5943 = vst [vmem:[#allocation68_spill] sm:$0xff] %v4947_v33  ;;  %v1652_v62 = vmul.f32 %v1642_v42, %v3431_v3  ;;  %v2306_v43 = vadd.f32 %v2290_v27, %v2241_v48  ;;  %v2409_v29 = vsel %vm289_vm0, %v2407_v38, %v5815_v44  ;;  %v1788_v0 = vmul.f32 %v1642_v42, %v3433_v4  ;;  %v5948_v39 = vld [vmem:[#allocation40_spill] sm:$0xff] }
 0x127   : > { %5944 = vst [vmem:[#allocation69_spill] sm:$0xff] %v4952_v40  ;;  %v5947_v27 = vrot.slane %v5946_v1, 1  ;;  %v2545_v48 = vsel %vm427_vm1, %v2543_v52, %v5816_v31  ;;  %v1979_v44 = vunpack.c.l.bf16 %v3156_v14  ;;  %v5950_v52 = vld [vmem:[#allocation41_spill] sm:$0xff]  ;;  %v1643_v14 = vunpack.c.l.bf16 %v3125_v47 }
 0x128   : > { %v1701_v10 = vrot.slane %v1652_v62, 1  ;;  %v1327_v55 = vpop.permute.xlu2 %1326  ;;  %v1837_v38 = vrot.slane %v1788_v0, 2  ;;  %v2442_v9 = vadd.f32 %v2409_v29, %v2306_v43  ;;  %v3378_v29 = vld [vmem:[%s3438_s19 + $0x78] sm:$0xff]   ;;  %v1940_v31 = vmul.f32 %v5950_v52, %v3440_v5 }
 0x129   : > { %1504 = vperm.xlu2 %3362, %v5945_v45   ;;  %v1354_v23 = vmul.f32 %v4789_v36, %v1327_v55  ;;  %v3277_v0 = vunpack.c.l.bf16 %v3378_v29  ;;  %v1791_v16 = vmul.f32 %v1643_v14, %v3433_v4 }
 0x12a   : > { %2709 = vperm.xlu0 %3366, %v4938_v63   ;;  %v1702_v50 = vsel %vm289_vm0, %v5947_v27, %v1701_v10  ;;  %v5949_v10 = vrot.slane %v5948_v39, 2  ;;  %v4995_v52 = vadd.f32 %v2545_v48, %v2442_v9  ;;  %v5956_v48 = vld [vmem:[#allocation43_spill] sm:$0xff] }
 0x12b   : > { %v1755_v62 = vadd.f32 %v1702_v50, %v1619_v37  ;;  %v3134_v37 = vld [vmem:[%s3438_s19 + $0x78] sm:$0xe]  ;;  %v1656_v39 = vmul.f32 %v3277_v0, %v3431_v3 }
 0x12c   : > { %v1279_v21 = vpop.permute.xlu1 %1278  ;;  %v1838_v43 = vsel %vm427_vm1, %v5949_v10, %v1837_v38  ;;  %v5953_v38 = vld [vmem:[#allocation6_spill] sm:$0xff]  ;;  %v1780_v29 = vunpack.c.l.bf16 %v3134_v37  ;;  %v5957_v37 = vrot.slane %v5956_v48, 2 }
 0x12d   : > { %v1243_v42 = vpop.permute.xlu0 %1242  ;;  %1500 = vperm.xlu1 %3363, %v3941_v30   ;;  %v1342_v1 = vmul.f32 %v4789_v36, %v1279_v21  ;;  %v1891_v27 = vadd.f32 %v1838_v43, %v1755_v62  ;;  %v1989_v30 = vmul.f32 %v1979_v44, %v3442_v6  ;;  %v2125_v21 = vmul.f32 %v1979_v44, %v3444_v7  ;;  %v3188_v43 = vld [vmem:[%s3438_s19 + $0x80] sm:$0x1] }
 0x12e   : > { %v1273_v55 = vmul.f32 %v4615_v41, %v1243_v42  ;;  %v1792_v40 = vmul.f32 %v1780_v29, %v3433_v4  ;;  %v5961_v29 = vld [vmem:[#allocation46_spill] sm:$0xff] }
 0x12f   : > { %v4986_v50 = vadd.f32 %v1342_v1, %v1261_v28  ;;  %v1956_v10 = vadd.f32 %v1940_v31, %v1891_v27  ;;  %v2038_v62 = vrot.slane %v1989_v30, 1  ;;  %v2174_v47 = vrot.slane %v2125_v21, 2  ;;  %v3144_v31 = vld [vmem:[%s3438_s19 + $0x84] sm:$0xf] }
 0x130   : > { %v4988_v42 = vadd.f32 %v1354_v23, %v1273_v55  ;;  %v2316_v28 = vunpack.c.l.bf16 %v3188_v43  ;;  %v1708_v1 = vrot.slane %v1656_v39, 1  ;;  %v1339_v23 = vpop.permute.xlu2 %1338  ;;  %v5954_v55 = vld [vmem:[#allocation42_spill] sm:$0xff]  ;;  %v1655_v27 = vmul.f32 %v1643_v14, %v3431_v3  ;;  %v5958_v43 = vld [vmem:[#allocation7_spill] sm:$0xff] }
 0x131   : > { %5951 = vst [vmem:[#allocation4_spill] sm:$0xff] %v4986_v50  ;;  %1516 = vperm.xlu2 %3362, %v5953_v38   ;;  %v5955_v50 = vrot.slane %v5954_v55, 1  ;;  %v1357_v30 = vmul.f32 %v4789_v36, %v1339_v23  ;;  %v2175_v21 = vsel %vm427_vm1, %v5957_v37, %v2174_v47  ;;  %v5962_v55 = vrot.slane %v5961_v29, 1  ;;  %v3166_v37 = vld [vmem:[%s3438_s19 + $0x84] sm:$0xe] }
 0x132   : > { %5952 = vst [vmem:[#allocation38_spill] sm:$0xff] %v4988_v42  ;;  %2721 = vperm.xlu0 %3366, %v4932_v19   ;;  %v1622_v42 = vmul.f32 %v3277_v0, %v3429_v2  ;;  %v2326_v39 = vmul.f32 %v2316_v28, %v3451_v12  ;;  %v5960_v0 = vld [vmem:[#allocation14_spill] sm:$0xff]  ;;  %v1844_v51 = vrot.slane %v1792_v40, 2  ;;  %v1927_v23 = vunpack.c.l.bf16 %v3144_v31  ;;  %v5965_v40 = vld [vmem:[#allocation48_spill] sm:$0xff] }
 0x133   : > { %v2039_v44 = vsel %vm289_vm0, %v5955_v50, %v2038_v62  ;;  %v2277_v62 = vmul.f32 %v5960_v0, %v3449_v11  ;;  %v1710_v33 = vsel %vm289_vm0, %v1708_v1, %v5962_v55  ;;  %v2462_v47 = vmul.f32 %v4795_v17, %v2316_v28  ;;  %v5967_v28 = vld [vmem:[#allocation10_spill] sm:$0xff]  ;;  %v5969_v55 = vld [vmem:[#allocation9_spill] sm:$0xff] }
 0x134   : > { %v2092_v9 = vadd.f32 %v2039_v44, %v1956_v10  ;;  %v5010_v50 = vpop.permute.xlu1 %1290  ;;  %v2375_v48 = vrot.slane %v2326_v39, 1  ;;  %v1758_v32 = vadd.f32 %v1710_v33, %v1622_v42  ;;  %v1943_v29 = vmul.f32 %v1927_v23, %v3440_v5  ;;  %v5970_v42 = vld [vmem:[#allocation39_spill] sm:$0xff] }
 0x135   : > { %1512 = vperm.xlu1 %3363, %v5958_v43   ;;  %5959 = vst [vmem:[#allocation40_spill] sm:$0xff] %v5010_v50  ;;  %v5964_v50 = vrot.slane %v5963_v22, 2  ;;  %v5966_v31 = vrot.slane %v5965_v40, 1  ;;  %v1621_v39 = vmul.f32 %v5967_v28, %v3429_v2  ;;  %v1993_v22 = vmul.f32 %v1927_v23, %v3442_v6 }
 0x136   : > { %v1258_v10 = vpop.permute.xlu0 %1257  ;;  %v2228_v44 = vadd.f32 %v2175_v21, %v2092_v9  ;;  %v2511_v21 = vrot.slane %v2462_v47, 2  ;;  %v1706_v47 = vrot.slane %v1655_v27, 1 }
 0x137   : > { %v1276_v43 = vmul.f32 %v4615_v41, %v1258_v10  ;;  %v1846_v49 = vsel %vm427_vm1, %v1844_v51, %v5964_v50  ;;  %v2376_v9 = vsel %vm289_vm0, %v5966_v31, %v2375_v48  ;;  %v2117_v51 = vunpack.c.l.bf16 %v3166_v37  ;;  %v5971_v10 = vld [vmem:[#allocation49_spill] sm:$0xff]  ;;  %v5973_v37 = vld [vmem:[#allocation54_spill] sm:$0xff] }
 0x138   : > { %v2293_v1 = vadd.f32 %v2277_v62, %v2228_v44  ;;  %v1894_v33 = vadd.f32 %v1846_v49, %v1758_v32  ;;  %v1266_v50 = vmul.f32 %v4615_v41, %v5970_v42  ;;  %v5972_v44 = vrot.slane %v5971_v10, 2  ;;  %v3198_v49 = vld [vmem:[%s3438_s19 + $0x90] sm:$0xe]  ;;  %v5974_v42 = vld [vmem:[#allocation11_spill] sm:$0xff] }
 0x139   : > { %v5030_v14 = vadd.f32 %v1357_v30, %v1276_v43  ;;  %1528 = vperm.xlu2 %3362, %v5969_v55   ;;  %v2045_v43 = vrot.slane %v1993_v22, 1  ;;  %v2129_v40 = vmul.f32 %v2117_v51, %v3444_v7  ;;  %v1842_v32 = vrot.slane %v1791_v16, 2 }
 0x13a   : > { %2733 = vperm.xlu0 %3366, %v4995_v52   ;;  %v2429_v62 = vadd.f32 %v2376_v9, %v2293_v1  ;;  %v2512_v48 = vsel %vm427_vm1, %v5972_v44, %v2511_v21  ;;  %v1959_v30 = vadd.f32 %v1943_v29, %v1894_v33  ;;  %v2330_v31 = vmul.f32 %v5973_v37, %v3451_v12  ;;  %v3157_v9 = vld [vmem:[%s3438_s19 + $0x80] sm:$0x1] }
 0x13b   : > { %5968 = vst [vmem:[#allocation41_spill] sm:$0xff] %v5030_v14  ;;  %v2454_v28 = vunpack.c.l.bf16 %v3198_v49  ;;  %v5975_v14 = vrot.slane %v5974_v42, 1  ;;  %v5976_v29 = vld [vmem:[#allocation50_spill] sm:$0xff]  ;;  %v2181_v33 = vrot.slane %v2129_v40, 2  ;;  %v2280_v22 = vmul.f32 %v5973_v37, %v3449_v11  ;;  %v5980_v49 = vld [vmem:[#allocation12_spill] sm:$0xff] }
 0x13c   : > { %v5042_v23 = vadd.f32 %v2512_v48, %v2429_v62  ;;  %v1299_v27 = vpop.permute.xlu1 %1298  ;;  %v5977_v21 = vrot.slane %v5976_v29, 1  ;;  %v2382_v44 = vrot.slane %v2330_v31, 1  ;;  %v5978_v48 = vld [vmem:[#allocation52_spill] sm:$0xff]  ;;  %v5981_v42 = vrot.slane %v5980_v49, 2 }
 0x13d   : > { %v1707_v1 = vsel %vm289_vm0, %v5975_v14, %v1706_v47  ;;  %1524 = vperm.xlu1 %3363, %v4214_v57   ;;  %v1347_v62 = vmul.f32 %v4789_v36, %v1299_v27  ;;  %v2466_v14 = vmul.f32 %v4795_v17, %v2454_v28  ;;  %v5979_v47 = vrot.slane %v5978_v48, 2 }
 0x13e   : > { %v2047_v16 = vsel %vm289_vm0, %v2045_v43, %v5977_v21  ;;  %v1757_v51 = vadd.f32 %v1707_v1, %v1621_v39  ;;  %v1843_v29 = vsel %vm427_vm1, %v5981_v42, %v1842_v32  ;;  %v1942_v43 = vmul.f32 %v5960_v0, %v3440_v5  ;;  %v3189_v21 = vld [vmem:[%s3438_s19 + $0x8c] sm:$0x1]  ;;  %v3114_v39 = vld [vmem:[%s3438_s19 + $0x84] sm:$0xf]  ;;  %v5982_v1 = vld [vmem:[#allocation45_spill] sm:$0xff] }
 0x13f   : > { %v2095_v10 = vadd.f32 %v2047_v16, %v1959_v30  ;;  %v2183_v57 = vsel %vm427_vm1, %v2181_v33, %v5979_v47  ;;  %v1980_v40 = vunpack.c.l.bf16 %v3157_v9  ;;  %v1269_v30 = vmul.f32 %v4615_v41, %v5982_v1 }
 0x140   : > { %v5070_v31 = vadd.f32 %v1347_v62, %v1266_v50  ;;  %v5984_v27 = vrot.slane %v4692_v20, 1  ;;  %v5985_v33 = vmov 0   ;;  %v2518_v32 = vrot.slane %v2466_v14, 2 }
 0x141   : > { %v2231_v28 = vadd.f32 %v2183_v57, %v2095_v10  ;;  %3365 = vset.pattern.permute.xlu2 %v5985_v33  ;;  %v1893_v48 = vadd.f32 %v1843_v29, %v1757_v51  ;;  %v1992_v0 = vmul.f32 %v1980_v40, %v3442_v6  ;;  %v2128_v9 = vmul.f32 %v1980_v40, %v3444_v7  ;;  %v5988_v29 = vld [vmem:[#allocation17_spill] sm:$0xff] }
 0x142   : > { %5983 = vst [vmem:[#allocation6_spill] sm:$0xff] %v5070_v31  ;;  %v2384_v16 = vsel %vm289_vm0, %v2382_v44, %v5984_v27  ;;  %v5986_v47 = vmov 2   ;;  %v5080_v49 = vperm.slane %v4600_v58, 2  ;;  %v5082_v50 = vpop.permute.xlu2 %1383  ;;  %2587 = vperm.xlu2 %3365, %v5042_v23   ;;  %v2317_v62 = vunpack.c.l.bf16 %v3189_v21  ;;  %v3135_v44 = vld [vmem:[%s3438_s19 + $0x84] sm:$0xe]  ;;  %v5094_v21 = vpop.permute.xlu0 %2592 }
 0x143   : > { %3369 = vset.pattern.permute.xlu0 %v5986_v47  ;;  %v2296_v20 = vadd.f32 %v2280_v22, %v2231_v28  ;;  %v1608_v10 = vunpack.c.l.bf16 %v3114_v39  ;;  %v5987_v51 = vrot.slane %v4708_v34, 2  ;;  %v1958_v57 = vadd.f32 %v1942_v43, %v1893_v48  ;;  %5989 = vst [vmem:[#allocation42_spill] sm:$0xff] %v5094_v21  ;;  %v5990_v34 = vld [vmem:[#allocation15_spill] sm:$0xff] }
 0x144   : > { %1375 = vperm.xlu0 %3369, %v3715_v53   ;;  %v2043_v42 = vrot.slane %v1992_v0, 1  ;;  %v2279_v40 = vmul.f32 %v5988_v29, %v3449_v11  ;;  %v2179_v27 = vrot.slane %v2128_v9, 2  ;;  %v2329_v31 = vmul.f32 %v2317_v62, %v3451_v12  ;;  %v1311_v53 = vpop.permute.xlu1 %1310 }
 0x145   : > { %v2520_v14 = vsel %vm427_vm1, %v2518_v32, %v5987_v51  ;;  %v2432_v1 = vadd.f32 %v2384_v16, %v2296_v20  ;;  %v2465_v22 = vmul.f32 %v4795_v17, %v2317_v62  ;;  %3364 = vset.pattern.permute.xlu1 %v5985_v33  ;;  %v5991_v39 = vrot.slane %v5990_v34, 1  ;;  %v5992_v33 = vld [vmem:[#allocation16_spill] sm:$0xff] }
 0x146   : > { %v1624_v28 = vmul.f32 %v1608_v10, %v3429_v2  ;;  %v1659_v32 = vmul.f32 %v1608_v10, %v3431_v3  ;;  %v1781_v16 = vunpack.c.l.bf16 %v3135_v44  ;;  %v1350_v48 = vmul.f32 %v4789_v36, %v1311_v53  ;;  %2582 = vperm.xlu1 %3364, %v4775_v25   ;;  %v3167_v10 = vld [vmem:[%s3438_s19 + $0x90] sm:$0xe]  ;;  %v3152_v25 = vld [vmem:[%s3438_s19 + $0xb4] sm:$0xf] }
 0x147   : > { %v2044_v43 = vsel %vm289_vm0, %v5991_v39, %v2043_v42  ;;  %v5104_v0 = vadd.f32 %v2520_v14, %v2432_v1  ;;  %v5993_v20 = vrot.slane %v5992_v33, 2  ;;  %v2380_v51 = vrot.slane %v2329_v31, 1  ;;  %v3199_v1 = vld [vmem:[%s3438_s19 + $0x9c] sm:$0xe] }
 0x148   : > { %v2094_v9 = vadd.f32 %v2044_v43, %v1958_v57  ;;  %v2516_v42 = vrot.slane %v2465_v22, 2  ;;  %v1713_v29 = vrot.slane %v1659_v32, 1  ;;  %v1795_v34 = vmul.f32 %v1781_v16, %v3433_v4  ;;  %v3178_v57 = vld [vmem:[%s3438_s19 + $0x9c] sm:$0xf]  ;;  %v5995_v43 = vld [vmem:[#allocation18_spill] sm:$0xff] }
 0x149   : > { %v2180_v62 = vsel %vm427_vm1, %v5993_v20, %v2179_v27  ;;  %v5111_v39 = vadd.f32 %v1350_v48, %v1269_v30  ;;  %v1945_v53 = vmul.f32 %v5973_v37, %v3440_v5  ;;  %v1996_v14 = vmul.f32 %v5973_v37, %v3442_v6  ;;  %v5997_v27 = vld [vmem:[#allocation19_spill] sm:$0xff]  ;;  %v5999_v16 = vld [vmem:[#allocation21_spill] sm:$0xff] }
 0x14a   : > { %v2230_v44 = vadd.f32 %v2180_v62, %v2094_v9  ;;  %v5996_v33 = vrot.slane %v5995_v43, 1  ;;  %v5998_v22 = vrot.slane %v5997_v27, 2  ;;  %v6000_v30 = vrot.slane %v5999_v16, 1  ;;  %v1392_v20 = vpop.permute.xlu2 %1391  ;;  %2602 = vperm.xlu2 %3365, %v5104_v0   ;;  %v6001_v43 = vld [vmem:[#allocation22_spill] sm:$0xff] }
 0x14b   : > { %5994 = vst [vmem:[#allocation43_spill] sm:$0xff] %v5111_v39  ;;  %v1849_v9 = vrot.slane %v1795_v34, 2  ;;  %v2050_v21 = vrot.slane %v1996_v14, 1  ;;  %v2118_v39 = vunpack.c.l.bf16 %v3167_v10  ;;  %v2266_v27 = vunpack.c.l.bf16 %v3178_v57  ;;  %v6004_v14 = vld [vmem:[#allocation24_spill] sm:$0xff] }
 0x14c   : > { %v2381_v31 = vsel %vm289_vm0, %v5996_v33, %v2380_v51  ;;  %v2517_v32 = vsel %vm427_vm1, %v5998_v22, %v2516_v42  ;;  %v1715_v48 = vsel %vm289_vm0, %v1713_v29, %v6000_v30  ;;  %v2295_v37 = vadd.f32 %v2279_v40, %v2230_v44  ;;  %1395 = vperm.xlu0 %3369, %v5938_v54   ;;  %v3128_v40 = vld [vmem:[%s3438_s19 + $0x98] sm:$0x1]  ;;  %v1323_v44 = vpop.permute.xlu1 %1322 }
 0x14d   : > { %v1760_v62 = vadd.f32 %v1715_v48, %v1624_v28  ;;  %v1443_v51 = vmul.f32 %v5080_v49, %v1392_v20  ;;  %v6002_v33 = vrot.slane %v6001_v43, 2  ;;  %v2455_v22 = vunpack.c.l.bf16 %v3199_v1  ;;  %v6003_v28 = vld [vmem:[#allocation51_spill] sm:$0xff]  ;;  %v5148_v20 = vpop.permute.xlu0 %2617 }
 0x14e   : > { %v2431_v29 = vadd.f32 %v2381_v31, %v2295_v37  ;;  %v2132_v34 = vmul.f32 %v2118_v39, %v3444_v7  ;;  %v1272_v10 = vmul.f32 %v4615_v41, %v6003_v28  ;;  %v6005_v30 = vrot.slane %v6004_v14, 1  ;;  %6006 = vst [vmem:[#allocation7_spill] sm:$0xff] %v5148_v20  ;;  %v6011_v14 = vld [vmem:[#allocation23_spill] sm:$0xff] }
 0x14f   : > { %v1851_v42 = vsel %vm427_vm1, %v1849_v9, %v6002_v33  ;;  %v5139_v54 = vadd.f32 %v1443_v51, %v4856_v35  ;;  %v2333_v57 = vmul.f32 %v2266_v27, %v3451_v12  ;;  %v1353_v1 = vmul.f32 %v4789_v36, %v1323_v44  ;;  %v3160_v35 = vld [vmem:[%s3438_s19 + $0xa4] sm:$0x1]  ;;  %v3192_v51 = vld [vmem:[%s3438_s19 + $0xb0] sm:$0x1] }
 0x150   : > { %v1896_v16 = vadd.f32 %v1851_v42, %v1760_v62  ;;  %v2052_v48 = vsel %vm289_vm0, %v2050_v21, %v6005_v30  ;;  %v5146_v31 = vadd.f32 %v2517_v32, %v2431_v29  ;;  %v2186_v9 = vrot.slane %v2132_v34, 2  ;;  %v6008_v42 = vld [vmem:[#allocation25_spill] sm:$0xff]  ;;  %v6010_v29 = vld [vmem:[#allocation56_spill] sm:$0xff] }
 0x151   : > { %v2387_v37 = vrot.slane %v2333_v57, 1  ;;  %v2469_v62 = vmul.f32 %v4795_v17, %v2455_v22  ;;  %v1646_v43 = vunpack.c.l.bf16 %v3128_v40  ;;  %v5153_v33 = vadd.f32 %v1353_v1, %v1272_v10 }
 0x152   : > { %v1961_v39 = vadd.f32 %v1945_v53, %v1896_v16  ;;  %2597 = vperm.xlu1 %3364, %v5146_v31   ;;  %v6009_v28 = vrot.slane %v6008_v42, 2  ;;  %v2282_v53 = vmul.f32 %v2266_v27, %v3449_v11  ;;  %v1275_v16 = vmul.f32 %v4615_v41, %v6010_v29  ;;  %v5164_v44 = vpop.permute.xlu2 %1403  ;;  %v6012_v27 = vld [vmem:[#allocation27_spill] sm:$0xff]  ;;  %v6014_v42 = vld [vmem:[#allocation58_spill] sm:$0xff] }
 0x153   : > { %6007 = vst [vmem:[#allocation14_spill] sm:$0xff] %v5153_v33  ;;  %v2523_v34 = vrot.slane %v2469_v62, 2  ;;  %v1664_v22 = vmul.f32 %v1646_v43, %v3431_v3  ;;  %v1800_v40 = vmul.f32 %v1646_v43, %v3433_v4  ;;  %v1627_v30 = vmul.f32 %v6011_v14, %v3429_v2  ;;  %v6017_v14 = vld [vmem:[#allocation55_spill] sm:$0xff] }
 0x154   : > { %v2097_v21 = vadd.f32 %v2052_v48, %v1961_v39  ;;  %v2188_v32 = vsel %vm427_vm1, %v2186_v9, %v6009_v28  ;;  %v1983_v48 = vunpack.c.l.bf16 %v3160_v35  ;;  %v2320_v57 = vunpack.c.l.bf16 %v3192_v51  ;;  %1407 = vperm.xlu0 %3369, %v5945_v45   ;;  %v1335_v51 = vpop.permute.xlu1 %1334  ;;  %v3138_v33 = vld [vmem:[%s3438_s19 + $0xa8] sm:$0xe] }
 0x155   : > { %v6013_v1 = vrot.slane %v6012_v27, 1  ;;  %v1721_v9 = vrot.slane %v1664_v22, 1  ;;  %v1857_v62 = vrot.slane %v1800_v40, 2  ;;  %v1948_v43 = vmul.f32 %v6014_v42, %v3440_v5  ;;  %v6019_v22 = vld [vmem:[#allocation57_spill] sm:$0xff] }
 0x156   : > { %v2233_v10 = vadd.f32 %v2188_v32, %v2097_v21  ;;  %v6015_v21 = vld [vmem:[#allocation28_spill] sm:$0xff]  ;;  %v2001_v35 = vmul.f32 %v1983_v48, %v3442_v6  ;;  %v2137_v45 = vmul.f32 %v1983_v48, %v3444_v7  ;;  %v6018_v27 = vrot.slane %v6017_v14, 1 }
 0x157   : > { %v2389_v39 = vsel %vm289_vm0, %v2387_v37, %v6013_v1  ;;  %v6016_v32 = vrot.slane %v6015_v21, 2  ;;  %v6020_v40 = vrot.slane %v6019_v22, 2 }
 0x158   : > { %v2298_v28 = vadd.f32 %v2282_v53, %v2233_v10  ;;  %v1722_v37 = vsel %vm289_vm0, %v6018_v27, %v1721_v9  ;;  %v2338_v53 = vmul.f32 %v2320_v57, %v3451_v12  ;;  %v3379_v10 = vld [vmem:[%s3438_s19 + $0xa8] sm:$0xff]   ;;  %v2058_v20 = vrot.slane %v2001_v35, 1 }
 0x159   : > { %v2525_v29 = vsel %vm427_vm1, %v2523_v34, %v6016_v32  ;;  %v1858_v1 = vsel %vm427_vm1, %v6020_v40, %v1857_v62  ;;  %v3285_v42 = vunpack.c.l.bf16 %v3379_v10  ;;  %v1356_v34 = vmul.f32 %v4789_v36, %v1335_v51  ;;  %v3170_v62 = vld [vmem:[%s3438_s19 + $0xb4] sm:$0xe]  ;;  %v5196_v22 = vpop.permute.xlu0 %2632 }
 0x15a   : > { %v2434_v21 = vadd.f32 %v2389_v39, %v2298_v28  ;;  %v1763_v32 = vadd.f32 %v1722_v37, %v1627_v30  ;;  %v2194_v48 = vrot.slane %v2137_v45, 2  ;;  %2607 = vperm.xlu1 %3364, %v4825_v60   ;;  %v6021_v40 = vrot.slane %v4746_v8, 1 }
 0x15b   : > { %v5190_v14 = vadd.f32 %v1356_v34, %v1275_v16  ;;  %v2395_v30 = vrot.slane %v2338_v53, 1  ;;  %v2474_v28 = vmul.f32 %v4795_v17, %v2320_v57  ;;  %v5203_v16 = vpop.permute.xlu2 %1415  ;;  %v1668_v35 = vmul.f32 %v3285_v42, %v3431_v3  ;;  %v3202_v53 = vld [vmem:[%s3438_s19 + $0xc0] sm:$0xe] }
 0x15c   : > { %v5192_v9 = vadd.f32 %v2525_v29, %v2434_v21  ;;  %v1899_v27 = vadd.f32 %v1858_v1, %v1763_v32  ;;  %v2059_v39 = vsel %vm289_vm0, %v6021_v40, %v2058_v20  ;;  %v1784_v45 = vunpack.c.l.bf16 %v3138_v33  ;;  %1419 = vperm.xlu0 %3369, %v5953_v38  }
 0x15d   : > { %v1935_v51 = vunpack.c.l.bf16 %v3152_v25  ;;  %v6022_v37 = vrot.slane %v4750_v61, 2  ;;  %v1630_v20 = vmul.f32 %v3285_v42, %v3429_v2  ;;  %v2121_v1 = vunpack.c.l.bf16 %v3170_v62 }
 0x15e   : > { %2612 = vperm.xlu2 %3365, %v5192_v9   ;;  %v1964_v29 = vadd.f32 %v1948_v43, %v1899_v27  ;;  %v2285_v10 = vmul.f32 %v4419_v24, %v3449_v11  ;;  %v1728_v43 = vrot.slane %v1668_v35, 1  ;;  %v1804_v34 = vmul.f32 %v1784_v45, %v3433_v4  ;;  %v1380_v32 = vpop.permute.xlu1 %1379  ;;  %v6026_v45 = vld [vmem:[#allocation31_spill] sm:$0xff] }
 0x15f   : > { %v2195_v8 = vsel %vm427_vm1, %v6022_v37, %v2194_v48  ;;  %v6023_v25 = vrot.slane %v4764_v15, 1  ;;  %v2531_v33 = vrot.slane %v2474_v28, 2  ;;  %v2005_v61 = vmul.f32 %v1935_v51, %v3442_v6  ;;  %v6024_v48 = vld [vmem:[#allocation30_spill] sm:$0xff]  ;;  %v3131_v28 = vld [vmem:[%s3438_s19 + $0xbc] sm:$0x1] }
 0x160   : > { %v2100_v57 = vadd.f32 %v2059_v39, %v1964_v29  ;;  %v2141_v21 = vmul.f32 %v2121_v1, %v3444_v7  ;;  %v6025_v27 = vrot.slane %v6024_v48, 1  ;;  %v1864_v62 = vrot.slane %v1804_v34, 2 }
 0x161   : > { %v2396_v38 = vsel %vm289_vm0, %v6023_v25, %v2395_v30  ;;  %v2458_v40 = vunpack.c.l.bf16 %v3202_v53  ;;  %v1440_v39 = vmul.f32 %v5080_v49, %v1380_v32  ;;  %v1951_v15 = vmul.f32 %v1935_v51, %v3440_v5  ;;  %v3163_v53 = vld [vmem:[%s3438_s19 + $0xc8] sm:$0x1] }
 0x162   : > { %v2236_v42 = vadd.f32 %v2195_v8, %v2100_v57  ;;  %v1730_v24 = vsel %vm289_vm0, %v1728_v43, %v6025_v27  ;;  %v2065_v30 = vrot.slane %v2005_v61, 1  ;;  %2622 = vperm.xlu1 %3364, %v4938_v63   ;;  %v6027_v37 = vrot.slane %v6026_v45, 2  ;;  %v6029_v61 = vld [vmem:[#allocation32_spill] sm:$0xff] }
 0x163   : > { %v1766_v29 = vadd.f32 %v1730_v24, %v1630_v20  ;;  %v2201_v1 = vrot.slane %v2141_v21, 2  ;;  %v2342_v57 = vmul.f32 %v4859_v56, %v3451_v12  ;;  %v6028_v43 = vrot.slane %v4802_v26, 2  ;;  %v5239_v25 = vpop.permute.xlu2 %1427  ;;  %v5246_v27 = vpop.permute.xlu0 %2647  ;;  %v3195_v24 = vld [vmem:[%s3438_s19 + $0xd4] sm:$0x1] }
 0x164   : > { %v2301_v35 = vadd.f32 %v2285_v10, %v2236_v42  ;;  %v1866_v8 = vsel %vm427_vm1, %v1864_v62, %v6027_v37  ;;  %v5237_v51 = vadd.f32 %v1440_v39, %v4815_v59  ;;  %v6030_v42 = vrot.slane %v6029_v61, 1  ;;  %1431 = vperm.xlu0 %3369, %v5969_v55   ;;  %v6031_v62 = vld [vmem:[#allocation33_spill] sm:$0xff]  ;;  %v6037_v61 = vld [vmem:[#allocation34_spill] sm:$0xff] }
 0x165   : > { %v2532_v20 = vsel %vm427_vm1, %v6028_v43, %v2531_v33  ;;  %v1902_v10 = vadd.f32 %v1866_v8, %v1766_v29  ;;  %v2478_v32 = vmul.f32 %v4795_v17, %v2458_v40  ;;  %v1649_v48 = vunpack.c.l.bf16 %v3131_v28  ;;  %v6033_v43 = vld [vmem:[#allocation36_spill] sm:$0xff] }
 0x166   : > { %v2437_v34 = vadd.f32 %v2396_v38, %v2301_v35  ;;  %v2067_v21 = vsel %vm289_vm0, %v2065_v30, %v6030_v42  ;;  %v2288_v59 = vmul.f32 %v4859_v56, %v3449_v11  ;;  %v1986_v33 = vunpack.c.l.bf16 %v3163_v53  ;;  %v1388_v45 = vpop.permute.xlu1 %1387 }
 0x167   : > { %v1967_v26 = vadd.f32 %v1951_v15, %v1902_v10  ;;  %v6032_v39 = vrot.slane %v6031_v62, 2  ;;  %v2402_v30 = vrot.slane %v2342_v57, 1  ;;  %v1673_v40 = vmul.f32 %v1649_v48, %v3431_v3  ;;  %v6040_v62 = vld [vmem:[#allocation53_spill] sm:$0xff] }
 0x168   : > { %v5251_v38 = vadd.f32 %v2532_v20, %v2437_v34  ;;  %v1633_v55 = vmul.f32 %v4853_v46, %v3429_v2  ;;  %v1809_v15 = vmul.f32 %v1649_v48, %v3433_v4  ;;  %v2010_v35 = vmul.f32 %v1986_v33, %v3442_v6 }
 0x169   : > { %v2203_v29 = vsel %vm427_vm1, %v2201_v1, %v6032_v39  ;;  %v2103_v28 = vadd.f32 %v2067_v21, %v1967_v26  ;;  %v2538_v56 = vrot.slane %v2478_v32, 2  ;;  %v1736_v37 = vrot.slane %v1673_v40, 1  ;;  %v6038_v21 = vld [vmem:[#allocation37_spill] sm:$0xff] }
 0x16a   : > { %2627 = vperm.xlu2 %3365, %v5251_v38   ;;  %v2146_v8 = vmul.f32 %v1986_v33, %v3444_v7  ;;  %v2323_v53 = vunpack.c.l.bf16 %v3195_v24  ;;  %v1872_v57 = vrot.slane %v1809_v15, 2  ;;  %v6034_v3 = vrot.slane %v6033_v43, 1  ;;  %2637 = vperm.xlu1 %3364, %v4932_v19  }
 0x16b   : > { %v2239_v1 = vadd.f32 %v2203_v29, %v2103_v28  ;;  %v6035_v2 = vrot.slane %v4872_v18, 1  ;;  %v2073_v6 = vrot.slane %v2010_v35, 1  ;;  %v6036_v34 = vrot.slane %v4881_v13, 2  ;;  %v6041_v29 = vld [vmem:[#allocation62_spill] sm:$0xff]  ;;  %v6043_v35 = vld [vmem:[#allocation40_spill] sm:$0xff] }
 0x16c   : > { %v2404_v20 = vsel %vm289_vm0, %v2402_v30, %v6034_v3  ;;  %v1954_v42 = vmul.f32 %v6037_v61, %v3440_v5  ;;  %v6039_v32 = vrot.slane %v6038_v21, 2  ;;  %v2209_v26 = vrot.slane %v2146_v8, 2  ;;  %2777 = vperm.xlu0 %3369, %v5042_v23   ;;  %v1287_v39 = vpop.permute.xlu0 %1286 }
 0x16d   : > { %v1737_v4 = vsel %vm289_vm0, %v6035_v2, %v1736_v37  ;;  %v2304_v46 = vadd.f32 %v2288_v59, %v2239_v1  ;;  %v1873_v7 = vsel %vm427_vm1, %v6036_v34, %v1872_v57  ;;  %v2347_v33 = vmul.f32 %v2323_v53, %v3451_v12  ;;  %v5280_v59 = vpop.permute.xlu2 %1472  ;;  %v6044_v37 = vld [vmem:[#allocation64_spill] sm:$0xff]  ;;  %v6047_v2 = vld [vmem:[#allocation59_spill] sm:$0xff] }
 0x16e   : > { %v1769_v10 = vadd.f32 %v1737_v4, %v1633_v55  ;;  %v2540_v48 = vsel %vm427_vm1, %v2538_v56, %v6039_v32  ;;  %v1263_v13 = vmul.f32 %v4615_v41, %v6040_v62  ;;  %v6042_v30 = vrot.slane %v6041_v29, 1  ;;  %v1400_v43 = vpop.permute.xlu1 %1399  ;;  %v6052_v62 = vld [vmem:[#allocation68_spill] sm:$0xff] }
 0x16f   : > { %v2440_v18 = vadd.f32 %v2404_v20, %v2304_v46  ;;  %v2483_v40 = vmul.f32 %v4795_v17, %v2323_v53  ;;  %v1441_v28 = vmul.f32 %v5080_v49, %v5082_v50  ;;  %v1344_v12 = vmul.f32 %v4789_v36, %v1287_v39  ;;  %v6046_v50 = vld [vmem:[#allocation65_spill] sm:$0xff] }
 0x170   : > { %v1905_v24 = vadd.f32 %v1873_v7, %v1769_v10  ;;  %v2074_v5 = vsel %vm289_vm0, %v6042_v30, %v2073_v6  ;;  %v1345_v56 = vmul.f32 %v4789_v36, %v6043_v35  ;;  %v6045_v8 = vrot.slane %v6044_v37, 2  ;;  %v6048_v7 = vld [vmem:[#allocation66_spill] sm:$0xff] }
 0x171   : > { %v5291_v55 = vadd.f32 %v2540_v48, %v2440_v18  ;;  %v2410_v57 = vrot.slane %v2347_v33, 1  ;;  %v1360_v3 = vadd.f32 %v1344_v12, %v1263_v13  ;;  %v2291_v53 = vmul.f32 %v6046_v50, %v3449_v11  ;;  %v6049_v11 = vld [vmem:[#allocation2_spill] sm:$0xff]  ;;  %v6051_v33 = vld [vmem:[#allocation61_spill] sm:$0xff] }
 0x172   : > { %v1970_v15 = vadd.f32 %v1954_v42, %v1905_v24  ;;  %v2210_v1 = vsel %vm427_vm1, %v6045_v8, %v2209_v26  ;;  %v1445_v20 = vmul.f32 %v5080_v49, %v1400_v43  ;;  %v1264_v4 = vmul.f32 %v4615_v41, %v6047_v2  ;;  %2652 = vperm.xlu1 %3364, %v4995_v52  }
 0x173   : > { %2642 = vperm.xlu2 %3365, %v5291_v55   ;;  %v1442_v6 = vmul.f32 %v5080_v49, %v1388_v45  ;;  %v2546_v46 = vrot.slane %v2483_v40, 2  ;;  %v5307_v10 = vperm.slane %v4600_v58, 3  ;;  %v1457_v42 = vadd.f32 %v1441_v28, %v1360_v3  ;;  %v6056_v3 = vld [vmem:[#allocation63_spill] sm:$0xff] }
 0x174   : > { %v2106_v17 = vadd.f32 %v2074_v5, %v1970_v15  ;;  %v5310_v61 = vadd.f32 %v1445_v20, %v6048_v7  ;;  %v1361_v21 = vadd.f32 %v1345_v56, %v1264_v4  ;;  %v6050_v32 = vrot.slane %v6049_v11, 1  ;;  %2797 = vperm.xlu0 %3369, %v5192_v9   ;;  %v1307_v58 = vpop.permute.xlu0 %1306  ;;  %v6058_v7 = vld [vmem:[#allocation26_spill] sm:$0xff] }
 0x175   : > { %v1485_v26 = vpop.permute.xlu2 %1484  ;;  %v1268_v18 = vmul.f32 %v4615_v41, %v6051_v33  ;;  %v6053_v13 = vrot.slane %v6052_v62, 2  ;;  %v1446_v30 = vmul.f32 %v5080_v49, %v5164_v44  ;;  %v1349_v5 = vmul.f32 %v4789_v36, %v1307_v58  ;;  %v6055_v44 = vld [vmem:[#allocation69_spill] sm:$0xff] }
 0x176   : > { %v2242_v34 = vadd.f32 %v2210_v1, %v2106_v17  ;;  %v2411_v48 = vsel %vm289_vm0, %v6050_v32, %v2410_v57  ;;  %v1458_v24 = vadd.f32 %v1442_v6, %v1361_v21  ;;  %v1539_v29 = vmul.f32 %v5307_v10, %v1485_v26  ;;  %v1412_v28 = vpop.permute.xlu1 %1411  ;;  %v6057_v6 = vld [vmem:[#allocation38_spill] sm:$0xff]  ;;  %v6059_v32 = vld [vmem:[#allocation67_spill] sm:$0xff]  ;;  %v6060_v58 = vld [vmem:[#allocation41_spill] sm:$0xff] }
 0x177   : > { %v2547_v39 = vsel %vm427_vm1, %v6053_v13, %v2546_v46  ;;  %v1365_v15 = vadd.f32 %v1349_v5, %v1268_v18  ;;  %v1448_v56 = vmul.f32 %v5080_v49, %v1412_v28  ;;  %v6054_v37 = vmov 1   ;;  %v6063_v28 = vld [vmem:[#allocation3_spill] sm:$0xff] }
 0x178   : > { %v2307_v45 = vadd.f32 %v2291_v53, %v2242_v34  ;;  %v1555_v12 = vadd.f32 %v1539_v29, %v1458_v24  ;;  %v1271_v17 = vmul.f32 %v4615_v41, %v6056_v3  ;;  %v1449_v20 = vmul.f32 %v5080_v49, %v5203_v16 }
 0x179   : > { %v5339_v8 = vadd.f32 %v1448_v56, %v6055_v44  ;;  %v1462_v1 = vadd.f32 %v1446_v30, %v1365_v15  ;;  %v1274_v16 = vmul.f32 %v4615_v41, %v6059_v32  ;;  %v1452_v26 = vmul.f32 %v5080_v49, %v5239_v25  ;;  %v6061_v30 = vld [vmem:[#allocation29_spill] sm:$0xff]  ;;  %v6064_v44 = vld [vmem:[#allocation35_spill] sm:$0xff] }
 0x17a   : > { %v2443_v40 = vadd.f32 %v2411_v48, %v2307_v45  ;;  %3367 = vset.pattern.permute.xlu1 %v6054_v37  ;;  %1572 = vst.msk [vmem:[%s5329_s4 + $0x18] sm:$0xff] %vm1568_vm2, %v1555_v12 }
 0x17b   : > { %2681 = vperm.xlu1 %3367, %v5042_v23  }
 0x17c   : > { %v5331_v35 = vadd.f32 %v2547_v39, %v2443_v40  ;;  %2809 = vperm.xlu0 %3369, %v5251_v38   ;;  %v1319_v43 = vpop.permute.xlu0 %1318  ;;  %v6062_v40 = vmov 3  }
 0x17d   : > { %v5343_v57 = vpop.permute.xlu2 %1492  ;;  %v1352_v50 = vmul.f32 %v4789_v36, %v1319_v43  ;;  %v6065_v43 = vld [vmem:[#allocation5_spill] sm:$0xff] }
 0x17e   : > { %2657 = vperm.xlu2 %3365, %v5331_v35   ;;  %v1424_v53 = vpop.permute.xlu1 %1423 }
 0x17f   : > { %v1368_v2 = vadd.f32 %v1352_v50, %v1271_v17  ;;  %v1451_v4 = vmul.f32 %v5080_v49, %v1424_v53  ;;  %v6066_v53 = vld [vmem:[#allocation44_spill] sm:$0xff] }
 0x181   : > { %v5353_v46 = vadd.f32 %v1451_v4, %v6057_v6  ;;  %v1465_v34 = vadd.f32 %v1449_v20, %v1368_v2  ;;  %v6067_v4 = vld [vmem:[#allocation8_spill] sm:$0xff] }
 0x183   : > { %2689 = vperm.xlu1 %3367, %v5146_v31  }
 0x184   : > { %2821 = vperm.xlu0 %3369, %v5291_v55   ;;  %v1331_v21 = vpop.permute.xlu0 %1330 }
 0x185   : > { %v5358_v11 = vpop.permute.xlu2 %1504  ;;  %v1355_v48 = vmul.f32 %v4789_v36, %v1331_v21 }
 0x186   : > { %3368 = vset.pattern.permute.xlu2 %v6054_v37  ;;  %v1436_v45 = vpop.permute.xlu1 %1435 }
 0x187   : > { %2685 = vperm.xlu2 %3368, %v6058_v7   ;;  %v1371_v33 = vadd.f32 %v1355_v48, %v1274_v16  ;;  %v1454_v18 = vmul.f32 %v5080_v49, %v1436_v45  ;;  %v6069_v16 = vld [vmem:[#allocation13_spill] sm:$0xff] }
 0x189   : > { %v5367_v24 = vadd.f32 %v1454_v18, %v6060_v58  ;;  %v1468_v62 = vadd.f32 %v1452_v26, %v1371_v33 }
 0x18b   : > { %2701 = vperm.xlu1 %3367, %v5192_v9  }
 0x18c   : > { %2833 = vperm.xlu0 %3369, %v5331_v35   ;;  %v2678_v13 = vpop.permute.xlu0 %2677 }
 0x18d   : > { %v5372_v39 = vpop.permute.xlu2 %1516 }
 0x18f   : > { %2693 = vperm.xlu2 %3368, %v5104_v0   ;;  %v1481_v29 = vpop.permute.xlu1 %1480 }
 0x190   : > { %v1538_v25 = vmul.f32 %v5307_v10, %v1481_v29 }
 0x192   : > { %v1554_v5 = vadd.f32 %v1538_v25, %v1457_v42  ;;  %v1536_v25 = vmul.f32 %v5307_v10, %v5280_v59 }
 0x193   : > { %2713 = vperm.xlu1 %3367, %v5251_v38  }
 0x194   : > { %3372 = vset.pattern.permute.xlu0 %v6062_v40  ;;  %v5379_v12 = vpop.permute.xlu0 %2697  ;;  %1571 = vst.msk [vmem:[%s5329_s4 + $0x10] sm:$0xff] %vm1568_vm2, %v1554_v5  ;;  %v6071_v5 = vld [vmem:[#allocation4_spill] sm:$0xff] }
 0x195   : > { %1476 = vperm.xlu0 %3372, %v6063_v28   ;;  %v5383_v56 = vpop.permute.xlu2 %1528 }
 0x197   : > { %2705 = vperm.xlu2 %3368, %v6061_v30   ;;  %v1489_v15 = vpop.permute.xlu1 %1488 }
 0x198   : > { %v1540_v37 = vmul.f32 %v5307_v10, %v1489_v15  ;;  %v2740_v15 = vmul.f32 %v2678_v13, %v4789_v36  ;;  %v1541_v13 = vmul.f32 %v5307_v10, %v5343_v57  ;;  %v1544_v57 = vmul.f32 %v5307_v10, %v5358_v11 }
 0x19a   : > { %v1556_v42 = vadd.f32 %v1540_v37, %v5139_v54 }
 0x19b   : > { %2725 = vperm.xlu1 %3367, %v5291_v55  }
 0x19c   : > { %v5390_v3 = vpop.permute.xlu0 %2709  ;;  %1573 = vst.msk [vmem:[%s5329_s4 + $0x20] sm:$0xff] %vm1568_vm2, %v1556_v42 }
 0x19d   : > { %1496 = vperm.xlu0 %3372, %v6065_v43   ;;  %v5397_v2 = vpop.permute.xlu2 %2587 }
 0x19f   : > { %2717 = vperm.xlu2 %3368, %v6064_v44   ;;  %v1501_v17 = vpop.permute.xlu1 %1500 }
 0x1a0   : > { %v1543_v50 = vmul.f32 %v5307_v10, %v1501_v17 }
 0x1a2   : > { %v1559_v20 = vadd.f32 %v1543_v50, %v1462_v1  ;;  %v6068_v1 = vld [vmem:[#allocation60_spill] sm:$0xff]  ;;  %v6072_v50 = vld [vmem:[#allocation6_spill] sm:$0xff] }
 0x1a3   : > { %2737 = vperm.xlu1 %3367, %v5331_v35  }
 0x1a4   : > { %v5400_v54 = vpop.permute.xlu0 %2721  ;;  %1576 = vst.msk [vmem:[%s5329_s4 + $0x38] sm:$0xff] %vm1568_vm2, %v1559_v20 }
 0x1a5   : > { %1508 = vperm.xlu0 %3372, %v6067_v4   ;;  %v5414_v45 = vpop.permute.xlu2 %2602 }
 0x1a7   : > { %2729 = vperm.xlu2 %3368, %v6066_v53   ;;  %v1513_v6 = vpop.permute.xlu1 %1512 }
 0x1a8   : > { %v1546_v21 = vmul.f32 %v5307_v10, %v1513_v6 }
 0x1aa   : > { %v1562_v32 = vadd.f32 %v1546_v21, %v1465_v34 }
 0x1ab   : > { %3371 = vset.pattern.permute.xlu1 %v5986_v47 }
 0x1ac   : > { %2781 = vperm.xlu1 %3371, %v6058_v7   ;;  %v5410_v48 = vpop.permute.xlu0 %2733  ;;  %1579 = vst.msk [vmem:[%s5329_s4 + $0x50] sm:$0xff] %vm1568_vm2, %v1562_v32 }
 0x1ad   : > { %1520 = vperm.xlu0 %3372, %v6069_v16   ;;  %v6073_v16 = vld [vmem:[#allocation43_spill] sm:$0xff] }
 0x1af   : > { %3370 = vset.pattern.permute.xlu2 %v5986_v47  ;;  %v1525_v26 = vpop.permute.xlu1 %1524  ;;  %v6070_v47 = vld [vmem:[#allocation20_spill] sm:$0xff] }
 0x1b0   : > { %2773 = vperm.xlu2 %3370, %v6068_v1   ;;  %v1549_v33 = vmul.f32 %v5307_v10, %v1525_v26 }
 0x1b2   : > { %v1565_v18 = vadd.f32 %v1549_v33, %v1468_v62 }
 0x1b4   : > { %2789 = vperm.xlu1 %3371, %v5104_v0   ;;  %1582 = vst.msk [vmem:[%s5329_s4 + $0x68] sm:$0xff] %vm1568_vm2, %v1565_v18 }
 0x1b5   : > { %1532 = vperm.xlu0 %3372, %v6070_v47  }
 0x1b6   : > { %v1376_v34 = vpop.permute.xlu0 %1375 }
 0x1b7   : > { %v1439_v58 = vmul.f32 %v5080_v49, %v1376_v34  ;;  %v2745_v34 = vmul.f32 %v5379_v12, %v4789_v36 }
 0x1b8   : > { %2785 = vperm.xlu2 %3370, %v5146_v31   ;;  %v5423_v29 = vpop.permute.xlu2 %2612  ;;  %v2583_v62 = vpop.permute.xlu1 %2582 }
 0x1b9   : > { %v1455_v28 = vadd.f32 %v1439_v58, %v6071_v5  ;;  %v2660_v37 = vmul.f32 %v2583_v62, %v4615_v41  ;;  %v1547_v5 = vmul.f32 %v5307_v10, %v5372_v39 }
 0x1bb   : > { %v1552_v42 = vadd.f32 %v1536_v25, %v1455_v28  ;;  %v5432_v43 = vadd.f32 %v2740_v15, %v2660_v37  ;;  %v6074_v28 = vld [vmem:[#allocation14_spill] sm:$0xff]  ;;  %v2748_v37 = vmul.f32 %v5390_v3, %v4789_v36  ;;  %v1550_v3 = vmul.f32 %v5307_v10, %v5383_v56 }
 0x1bc   : > { %2801 = vperm.xlu1 %3371, %v6061_v30   ;;  %v6075_v56 = vld [vmem:[#allocation42_spill] sm:$0xff] }
 0x1bd   : > { %1569 = vst.msk [vmem:[%s5329_s4] sm:$0xff] %vm1568_vm2, %v1552_v42  ;;  %2877 = vperm.xlu0 %3372, %v6058_v7  }
 0x1be   : > { %v1396_v59 = vpop.permute.xlu0 %1395 }
 0x1bf   : > { %v1444_v17 = vmul.f32 %v5080_v49, %v1396_v59 }
 0x1c0   : > { %2793 = vperm.xlu2 %3370, %v4825_v60  }
 0x1c1   : > { %v1460_v20 = vadd.f32 %v1444_v17, %v6072_v50 }
 0x1c3   : > { %v1557_v6 = vadd.f32 %v1541_v13, %v1460_v20 }
 0x1c4   : > { %v5441_v4 = vpop.permute.xlu2 %2627  ;;  %2813 = vperm.xlu1 %3371, %v6064_v44   ;;  %v5444_v21 = vpop.permute.xlu1 %2597 }
 0x1c5   : > { %1574 = vst.msk [vmem:[%s5329_s4 + $0x28] sm:$0xff] %vm1568_vm2, %v1557_v6  ;;  %2897 = vperm.xlu0 %3372, %v6061_v30   ;;  %v2751_v6 = vmul.f32 %v5400_v54, %v4789_v36 }
 0x1c6   : > { %v1408_v7 = vpop.permute.xlu0 %1407 }
 0x1c7   : > { %v1447_v32 = vmul.f32 %v5080_v49, %v1408_v7  ;;  %v2662_v7 = vmul.f32 %v6075_v56, %v4615_v41 }
 0x1c8   : > { %2805 = vperm.xlu2 %3370, %v4938_v63  }
 0x1c9   : > { %v1463_v26 = vadd.f32 %v1447_v32, %v6073_v16  ;;  %v2754_v16 = vmul.f32 %v5410_v48, %v4789_v36 }
 0x1cb   : > { %v1560_v18 = vadd.f32 %v1544_v57, %v1463_v26  ;;  %v2664_v26 = vmul.f32 %v5414_v45, %v4615_v41  ;;  %v6076_v45 = vld [vmem:[#allocation7_spill] sm:$0xff] }
 0x1cc   : > { %2825 = vperm.xlu1 %3371, %v6066_v53   ;;  %v2608_v47 = vpop.permute.xlu1 %2607 }
 0x1cd   : > { %v5454_v33 = vpop.permute.xlu2 %2642  ;;  %v2665_v30 = vmul.f32 %v2608_v47, %v4615_v41  ;;  %1577 = vst.msk [vmem:[%s5329_s4 + $0x40] sm:$0xff] %vm1568_vm2, %v1560_v18  ;;  %2909 = vperm.xlu0 %3372, %v6064_v44  }
 0x1ce   : > { %v1420_v11 = vpop.permute.xlu0 %1419 }
 0x1cf   : > { %v5464_v58 = vadd.f32 %v2745_v34, %v2665_v30  ;;  %v1450_v25 = vmul.f32 %v5080_v49, %v1420_v11  ;;  %v2661_v11 = vmul.f32 %v5397_v2, %v4615_v41 }
 0x1d0   : > { %2817 = vperm.xlu2 %3370, %v4932_v19  }
 0x1d1   : > { %v1466_v62 = vadd.f32 %v1450_v25, %v6074_v28  ;;  %v2667_v25 = vmul.f32 %v6076_v45, %v4615_v41 }
 0x1d3   : > { %v1563_v12 = vadd.f32 %v1547_v5, %v1466_v62 }
 0x1d4   : > { %3373 = vset.pattern.permute.xlu1 %v6062_v40  ;;  %v2623_v15 = vpop.permute.xlu1 %2622 }
 0x1d5   : > { %v2668_v42 = vmul.f32 %v2623_v15, %v4615_v41  ;;  %2869 = vperm.xlu1 %3373, %v6068_v1   ;;  %1580 = vst.msk [vmem:[%s5329_s4 + $0x58] sm:$0xff] %vm1568_vm2, %v1563_v12  ;;  %2921 = vperm.xlu0 %3372, %v6066_v53  }
 0x1d6   : > { %v1432_v39 = vpop.permute.xlu0 %1431 }
 0x1d7   : > { %v5481_v59 = vadd.f32 %v2748_v37, %v2668_v42  ;;  %v1453_v17 = vmul.f32 %v5080_v49, %v1432_v39  ;;  %v2670_v39 = vmul.f32 %v5196_v22, %v4615_v41  ;;  %v2673_v22 = vmul.f32 %v5246_v27, %v4615_v41 }
 0x1d8   : > { %2829 = vperm.xlu2 %3370, %v4995_v52   ;;  %v5474_v44 = vpop.permute.xlu2 %2657 }
 0x1d9   : > { %v1469_v13 = vadd.f32 %v1453_v17, %v5190_v14 }
 0x1db   : > { %v1566_v50 = vadd.f32 %v1550_v3, %v1469_v13 }
 0x1dc   : > { %v2638_v20 = vpop.permute.xlu1 %2637 }
 0x1dd   : > { %v2671_v1 = vmul.f32 %v2638_v20, %v4615_v41  ;;  %2881 = vperm.xlu1 %3373, %v5146_v31   ;;  %1583 = vst.msk [vmem:[%s5329_s4 + $0x70] sm:$0xff] %vm1568_vm2, %v1566_v50 }
 0x1de   : > { %v2778_v14 = vpop.permute.xlu0 %2777 }
 0x1df   : > { %v5498_v57 = vadd.f32 %v2751_v6, %v2671_v1  ;;  %v2837_v62 = vmul.f32 %v2778_v14, %v5080_v49 }
 0x1e0   : > { %3374 = vset.pattern.permute.xlu2 %v6062_v40 }
 0x1e1   : > { %2873 = vperm.xlu2 %3374, %v5042_v23   ;;  %v2686_v53 = vpop.permute.xlu2 %2685 }
 0x1e2   : > { %v2742_v32 = vmul.f32 %v2686_v53, %v4789_v36 }
 0x1e4   : > { %v5500_v54 = vadd.f32 %v2742_v32, %v2662_v7  ;;  %v2653_v40 = vpop.permute.xlu1 %2652 }
 0x1e5   : > { %v2674_v31 = vmul.f32 %v2653_v40, %v4615_v41  ;;  %2889 = vperm.xlu1 %3373, %v4825_v60  }
 0x1e6   : > { %v2798_v18 = vpop.permute.xlu0 %2797 }
 0x1e7   : > { %v5510_v34 = vadd.f32 %v2754_v16, %v2674_v31  ;;  %v2842_v53 = vmul.f32 %v2798_v18, %v5080_v49 }
 0x1e9   : > { %2885 = vperm.xlu2 %3374, %v5104_v0   ;;  %v2694_v23 = vpop.permute.xlu2 %2693 }
 0x1ea   : > { %v2744_v47 = vmul.f32 %v2694_v23, %v4789_v36 }
 0x1ec   : > { %v5512_v30 = vadd.f32 %v2744_v47, %v2664_v26 }
 0x1ed   : > { %2901 = vperm.xlu1 %3373, %v4938_v63   ;;  %v2682_v48 = vpop.permute.xlu1 %2681 }
 0x1ee   : > { %v2741_v0 = vmul.f32 %v2682_v48, %v4789_v36  ;;  %v2810_v5 = vpop.permute.xlu0 %2809 }
 0x1ef   : > { %v2845_v32 = vmul.f32 %v2810_v5, %v5080_v49 }
 0x1f0   : > { %v2757_v12 = vadd.f32 %v2741_v0, %v2661_v11 }
 0x1f1   : > { %2893 = vperm.xlu2 %3374, %v5192_v9   ;;  %v2706_v60 = vpop.permute.xlu2 %2705  ;;  %v2663_v9 = vmul.f32 %v5444_v21, %v4615_v41  ;;  %v2666_v21 = vmul.f32 %v5423_v29, %v4615_v41 }
 0x1f2   : > { %v2747_v28 = vmul.f32 %v2706_v60, %v4789_v36  ;;  %v5525_v63 = vadd.f32 %v2837_v62, %v2757_v12 }
 0x1f4   : > { %v5523_v15 = vadd.f32 %v2747_v28, %v2667_v25 }
 0x1f5   : > { %2913 = vperm.xlu1 %3373, %v4932_v19   ;;  %v2690_v2 = vpop.permute.xlu1 %2689 }
 0x1f6   : > { %v2743_v42 = vmul.f32 %v2690_v2, %v4789_v36  ;;  %v2822_v17 = vpop.permute.xlu0 %2821 }
 0x1f7   : > { %v2848_v48 = vmul.f32 %v2822_v17, %v5080_v49 }
 0x1f8   : > { %v5535_v13 = vadd.f32 %v2743_v42, %v2663_v9 }
 0x1f9   : > { %2905 = vperm.xlu2 %3374, %v5251_v38   ;;  %v2718_v37 = vpop.permute.xlu2 %2717 }
 0x1fa   : > { %v2750_v3 = vmul.f32 %v2718_v37, %v4789_v36 }
 0x1fc   : > { %v5537_v50 = vadd.f32 %v2750_v3, %v2670_v39 }
 0x1fd   : > { %2925 = vperm.xlu1 %3373, %v4995_v52   ;;  %v2702_v19 = vpop.permute.xlu1 %2701 }
 0x1fe   : > { %v2746_v20 = vmul.f32 %v2702_v19, %v4789_v36  ;;  %v2834_v6 = vpop.permute.xlu0 %2833 }
 0x1ff   : > { %v2851_v62 = vmul.f32 %v2834_v6, %v5080_v49 }
 0x200   : > { %v2762_v56 = vadd.f32 %v2746_v20, %v2666_v21 }
 0x201   : > { %2917 = vperm.xlu2 %3374, %v5291_v55   ;;  %v2730_v38 = vpop.permute.xlu2 %2729  ;;  %v2669_v55 = vmul.f32 %v5441_v4, %v4615_v41 }
 0x202   : > { %v2753_v1 = vmul.f32 %v2730_v38, %v4789_v36  ;;  %v5550_v7 = vadd.f32 %v2842_v53, %v2762_v56 }
 0x204   : > { %v5548_v52 = vadd.f32 %v2753_v1, %v2673_v22 }
 0x205   : > { %v2714_v29 = vpop.permute.xlu1 %2713 }
 0x206   : > { %v2749_v14 = vmul.f32 %v2714_v29, %v4789_v36 }
 0x207   : > { %v1477_v40 = vpop.permute.xlu0 %1476 }
 0x208   : > { %v2765_v16 = vadd.f32 %v2749_v14, %v2669_v55  ;;  %v1537_v31 = vmul.f32 %v5307_v10, %v1477_v40 }
 0x209   : > { %2929 = vperm.xlu2 %3374, %v5331_v35   ;;  %v2672_v35 = vmul.f32 %v5454_v33, %v4615_v41  ;;  %v2675_v33 = vmul.f32 %v5474_v44, %v4615_v41 }
 0x20a   : > { %v5556_v27 = vpop.permute.xlu2 %2773  ;;  %v5560_v23 = vadd.f32 %v2845_v32, %v2765_v16  ;;  %v1553_v26 = vadd.f32 %v1537_v31, %v5237_v51 }
 0x20c   : > { %1570 = vst.msk [vmem:[%s5329_s4 + $0x8] sm:$0xff] %vm1568_vm2, %v1553_v26 }
 0x20d   : > { %v2726_v4 = vpop.permute.xlu1 %2725 }
 0x20e   : > { %v2752_v18 = vmul.f32 %v2726_v4, %v4789_v36 }
 0x20f   : > { %v1497_v11 = vpop.permute.xlu0 %1496 }
 0x210   : > { %v2768_v60 = vadd.f32 %v2752_v18, %v2672_v35  ;;  %v1542_v0 = vmul.f32 %v5307_v10, %v1497_v11 }
 0x212   : > { %v5568_v47 = vpop.permute.xlu2 %2785  ;;  %v5572_v45 = vadd.f32 %v2848_v48, %v2768_v60  ;;  %v1558_v51 = vadd.f32 %v1542_v0, %v5310_v61 }
 0x214   : > { %1575 = vst.msk [vmem:[%s5329_s4 + $0x30] sm:$0xff] %vm1568_vm2, %v1558_v51 }
 0x215   : > { %v2738_v25 = vpop.permute.xlu1 %2737 }
 0x216   : > { %v2755_v5 = vmul.f32 %v2738_v25, %v4789_v36  ;;  %v2836_v25 = vmul.f32 %v5556_v27, %v5080_v49 }
 0x217   : > { %v1509_v12 = vpop.permute.xlu0 %1508 }
 0x218   : > { %v2771_v2 = vadd.f32 %v2755_v5, %v2675_v33  ;;  %v1545_v9 = vmul.f32 %v5307_v10, %v1509_v12  ;;  %v2852_v33 = vadd.f32 %v2836_v25, %v5432_v43 }
 0x21a   : > { %v5580_v28 = vpop.permute.xlu2 %2793  ;;  %v5584_v37 = vadd.f32 %v2851_v62, %v2771_v2  ;;  %v1561_v61 = vadd.f32 %v1545_v9, %v5339_v8 }
 0x21c   : > { %1578 = vst.msk [vmem:[%s5329_s4 + $0x48] sm:$0xff] %vm1568_vm2, %v1561_v61 }
 0x21e   : > { %v2782_v42 = vpop.permute.xlu1 %2781 }
 0x21f   : > { %v1521_v41 = vpop.permute.xlu0 %1520  ;;  %v2838_v38 = vmul.f32 %v2782_v42, %v5080_v49 }
 0x220   : > { %v1548_v36 = vmul.f32 %v5307_v10, %v1521_v41 }
 0x221   : > { %v2854_v22 = vadd.f32 %v2838_v38, %v5500_v54 }
 0x222   : > { %v5589_v39 = vpop.permute.xlu2 %2805  ;;  %v1564_v44 = vadd.f32 %v1548_v36, %v5353_v46 }
 0x224   : > { %1581 = vst.msk [vmem:[%s5329_s4 + $0x60] sm:$0xff] %vm1568_vm2, %v1564_v44 }
 0x226   : > { %v2790_v17 = vpop.permute.xlu1 %2789 }
 0x227   : > { %v1533_v19 = vpop.permute.xlu0 %1532  ;;  %v2840_v26 = vmul.f32 %v2790_v17, %v5080_v49 }
 0x228   : > { %v1551_v21 = vmul.f32 %v5307_v10, %v1533_v19 }
 0x229   : > { %v2856_v48 = vadd.f32 %v2840_v26, %v5512_v30 }
 0x22a   : > { %v5595_v3 = vpop.permute.xlu2 %2817  ;;  %v1567_v8 = vadd.f32 %v1551_v21, %v5367_v24 }
 0x22c   : > { %1584 = vst.msk [vmem:[%s5329_s4 + $0x78] sm:$0xff] %vm1568_vm2, %v1567_v8 }
 0x22e   : > { %v2802_v20 = vpop.permute.xlu1 %2801 }
 0x22f   : > { %v2878_v46 = vpop.permute.xlu0 %2877  ;;  %v2843_v56 = vmul.f32 %v2802_v20, %v5080_v49 }
 0x230   : > { %v2934_v1 = vmul.f32 %v2878_v46, %v5307_v10 }
 0x231   : > { %v2859_v29 = vadd.f32 %v2843_v56, %v5523_v15 }
 0x232   : > { %v5603_v6 = vpop.permute.xlu2 %2829  ;;  %v2950_v53 = vadd.f32 %v2934_v1, %v2854_v22 }
 0x234   : > { %3206 = vst.msk [vmem:[%s5329_s4 + $0x90] sm:$0xff] %vm1568_vm2, %v2950_v53 }
 0x236   : > { %v2814_v24 = vpop.permute.xlu1 %2813 }
 0x237   : > { %v2898_v55 = vpop.permute.xlu0 %2897  ;;  %v2846_v31 = vmul.f32 %v2814_v24, %v5080_v49 }
 0x238   : > { %v2939_v32 = vmul.f32 %v2898_v55, %v5307_v10 }
 0x239   : > { %v2862_v4 = vadd.f32 %v2846_v31, %v5537_v50 }
 0x23a   : > { %v2955_v40 = vadd.f32 %v2939_v32, %v2859_v29  ;;  %v2850_v32 = vmul.f32 %v5603_v6, %v5080_v49 }
 0x23b   : > { %v2874_v14 = vpop.permute.xlu2 %2873 }
 0x23c   : > { %v2933_v54 = vmul.f32 %v2874_v14, %v5307_v10  ;;  %3211 = vst.msk [vmem:[%s5329_s4 + $0xb8] sm:$0xff] %vm1568_vm2, %v2955_v40 }
 0x23e   : > { %v2949_v16 = vadd.f32 %v2933_v54, %v5525_v63  ;;  %v2826_v15 = vpop.permute.xlu1 %2825 }
 0x23f   : > { %v2910_v35 = vpop.permute.xlu0 %2909  ;;  %v2849_v51 = vmul.f32 %v2826_v15, %v5080_v49 }
 0x240   : > { %3205 = vst.msk [vmem:[%s5329_s4 + $0x88] sm:$0xff] %vm1568_vm2, %v2949_v16  ;;  %v2942_v11 = vmul.f32 %v2910_v35, %v5307_v10 }
 0x241   : > { %v2865_v30 = vadd.f32 %v2849_v51, %v5548_v52  ;;  %v2839_v52 = vmul.f32 %v5568_v47, %v5080_v49  ;;  %v2841_v47 = vmul.f32 %v5580_v28, %v5080_v49  ;;  %v2844_v28 = vmul.f32 %v5589_v39, %v5080_v49 }
 0x242   : > { %v2958_v60 = vadd.f32 %v2942_v11, %v2862_v4  ;;  %v2847_v39 = vmul.f32 %v5595_v3, %v5080_v49 }
 0x243   : > { %v2886_v18 = vpop.permute.xlu2 %2885  ;;  %v2855_v41 = vadd.f32 %v2839_v52, %v5535_v13  ;;  %v2857_v13 = vadd.f32 %v2841_v47, %v5464_v58  ;;  %v2860_v58 = vadd.f32 %v2844_v28, %v5481_v59 }
 0x244   : > { %v2936_v63 = vmul.f32 %v2886_v18, %v5307_v10  ;;  %3214 = vst.msk [vmem:[%s5329_s4 + $0xd0] sm:$0xff] %vm1568_vm2, %v2958_v60  ;;  %v2863_v55 = vadd.f32 %v2847_v39, %v5498_v57 }
 0x246   : > { %v2952_v0 = vadd.f32 %v2936_v63, %v2856_v48 }
 0x247   : > { %v2870_v50 = vpop.permute.xlu1 %2869  ;;  %v2922_v5 = vpop.permute.xlu0 %2921 }
 0x248   : > { %3208 = vst.msk [vmem:[%s5329_s4 + $0xa0] sm:$0xff] %vm1568_vm2, %v2952_v0  ;;  %v2932_v12 = vmul.f32 %v2870_v50, %v5307_v10  ;;  %v2945_v2 = vmul.f32 %v2922_v5, %v5307_v10 }
 0x24a   : > { %v2948_v27 = vadd.f32 %v2932_v12, %v2852_v33  ;;  %v2961_v61 = vadd.f32 %v2945_v2, %v2865_v30 }
 0x24b   : > { %v2894_v62 = vpop.permute.xlu2 %2893 }
 0x24c   : > { %v2938_v9 = vmul.f32 %v2894_v62, %v5307_v10  ;;  %3204 = vst.msk [vmem:[%s5329_s4 + $0x80] sm:$0xff] %vm1568_vm2, %v2948_v27 }
 0x24d   : > { %3217 = vst.msk [vmem:[%s5329_s4 + $0xe8] sm:$0xff] %vm1568_vm2, %v2961_v61 }
 0x24e   : > { %v2954_v42 = vadd.f32 %v2938_v9, %v5550_v7 }
 0x24f   : > { %v2882_v43 = vpop.permute.xlu1 %2881 }
 0x250   : > { %3210 = vst.msk [vmem:[%s5329_s4 + $0xb0] sm:$0xff] %vm1568_vm2, %v2954_v42  ;;  %v2935_v44 = vmul.f32 %v2882_v43, %v5307_v10 }
 0x252   : > { %v2951_v7 = vadd.f32 %v2935_v44, %v2855_v41 }
 0x253   : > { %v2906_v36 = vpop.permute.xlu2 %2905 }
 0x254   : > { %v2941_v17 = vmul.f32 %v2906_v36, %v5307_v10  ;;  %3207 = vst.msk [vmem:[%s5329_s4 + $0x98] sm:$0xff] %vm1568_vm2, %v2951_v7 }
 0x256   : > { %v2957_v19 = vadd.f32 %v2941_v17, %v5560_v23 }
 0x257   : > { %v2890_v21 = vpop.permute.xlu1 %2889 }
 0x258   : > { %3213 = vst.msk [vmem:[%s5329_s4 + $0xc8] sm:$0xff] %vm1568_vm2, %v2957_v19  ;;  %v2937_v38 = vmul.f32 %v2890_v21, %v5307_v10 }
 0x25a   : > { %v2953_v22 = vadd.f32 %v2937_v38, %v2857_v13 }
 0x25b   : > { %v2918_v8 = vpop.permute.xlu2 %2917 }
 0x25c   : > { %v2944_v20 = vmul.f32 %v2918_v8, %v5307_v10  ;;  %3209 = vst.msk [vmem:[%s5329_s4 + $0xa8] sm:$0xff] %vm1568_vm2, %v2953_v22 }
 0x25e   : > { %v2960_v23 = vadd.f32 %v2944_v20, %v5572_v45 }
 0x25f   : > { %v2902_v46 = vpop.permute.xlu1 %2901 }
 0x260   : > { %3216 = vst.msk [vmem:[%s5329_s4 + $0xe0] sm:$0xff] %vm1568_vm2, %v2960_v23  ;;  %v2940_v53 = vmul.f32 %v2902_v46, %v5307_v10 }
 0x262   : > { %v2956_v24 = vadd.f32 %v2940_v53, %v2860_v58 }
 0x263   : > { %v2930_v1 = vpop.permute.xlu2 %2929 }
 0x264   : > { %v2947_v56 = vmul.f32 %v2930_v1, %v5307_v10  ;;  %3212 = vst.msk [vmem:[%s5329_s4 + $0xc0] sm:$0xff] %vm1568_vm2, %v2956_v24 }
 0x266   : > { %v2963_v45 = vadd.f32 %v2947_v56, %v5584_v37  ;;  %v2866_v37 = vadd.f32 %v2850_v32, %v5510_v34 }
 0x267   : > { %v2914_v29 = vpop.permute.xlu1 %2913 }
 0x268   : > { %3219 = vst.msk [vmem:[%s5329_s4 + $0xf8] sm:$0xff] %vm1568_vm2, %v2963_v45  ;;  %v2943_v59 = vmul.f32 %v2914_v29, %v5307_v10 }
 0x26a   : > { %v2959_v14 = vadd.f32 %v2943_v59, %v2863_v55 }
 0x26c   : > { %3215 = vst.msk [vmem:[%s5329_s4 + $0xd8] sm:$0xff] %vm1568_vm2, %v2959_v14 }
 0x26f   : > { %v2926_v54 = vpop.permute.xlu1 %2925 }
 0x270   : > { %v2946_v3 = vmul.f32 %v2926_v54, %v5307_v10 }
 0x272   : > { %v2962_v40 = vadd.f32 %v2946_v3, %v2866_v37 }
 0x274   : > { %3218 = vst.msk [vmem:[%s5329_s4 + $0xf0] sm:$0xff] %vm1568_vm2, %v2962_v40 }
 0x275 PF: > { %s13_s12 = sadd.s32 1, %s3386_s12  }
 0x276   : > { %p10_p4 = scmp.ge.s32.totalorder %s13_s12, 4  }
 0x278   :  { %12 = sbr.rel (!%p10_p4) target bundleno = 1 (0x1), region = 68 }

</bundles_post_ra>
